<compile_context>
chip_gen: v6e
topology: v6e:2x2x1
jax: 0.10.0
libtpu: 0.0.40
codegen_flags: <defaults>
</compile_context>

<pallas_src>
import jax
import jax.numpy as jnp
from jax import lax
from jax.experimental import pallas as pl
from jax.experimental.pallas import tpu as pltpu

DIM_PROJ = 32          # dim_proj (feature size)
DIM_FNN = 256          # dim_FNN (fixed in the module)
SEQ_LEN = 100          # hard-coded in the reference (.view(-1, 100, dim_per_head))
BATCH = 2


# --------------------------------------------------------------------------
# feature-last helpers (wrapper / pure-JAX reference)
# --------------------------------------------------------------------------
def _stable_softmax(a):
    a = a - jnp.max(a, axis=-1, keepdims=True)
    e = jnp.exp(a)
    return e / jnp.sum(e, axis=-1, keepdims=True)


def _nn_layer_norm(y, g, b, eps=1e-5):
    # torch.nn.LayerNorm: biased variance, eps inside the sqrt.
    mu = jnp.mean(y, axis=-1, keepdims=True)
    var = jnp.mean((y - mu) ** 2, axis=-1, keepdims=True)
    return (y - mu) / jnp.sqrt(var + eps) * g + b


def _custom_layer_norm(y, a2, b2, eps=1e-6):
    # reference LayerNorm class: unbiased std (Bessel), eps added to std.
    d = y.shape[-1]
    mu = jnp.mean(y, axis=-1, keepdims=True)
    var = jnp.sum((y - mu) ** 2, axis=-1, keepdims=True) / (d - 1)
    return a2 * (y - mu) / (jnp.sqrt(var) + eps) + b2


# --------------------------------------------------------------------------
# feature-major helpers (kernel side: feature axis = axis 0 of a (D, L) tile)
# --------------------------------------------------------------------------
def _nn_layer_norm_fm(y, g, b, eps=1e-5):
    mu = jnp.mean(y, axis=0, keepdims=True)
    var = jnp.mean((y - mu) ** 2, axis=0, keepdims=True)
    return (y - mu) * lax.rsqrt(var + eps) * g + b      # rsqrt -> EUP


def _custom_layer_norm_fm(y, a2, b2, eps=1e-6):
    d = y.shape[0]
    mu = jnp.mean(y, axis=0, keepdims=True)
    var = jnp.sum((y - mu) ** 2, axis=0, keepdims=True) / (d - 1)
    inv = pl.reciprocal(jnp.sqrt(var) + eps, approx=False)   # EUP path
    return a2 * (y - mu) * inv + b2


# --------------------------------------------------------------------------
# fused kernel
# --------------------------------------------------------------------------
def _encoder_block_kernel(
    x_ref, attnT_ref,
    wv_ref, bv_ref,            # multi_head_attention.linear_value   (out,in)/(out,1)
    wfc_ref, bfc_ref,          # multi_head_attention.fc
    g_mha_ref, b_mha_ref,      # multi_head_attention.layer_norm (nn.LayerNorm), (D,1)
    w1_ref, b1_ref,            # w_1 : Conv1d(dim_proj -> dim_FNN, k=1)
    w2_ref, b2_ref,            # w_2 : Conv1d(dim_FNN -> dim_proj, k=1)
    a_int_ref, b_int_ref,      # layer_norm_intermediate (custom)
    wc_ref, bc_ref,            # linear_proj_context
    a_ctx_ref, b_ctx_ref,      # layer_norm_context (custom)
    wfnn_ref, bfnn_ref,        # position_wise_fnn
    wint_ref, bint_ref,        # linear_proj_intermediate
    a_fin_ref, b_fin_ref,      # layer_norm_final (custom)
    out_ref,
):
    nb = x_ref.shape[0]        # static (1 on v7x path, B on flattened path)
    for b in range(nb):
        xT = x_ref[b]          # (D, L)  -- x transposed (feature-major)
        attnT = attnT_ref[b]   # (L, L)  -- attention matrix transposed

        # ---- Multi_Head_Attention (Q/K projections are dead code) --------
        vT = jnp.dot(wv_ref[...], xT, preferred_element_type=jnp.float32) + bv_ref[...]
        ctx0T = jnp.dot(vT, attnT, preferred_element_type=jnp.float32)          # (attn @ v)^T
        oT = jnp.dot(wfc_ref[...], ctx0T, preferred_element_type=jnp.float32) + bfc_ref[...]
        mhaT = _nn_layer_norm_fm(oT + xT, g_mha_ref[...], b_mha_ref[...])

        # ---- position-wise conv block (Conv1d k=1 == pointwise linear) ----
        hT = jnp.dot(w1_ref[...], mhaT, preferred_element_type=jnp.float32) + b1_ref[...]
        hT = jnp.maximum(hT, 0.0)
        hT = jnp.dot(w2_ref[...], hT, preferred_element_type=jnp.float32) + b2_ref[...]
        ctxT = _custom_layer_norm_fm(hT + mhaT, a_int_ref[...], b_int_ref[...])

        # ---- fused context projection: LN((x+ctx)@Wc + 2b) ----------------
        sT = (jnp.dot(wc_ref[...], xT + ctxT, preferred_element_type=jnp.float32)
              + 2.0 * bc_ref[...])
        resT = _custom_layer_norm_fm(sT, a_ctx_ref[...], b_ctx_ref[...])

        # ---- position-wise FFN --------------------------------------------
        rT = jnp.dot(wfnn_ref[...], resT, preferred_element_type=jnp.float32) + bfnn_ref[...]
        rT = jnp.maximum(rT, 0.0)
        rT = jnp.dot(wint_ref[...], rT, preferred_element_type=jnp.float32) + bint_ref[...]
        out_ref[b] = _custom_layer_norm_fm(rT + resT, a_fin_ref[...], b_fin_ref[...])


def transformer_encoder_block(inp, mask, gate, params):
    # `gate` is accepted for signature parity but is dead in the reference
    # forward (attn is overwritten by the mask before softmax).
    del gate
    B, L, D = inp.shape
    F = params[6].shape[1]     # w1: (D, F)

    # Attention matrix depends only on the mask -> precompute in plain XLA.
    attn = jnp.where(mask == 0.0, jnp.float32(1e-8), mask)
    attn = _stable_softmax(attn)                    # (B, L, L)
    attn_t = jnp.swapaxes(attn, 1, 2)               # attn^T per batch
    x_t = jnp.swapaxes(inp, 1, 2)                   # (B, D, L): L on lanes

    # Feature-major parameter views: weights (out, in), biases/LN params (out, 1).
    kparams = [jnp.transpose(p) for p in params]

    # Grid choice: v7x has 2 TensorCores -> shard batch across them; v5e/v6e
    # are single-TC -> one grid step, loop the (tiny) batch in-kernel.
    try:
        kind = jax.devices()[0].device_kind.lower()
    except Exception:
        kind = ""
    n_tc = 2 if "v7" in kind else 1
    bblk = 1 if (n_tc > 1 and B % n_tc == 0) else B
    grid = (B // bblk,)

    in_specs = [
        pl.BlockSpec((bblk, D, L), lambda i: (i, 0, 0)),
        pl.BlockSpec((bblk, L, L), lambda i: (i, 0, 0)),
    ]
    for p in kparams:
        in_specs.append(pl.BlockSpec(p.shape, lambda i, n=p.ndim: (0,) * n))

    flops = int(2 * B * L * (3 * D * D + D * L + 4 * D * F))
    bytes_accessed = int(4 * (x_t.size + attn_t.size + x_t.size
                              + sum(int(p.size) for p in kparams)))

    out_t = pl.pallas_call(
        _encoder_block_kernel,
        out_shape=jax.ShapeDtypeStruct((B, D, L), jnp.float32),
        grid=grid,
        in_specs=in_specs,
        out_specs=pl.BlockSpec((bblk, D, L), lambda i: (i, 0, 0)),
        compiler_params=pltpu.CompilerParams(
            dimension_semantics=("parallel",)),
        cost_estimate=pl.CostEstimate(
            flops=flops,
            transcendentals=int(8 * B * L),
            bytes_accessed=bytes_accessed),
    )(x_t, attn_t, *kparams)

    return jnp.swapaxes(out_t, 1, 2)                # back to (B, L, D)


# --------------------------------------------------------------------------
# synthetic parameters + pure-JAX reference for validation
# --------------------------------------------------------------------------
def init_params(key, dim_proj=DIM_PROJ, dim_fnn=DIM_FNN):
    """Deterministic synthetic parameters; shapes follow the module's __init__.

    Linear/Conv weights are stored as (in, out) so the reference computes
    x @ W + b (equivalent to PyTorch's x @ weight.T + bias)."""
    ks = jax.random.split(key, 8)

    def lin(k, din, dout, scale):
        kw, kb = jax.random.split(k)
        w = jax.random.normal(kw, (din, dout), jnp.float32) * scale
        b = jax.random.normal(kb, (1, dout), jnp.float32) * 0.01
        return w, b

    wv, bv = lin(ks[0], dim_proj, dim_proj, 0.1)      # mha.linear_value
    wfc, bfc = lin(ks[1], dim_proj, dim_proj, 0.1)    # mha.fc
    g_mha = jnp.ones((1, dim_proj), jnp.float32)      # nn.LayerNorm defaults
    b_mha = jnp.zeros((1, dim_proj), jnp.float32)
    w1, b1 = lin(ks[2], dim_proj, dim_fnn, 0.1)       # w_1 (Conv1d k=1)
    w2, b2 = lin(ks[3], dim_fnn, dim_proj, 0.05)      # w_2 (Conv1d k=1)
    a_int = jnp.ones((1, dim_proj), jnp.float32)      # custom LayerNorm defaults
    b_int = jnp.zeros((1, dim_proj), jnp.float32)
    wc, bc = lin(ks[4], dim_proj, dim_proj, 0.1)      # linear_proj_context
    a_ctx = jnp.ones((1, dim_proj), jnp.float32)
    b_ctx = jnp.zeros((1, dim_proj), jnp.float32)
    wfnn, bfnn = lin(ks[5], dim_proj, dim_fnn, 0.1)   # position_wise_fnn
    wint, bint = lin(ks[6], dim_fnn, dim_proj, 0.05)  # linear_proj_intermediate
    a_fin = jnp.ones((1, dim_proj), jnp.float32)
    b_fin = jnp.zeros((1, dim_proj), jnp.float32)

    return (wv, bv, wfc, bfc, g_mha, b_mha, w1, b1, w2, b2,
            a_int, b_int, wc, bc, a_ctx, b_ctx,
            wfnn, bfnn, wint, bint, a_fin, b_fin)


def reference_jax(inp, mask, gate, params):
    """Pure-JAX reference of the same (inference-mode) forward for validation."""
    (wv, bv, wfc, bfc, g_mha, b_mha, w1, b1, w2, b2,
     a_int, b_int, wc, bc, a_ctx, b_ctx,
     wfnn, bfnn, wint, bint, a_fin, b_fin) = params
    del gate
    v = inp @ wv + bv
    attn = jnp.where(mask == 0.0, jnp.float32(1e-8), mask)
    attn = _stable_softmax(attn)
    o = jnp.einsum("blk,bkd->bld", attn, v) @ wfc + bfc
    mha = _nn_layer_norm(o + inp, g_mha, b_mha)
    h = jnp.maximum(mha @ w1 + b1, 0.0) @ w2 + b2
    ctx = _custom_layer_norm(h + mha, a_int, b_int)
    res_inp = _custom_layer_norm((inp @ wc + bc) + (ctx @ wc + bc), a_ctx, b_ctx)
    r = jnp.maximum(res_inp @ wfnn + bfnn, 0.0) @ wint + bint
    return _custom_layer_norm(r + res_inp, a_fin, b_fin)


if __name__ == "__main__":
    key = jax.random.PRNGKey(0)
    k_inp, k_mask, k_gate, k_par = jax.random.split(key, 4)

    inp = jax.random.normal(k_inp, (BATCH, SEQ_LEN, DIM_PROJ), jnp.float32)
    mask = (jax.random.uniform(k_mask, (BATCH, SEQ_LEN, SEQ_LEN)) > 0.3).astype(jnp.float32)
    gate = jax.random.uniform(k_gate, (BATCH, SEQ_LEN, SEQ_LEN), jnp.float32)
    params = init_params(k_par)

    out = transformer_encoder_block(inp, mask, gate, params)
    jax.block_until_ready(out)

    ref = reference_jax(inp, mask, gate, params)
    assert jnp.allclose(out, ref, atol=2e-3, rtol=2e-3), "mismatch vs JAX reference"
    print("KERNEL_OK")
</pallas_src>

<mosaic_0001>
module attributes {stable_mosaic.version = 11 : i64} {
  func.func @_encoder_block_kernel(%arg0: i32, %arg1: memref<2x32x100xf32, #tpu.memory_space<vmem>>, %arg2: memref<2x100x100xf32, #tpu.memory_space<vmem>>, %arg3: memref<32x32xf32, #tpu.memory_space<vmem>>, %arg4: memref<32x1xf32, #tpu.memory_space<vmem>>, %arg5: memref<32x32xf32, #tpu.memory_space<vmem>>, %arg6: memref<32x1xf32, #tpu.memory_space<vmem>>, %arg7: memref<32x1xf32, #tpu.memory_space<vmem>>, %arg8: memref<32x1xf32, #tpu.memory_space<vmem>>, %arg9: memref<256x32xf32, #tpu.memory_space<vmem>>, %arg10: memref<256x1xf32, #tpu.memory_space<vmem>>, %arg11: memref<32x256xf32, #tpu.memory_space<vmem>>, %arg12: memref<32x1xf32, #tpu.memory_space<vmem>>, %arg13: memref<32x1xf32, #tpu.memory_space<vmem>>, %arg14: memref<32x1xf32, #tpu.memory_space<vmem>>, %arg15: memref<32x32xf32, #tpu.memory_space<vmem>>, %arg16: memref<32x1xf32, #tpu.memory_space<vmem>>, %arg17: memref<32x1xf32, #tpu.memory_space<vmem>>, %arg18: memref<32x1xf32, #tpu.memory_space<vmem>>, %arg19: memref<256x32xf32, #tpu.memory_space<vmem>>, %arg20: memref<256x1xf32, #tpu.memory_space<vmem>>, %arg21: memref<32x256xf32, #tpu.memory_space<vmem>>, %arg22: memref<32x1xf32, #tpu.memory_space<vmem>>, %arg23: memref<32x1xf32, #tpu.memory_space<vmem>>, %arg24: memref<32x1xf32, #tpu.memory_space<vmem>>, %arg25: memref<2x32x100xf32, #tpu.memory_space<vmem>>) attributes {dimension_semantics = [#tpu.dimension_semantics<parallel>], iteration_bounds = array<i64: 1>, scalar_prefetch = 0 : i64, scratch_operands = 0 : i64, tpu.core_type = #tpu.core_type<tc>, window_params = [{transform_indices = @transform_0, window_bounds = array<i64: 2, 32, 100>}, {transform_indices = @transform_1, window_bounds = array<i64: 2, 100, 100>}, {pipeline_mode = #tpu.pipeline_mode<synchronous>, transform_indices = @transform_2, window_bounds = array<i64: 32, 32>}, {pipeline_mode = #tpu.pipeline_mode<synchronous>, transform_indices = @transform_3, window_bounds = array<i64: 32, 1>}, {pipeline_mode = #tpu.pipeline_mode<synchronous>, transform_indices = @transform_4, window_bounds = array<i64: 32, 32>}, {pipeline_mode = #tpu.pipeline_mode<synchronous>, transform_indices = @transform_5, window_bounds = array<i64: 32, 1>}, {pipeline_mode = #tpu.pipeline_mode<synchronous>, transform_indices = @transform_6, window_bounds = array<i64: 32, 1>}, {pipeline_mode = #tpu.pipeline_mode<synchronous>, transform_indices = @transform_7, window_bounds = array<i64: 32, 1>}, {pipeline_mode = #tpu.pipeline_mode<synchronous>, transform_indices = @transform_8, window_bounds = array<i64: 256, 32>}, {pipeline_mode = #tpu.pipeline_mode<synchronous>, transform_indices = @transform_9, window_bounds = array<i64: 256, 1>}, {pipeline_mode = #tpu.pipeline_mode<synchronous>, transform_indices = @transform_10, window_bounds = array<i64: 32, 256>}, {pipeline_mode = #tpu.pipeline_mode<synchronous>, transform_indices = @transform_11, window_bounds = array<i64: 32, 1>}, {pipeline_mode = #tpu.pipeline_mode<synchronous>, transform_indices = @transform_12, window_bounds = array<i64: 32, 1>}, {pipeline_mode = #tpu.pipeline_mode<synchronous>, transform_indices = @transform_13, window_bounds = array<i64: 32, 1>}, {pipeline_mode = #tpu.pipeline_mode<synchronous>, transform_indices = @transform_14, window_bounds = array<i64: 32, 32>}, {pipeline_mode = #tpu.pipeline_mode<synchronous>, transform_indices = @transform_15, window_bounds = array<i64: 32, 1>}, {pipeline_mode = #tpu.pipeline_mode<synchronous>, transform_indices = @transform_16, window_bounds = array<i64: 32, 1>}, {pipeline_mode = #tpu.pipeline_mode<synchronous>, transform_indices = @transform_17, window_bounds = array<i64: 32, 1>}, {pipeline_mode = #tpu.pipeline_mode<synchronous>, transform_indices = @transform_18, window_bounds = array<i64: 256, 32>}, {pipeline_mode = #tpu.pipeline_mode<synchronous>, transform_indices = @transform_19, window_bounds = array<i64: 256, 1>}, {pipeline_mode = #tpu.pipeline_mode<synchronous>, transform_indices = @transform_20, window_bounds = array<i64: 32, 256>}, {pipeline_mode = #tpu.pipeline_mode<synchronous>, transform_indices = @transform_21, window_bounds = array<i64: 32, 1>}, {pipeline_mode = #tpu.pipeline_mode<synchronous>, transform_indices = @transform_22, window_bounds = array<i64: 32, 1>}, {pipeline_mode = #tpu.pipeline_mode<synchronous>, transform_indices = @transform_23, window_bounds = array<i64: 32, 1>}, {transform_indices = @transform_24, window_bounds = array<i64: 2, 32, 100>}]} {
    %c0 = arith.constant 0 : index
    %c0_0 = arith.constant 0 : index
    %c0_1 = arith.constant 0 : index
    %0 = vector.load %arg1[%c0, %c0_0, %c0_1] : memref<2x32x100xf32, #tpu.memory_space<vmem>>, vector<1x32x100xf32>
    %1 = vector.shape_cast %0 : vector<1x32x100xf32> to vector<32x100xf32>
    %c0_2 = arith.constant 0 : index
    %c0_3 = arith.constant 0 : index
    %c0_4 = arith.constant 0 : index
    %2 = vector.load %arg2[%c0_2, %c0_3, %c0_4] : memref<2x100x100xf32, #tpu.memory_space<vmem>>, vector<1x100x100xf32>
    %3 = vector.shape_cast %2 : vector<1x100x100xf32> to vector<100x100xf32>
    %c0_5 = arith.constant 0 : index
    %c0_6 = arith.constant 0 : index
    %4 = vector.load %arg3[%c0_5, %c0_6] : memref<32x32xf32, #tpu.memory_space<vmem>>, vector<32x32xf32>
    %cst = arith.constant dense<0.000000e+00> : vector<32x100xf32>
    %5 = tpu.matmul %4, %1, %cst {dimension_numbers = #tpu.dot_dimension_numbers<[1], [0], [0], [1], [0, 0, 1, 1], [], []>} : vector<32x32xf32>, vector<32x100xf32>, vector<32x100xf32> -> vector<32x100xf32>
    %c0_7 = arith.constant 0 : index
    %c0_8 = arith.constant 0 : index
    %6 = vector.load %arg4[%c0_7, %c0_8] : memref<32x1xf32, #tpu.memory_space<vmem>>, vector<32x1xf32>
    %7 = vector.broadcast %6 : vector<32x1xf32> to vector<32x100xf32>
    %8 = arith.addf %5, %7 : vector<32x100xf32>
    %cst_9 = arith.constant dense<0.000000e+00> : vector<32x100xf32>
    %9 = tpu.matmul %8, %3, %cst_9 {dimension_numbers = #tpu.dot_dimension_numbers<[1], [0], [0], [1], [0, 0, 1, 1], [], []>} : vector<32x100xf32>, vector<100x100xf32>, vector<32x100xf32> -> vector<32x100xf32>
    %c0_10 = arith.constant 0 : index
    %c0_11 = arith.constant 0 : index
    %10 = vector.load %arg5[%c0_10, %c0_11] : memref<32x32xf32, #tpu.memory_space<vmem>>, vector<32x32xf32>
    %cst_12 = arith.constant dense<0.000000e+00> : vector<32x100xf32>
    %11 = tpu.matmul %10, %9, %cst_12 {dimension_numbers = #tpu.dot_dimension_numbers<[1], [0], [0], [1], [0, 0, 1, 1], [], []>} : vector<32x32xf32>, vector<32x100xf32>, vector<32x100xf32> -> vector<32x100xf32>
    %c0_13 = arith.constant 0 : index
    %c0_14 = arith.constant 0 : index
    %12 = vector.load %arg6[%c0_13, %c0_14] : memref<32x1xf32, #tpu.memory_space<vmem>>, vector<32x1xf32>
    %13 = vector.broadcast %12 : vector<32x1xf32> to vector<32x100xf32>
    %14 = arith.addf %11, %13 : vector<32x100xf32>
    %15 = arith.addf %14, %1 : vector<32x100xf32>
    %c0_15 = arith.constant 0 : index
    %c0_16 = arith.constant 0 : index
    %16 = vector.load %arg7[%c0_15, %c0_16] : memref<32x1xf32, #tpu.memory_space<vmem>>, vector<32x1xf32>
    %c0_17 = arith.constant 0 : index
    %c0_18 = arith.constant 0 : index
    %17 = vector.load %arg8[%c0_17, %c0_18] : memref<32x1xf32, #tpu.memory_space<vmem>>, vector<32x1xf32>
    %cst_19 = arith.constant dense<0.000000e+00> : vector<100xf32>
    %18 = vector.multi_reduction <add>, %15, %cst_19 [0] : vector<32x100xf32> to vector<100xf32>
    %19 = vector.shape_cast %18 : vector<100xf32> to vector<1x100xf32>
    %cst_20 = arith.constant 3.200000e+01 : f32
    %20 = vector.broadcast %cst_20 : f32 to vector<1x100xf32>
    %21 = arith.divf %19, %20 : vector<1x100xf32>
    %22 = vector.broadcast %21 : vector<1x100xf32> to vector<32x100xf32>
    %23 = arith.subf %15, %22 : vector<32x100xf32>
    %24 = arith.mulf %23, %23 : vector<32x100xf32>
    %cst_21 = arith.constant dense<0.000000e+00> : vector<100xf32>
    %25 = vector.multi_reduction <add>, %24, %cst_21 [0] : vector<32x100xf32> to vector<100xf32>
    %26 = vector.shape_cast %25 : vector<100xf32> to vector<1x100xf32>
    %cst_22 = arith.constant 3.200000e+01 : f32
    %27 = vector.broadcast %cst_22 : f32 to vector<1x100xf32>
    %28 = arith.divf %26, %27 : vector<1x100xf32>
    %29 = vector.broadcast %21 : vector<1x100xf32> to vector<32x100xf32>
    %30 = arith.subf %15, %29 : vector<32x100xf32>
    %cst_23 = arith.constant 9.99999974E-6 : f32
    %31 = vector.broadcast %cst_23 : f32 to vector<1x100xf32>
    %32 = arith.addf %28, %31 : vector<1x100xf32>
    %33 = math.rsqrt %32 : vector<1x100xf32>
    %34 = vector.broadcast %33 : vector<1x100xf32> to vector<32x100xf32>
    %35 = arith.mulf %30, %34 : vector<32x100xf32>
    %36 = vector.broadcast %16 : vector<32x1xf32> to vector<32x100xf32>
    %37 = arith.mulf %35, %36 : vector<32x100xf32>
    %38 = vector.broadcast %17 : vector<32x1xf32> to vector<32x100xf32>
    %39 = arith.addf %37, %38 : vector<32x100xf32>
    %c0_24 = arith.constant 0 : index
    %c0_25 = arith.constant 0 : index
    %40 = vector.load %arg9[%c0_24, %c0_25] : memref<256x32xf32, #tpu.memory_space<vmem>>, vector<256x32xf32>
    %cst_26 = arith.constant dense<0.000000e+00> : vector<256x100xf32>
    %41 = tpu.matmul %40, %39, %cst_26 {dimension_numbers = #tpu.dot_dimension_numbers<[1], [0], [0], [1], [0, 0, 1, 1], [], []>} : vector<256x32xf32>, vector<32x100xf32>, vector<256x100xf32> -> vector<256x100xf32>
    %c0_27 = arith.constant 0 : index
    %c0_28 = arith.constant 0 : index
    %42 = vector.load %arg10[%c0_27, %c0_28] : memref<256x1xf32, #tpu.memory_space<vmem>>, vector<256x1xf32>
    %43 = vector.broadcast %42 : vector<256x1xf32> to vector<256x100xf32>
    %44 = arith.addf %41, %43 : vector<256x100xf32>
    %cst_29 = arith.constant 0.000000e+00 : f32
    %45 = vector.broadcast %cst_29 : f32 to vector<256x100xf32>
    %46 = arith.maximumf %44, %45 : vector<256x100xf32>
    %c0_30 = arith.constant 0 : index
    %c0_31 = arith.constant 0 : index
    %47 = vector.load %arg11[%c0_30, %c0_31] : memref<32x256xf32, #tpu.memory_space<vmem>>, vector<32x256xf32>
    %cst_32 = arith.constant dense<0.000000e+00> : vector<32x100xf32>
    %48 = tpu.matmul %47, %46, %cst_32 {dimension_numbers = #tpu.dot_dimension_numbers<[1], [0], [0], [1], [0, 0, 1, 1], [], []>} : vector<32x256xf32>, vector<256x100xf32>, vector<32x100xf32> -> vector<32x100xf32>
    %c0_33 = arith.constant 0 : index
    %c0_34 = arith.constant 0 : index
    %49 = vector.load %arg12[%c0_33, %c0_34] : memref<32x1xf32, #tpu.memory_space<vmem>>, vector<32x1xf32>
    %50 = vector.broadcast %49 : vector<32x1xf32> to vector<32x100xf32>
    %51 = arith.addf %48, %50 : vector<32x100xf32>
    %52 = arith.addf %51, %39 : vector<32x100xf32>
    %c0_35 = arith.constant 0 : index
    %c0_36 = arith.constant 0 : index
    %53 = vector.load %arg13[%c0_35, %c0_36] : memref<32x1xf32, #tpu.memory_space<vmem>>, vector<32x1xf32>
    %c0_37 = arith.constant 0 : index
    %c0_38 = arith.constant 0 : index
    %54 = vector.load %arg14[%c0_37, %c0_38] : memref<32x1xf32, #tpu.memory_space<vmem>>, vector<32x1xf32>
    %cst_39 = arith.constant dense<0.000000e+00> : vector<100xf32>
    %55 = vector.multi_reduction <add>, %52, %cst_39 [0] : vector<32x100xf32> to vector<100xf32>
    %56 = vector.shape_cast %55 : vector<100xf32> to vector<1x100xf32>
    %cst_40 = arith.constant 3.200000e+01 : f32
    %57 = vector.broadcast %cst_40 : f32 to vector<1x100xf32>
    %58 = arith.divf %56, %57 : vector<1x100xf32>
    %59 = vector.broadcast %58 : vector<1x100xf32> to vector<32x100xf32>
    %60 = arith.subf %52, %59 : vector<32x100xf32>
    %61 = arith.mulf %60, %60 : vector<32x100xf32>
    %cst_41 = arith.constant dense<0.000000e+00> : vector<100xf32>
    %62 = vector.multi_reduction <add>, %61, %cst_41 [0] : vector<32x100xf32> to vector<100xf32>
    %63 = vector.shape_cast %62 : vector<100xf32> to vector<1x100xf32>
    %cst_42 = arith.constant 3.100000e+01 : f32
    %64 = vector.broadcast %cst_42 : f32 to vector<1x100xf32>
    %65 = arith.divf %63, %64 : vector<1x100xf32>
    %66 = math.sqrt %65 : vector<1x100xf32>
    %cst_43 = arith.constant 9.99999997E-7 : f32
    %67 = vector.broadcast %cst_43 : f32 to vector<1x100xf32>
    %68 = arith.addf %66, %67 : vector<1x100xf32>
    %69 = tpu.reciprocal %68 : vector<1x100xf32> -> vector<1x100xf32>
    %70 = vector.broadcast %58 : vector<1x100xf32> to vector<32x100xf32>
    %71 = arith.subf %52, %70 : vector<32x100xf32>
    %72 = vector.broadcast %53 : vector<32x1xf32> to vector<32x100xf32>
    %73 = arith.mulf %72, %71 : vector<32x100xf32>
    %74 = vector.broadcast %69 : vector<1x100xf32> to vector<32x100xf32>
    %75 = arith.mulf %73, %74 : vector<32x100xf32>
    %76 = vector.broadcast %54 : vector<32x1xf32> to vector<32x100xf32>
    %77 = arith.addf %75, %76 : vector<32x100xf32>
    %c0_44 = arith.constant 0 : index
    %c0_45 = arith.constant 0 : index
    %78 = vector.load %arg15[%c0_44, %c0_45] : memref<32x32xf32, #tpu.memory_space<vmem>>, vector<32x32xf32>
    %79 = arith.addf %1, %77 : vector<32x100xf32>
    %cst_46 = arith.constant dense<0.000000e+00> : vector<32x100xf32>
    %80 = tpu.matmul %78, %79, %cst_46 {dimension_numbers = #tpu.dot_dimension_numbers<[1], [0], [0], [1], [0, 0, 1, 1], [], []>} : vector<32x32xf32>, vector<32x100xf32>, vector<32x100xf32> -> vector<32x100xf32>
    %c0_47 = arith.constant 0 : index
    %c0_48 = arith.constant 0 : index
    %81 = vector.load %arg16[%c0_47, %c0_48] : memref<32x1xf32, #tpu.memory_space<vmem>>, vector<32x1xf32>
    %cst_49 = arith.constant 2.000000e+00 : f32
    %82 = vector.broadcast %cst_49 : f32 to vector<32x1xf32>
    %83 = arith.mulf %82, %81 : vector<32x1xf32>
    %84 = vector.broadcast %83 : vector<32x1xf32> to vector<32x100xf32>
    %85 = arith.addf %80, %84 : vector<32x100xf32>
    %c0_50 = arith.constant 0 : index
    %c0_51 = arith.constant 0 : index
    %86 = vector.load %arg17[%c0_50, %c0_51] : memref<32x1xf32, #tpu.memory_space<vmem>>, vector<32x1xf32>
    %c0_52 = arith.constant 0 : index
    %c0_53 = arith.constant 0 : index
    %87 = vector.load %arg18[%c0_52, %c0_53] : memref<32x1xf32, #tpu.memory_space<vmem>>, vector<32x1xf32>
    %cst_54 = arith.constant dense<0.000000e+00> : vector<100xf32>
    %88 = vector.multi_reduction <add>, %85, %cst_54 [0] : vector<32x100xf32> to vector<100xf32>
    %89 = vector.shape_cast %88 : vector<100xf32> to vector<1x100xf32>
    %cst_55 = arith.constant 3.200000e+01 : f32
    %90 = vector.broadcast %cst_55 : f32 to vector<1x100xf32>
    %91 = arith.divf %89, %90 : vector<1x100xf32>
    %92 = vector.broadcast %91 : vector<1x100xf32> to vector<32x100xf32>
    %93 = arith.subf %85, %92 : vector<32x100xf32>
    %94 = arith.mulf %93, %93 : vector<32x100xf32>
    %cst_56 = arith.constant dense<0.000000e+00> : vector<100xf32>
    %95 = vector.multi_reduction <add>, %94, %cst_56 [0] : vector<32x100xf32> to vector<100xf32>
    %96 = vector.shape_cast %95 : vector<100xf32> to vector<1x100xf32>
    %cst_57 = arith.constant 3.100000e+01 : f32
    %97 = vector.broadcast %cst_57 : f32 to vector<1x100xf32>
    %98 = arith.divf %96, %97 : vector<1x100xf32>
    %99 = math.sqrt %98 : vector<1x100xf32>
    %cst_58 = arith.constant 9.99999997E-7 : f32
    %100 = vector.broadcast %cst_58 : f32 to vector<1x100xf32>
    %101 = arith.addf %99, %100 : vector<1x100xf32>
    %102 = tpu.reciprocal %101 : vector<1x100xf32> -> vector<1x100xf32>
    %103 = vector.broadcast %91 : vector<1x100xf32> to vector<32x100xf32>
    %104 = arith.subf %85, %103 : vector<32x100xf32>
    %105 = vector.broadcast %86 : vector<32x1xf32> to vector<32x100xf32>
    %106 = arith.mulf %105, %104 : vector<32x100xf32>
    %107 = vector.broadcast %102 : vector<1x100xf32> to vector<32x100xf32>
    %108 = arith.mulf %106, %107 : vector<32x100xf32>
    %109 = vector.broadcast %87 : vector<32x1xf32> to vector<32x100xf32>
    %110 = arith.addf %108, %109 : vector<32x100xf32>
    %c0_59 = arith.constant 0 : index
    %c0_60 = arith.constant 0 : index
    %111 = vector.load %arg19[%c0_59, %c0_60] : memref<256x32xf32, #tpu.memory_space<vmem>>, vector<256x32xf32>
    %cst_61 = arith.constant dense<0.000000e+00> : vector<256x100xf32>
    %112 = tpu.matmul %111, %110, %cst_61 {dimension_numbers = #tpu.dot_dimension_numbers<[1], [0], [0], [1], [0, 0, 1, 1], [], []>} : vector<256x32xf32>, vector<32x100xf32>, vector<256x100xf32> -> vector<256x100xf32>
    %c0_62 = arith.constant 0 : index
    %c0_63 = arith.constant 0 : index
    %113 = vector.load %arg20[%c0_62, %c0_63] : memref<256x1xf32, #tpu.memory_space<vmem>>, vector<256x1xf32>
    %114 = vector.broadcast %113 : vector<256x1xf32> to vector<256x100xf32>
    %115 = arith.addf %112, %114 : vector<256x100xf32>
    %cst_64 = arith.constant 0.000000e+00 : f32
    %116 = vector.broadcast %cst_64 : f32 to vector<256x100xf32>
    %117 = arith.maximumf %115, %116 : vector<256x100xf32>
    %c0_65 = arith.constant 0 : index
    %c0_66 = arith.constant 0 : index
    %118 = vector.load %arg21[%c0_65, %c0_66] : memref<32x256xf32, #tpu.memory_space<vmem>>, vector<32x256xf32>
    %cst_67 = arith.constant dense<0.000000e+00> : vector<32x100xf32>
    %119 = tpu.matmul %118, %117, %cst_67 {dimension_numbers = #tpu.dot_dimension_numbers<[1], [0], [0], [1], [0, 0, 1, 1], [], []>} : vector<32x256xf32>, vector<256x100xf32>, vector<32x100xf32> -> vector<32x100xf32>
    %c0_68 = arith.constant 0 : index
    %c0_69 = arith.constant 0 : index
    %120 = vector.load %arg22[%c0_68, %c0_69] : memref<32x1xf32, #tpu.memory_space<vmem>>, vector<32x1xf32>
    %121 = vector.broadcast %120 : vector<32x1xf32> to vector<32x100xf32>
    %122 = arith.addf %119, %121 : vector<32x100xf32>
    %123 = arith.addf %122, %110 : vector<32x100xf32>
    %c0_70 = arith.constant 0 : index
    %c0_71 = arith.constant 0 : index
    %124 = vector.load %arg23[%c0_70, %c0_71] : memref<32x1xf32, #tpu.memory_space<vmem>>, vector<32x1xf32>
    %c0_72 = arith.constant 0 : index
    %c0_73 = arith.constant 0 : index
    %125 = vector.load %arg24[%c0_72, %c0_73] : memref<32x1xf32, #tpu.memory_space<vmem>>, vector<32x1xf32>
    %cst_74 = arith.constant dense<0.000000e+00> : vector<100xf32>
    %126 = vector.multi_reduction <add>, %123, %cst_74 [0] : vector<32x100xf32> to vector<100xf32>
    %127 = vector.shape_cast %126 : vector<100xf32> to vector<1x100xf32>
    %cst_75 = arith.constant 3.200000e+01 : f32
    %128 = vector.broadcast %cst_75 : f32 to vector<1x100xf32>
    %129 = arith.divf %127, %128 : vector<1x100xf32>
    %130 = vector.broadcast %129 : vector<1x100xf32> to vector<32x100xf32>
    %131 = arith.subf %123, %130 : vector<32x100xf32>
    %132 = arith.mulf %131, %131 : vector<32x100xf32>
    %cst_76 = arith.constant dense<0.000000e+00> : vector<100xf32>
    %133 = vector.multi_reduction <add>, %132, %cst_76 [0] : vector<32x100xf32> to vector<100xf32>
    %134 = vector.shape_cast %133 : vector<100xf32> to vector<1x100xf32>
    %cst_77 = arith.constant 3.100000e+01 : f32
    %135 = vector.broadcast %cst_77 : f32 to vector<1x100xf32>
    %136 = arith.divf %134, %135 : vector<1x100xf32>
    %137 = math.sqrt %136 : vector<1x100xf32>
    %cst_78 = arith.constant 9.99999997E-7 : f32
    %138 = vector.broadcast %cst_78 : f32 to vector<1x100xf32>
    %139 = arith.addf %137, %138 : vector<1x100xf32>
    %140 = tpu.reciprocal %139 : vector<1x100xf32> -> vector<1x100xf32>
    %141 = vector.broadcast %129 : vector<1x100xf32> to vector<32x100xf32>
    %142 = arith.subf %123, %141 : vector<32x100xf32>
    %143 = vector.broadcast %124 : vector<32x1xf32> to vector<32x100xf32>
    %144 = arith.mulf %143, %142 : vector<32x100xf32>
    %145 = vector.broadcast %140 : vector<1x100xf32> to vector<32x100xf32>
    %146 = arith.mulf %144, %145 : vector<32x100xf32>
    %147 = vector.broadcast %125 : vector<32x1xf32> to vector<32x100xf32>
    %148 = arith.addf %146, %147 : vector<32x100xf32>
    %c0_79 = arith.constant 0 : index
    %c0_80 = arith.constant 0 : index
    %c0_81 = arith.constant 0 : index
    %149 = vector.load %arg25[%c0_79, %c0_80, %c0_81] : memref<2x32x100xf32, #tpu.memory_space<vmem>>, vector<1x32x100xf32>
    %150 = vector.shape_cast %149 : vector<1x32x100xf32> to vector<32x100xf32>
    %151 = vector.shape_cast %148 : vector<32x100xf32> to vector<1x32x100xf32>
    tpu.vector_store %arg25[%c0_79, %c0_80, %c0_81], %151 {strides = array<i32>} : memref<2x32x100xf32, #tpu.memory_space<vmem>>, vector<1x32x100xf32>,
    %c1 = arith.constant 1 : index
    %c0_82 = arith.constant 0 : index
    %c0_83 = arith.constant 0 : index
    %152 = vector.load %arg1[%c1, %c0_82, %c0_83] : memref<2x32x100xf32, #tpu.memory_space<vmem>>, vector<1x32x100xf32>
    %153 = vector.shape_cast %152 : vector<1x32x100xf32> to vector<32x100xf32>
    %c1_84 = arith.constant 1 : index
    %c0_85 = arith.constant 0 : index
    %c0_86 = arith.constant 0 : index
    %154 = vector.load %arg2[%c1_84, %c0_85, %c0_86] : memref<2x100x100xf32, #tpu.memory_space<vmem>>, vector<1x100x100xf32>
    %155 = vector.shape_cast %154 : vector<1x100x100xf32> to vector<100x100xf32>
    %c0_87 = arith.constant 0 : index
    %c0_88 = arith.constant 0 : index
    %156 = vector.load %arg3[%c0_87, %c0_88] : memref<32x32xf32, #tpu.memory_space<vmem>>, vector<32x32xf32>
    %cst_89 = arith.constant dense<0.000000e+00> : vector<32x100xf32>
    %157 = tpu.matmul %156, %153, %cst_89 {dimension_numbers = #tpu.dot_dimension_numbers<[1], [0], [0], [1], [0, 0, 1, 1], [], []>} : vector<32x32xf32>, vector<32x100xf32>, vector<32x100xf32> -> vector<32x100xf32>
    %c0_90 = arith.constant 0 : index
    %c0_91 = arith.constant 0 : index
    %158 = vector.load %arg4[%c0_90, %c0_91] : memref<32x1xf32, #tpu.memory_space<vmem>>, vector<32x1xf32>
    %159 = vector.broadcast %158 : vector<32x1xf32> to vector<32x100xf32>
    %160 = arith.addf %157, %159 : vector<32x100xf32>
    %cst_92 = arith.constant dense<0.000000e+00> : vector<32x100xf32>
    %161 = tpu.matmul %160, %155, %cst_92 {dimension_numbers = #tpu.dot_dimension_numbers<[1], [0], [0], [1], [0, 0, 1, 1], [], []>} : vector<32x100xf32>, vector<100x100xf32>, vector<32x100xf32> -> vector<32x100xf32>
    %c0_93 = arith.constant 0 : index
    %c0_94 = arith.constant 0 : index
    %162 = vector.load %arg5[%c0_93, %c0_94] : memref<32x32xf32, #tpu.memory_space<vmem>>, vector<32x32xf32>
    %cst_95 = arith.constant dense<0.000000e+00> : vector<32x100xf32>
    %163 = tpu.matmul %162, %161, %cst_95 {dimension_numbers = #tpu.dot_dimension_numbers<[1], [0], [0], [1], [0, 0, 1, 1], [], []>} : vector<32x32xf32>, vector<32x100xf32>, vector<32x100xf32> -> vector<32x100xf32>
    %c0_96 = arith.constant 0 : index
    %c0_97 = arith.constant 0 : index
    %164 = vector.load %arg6[%c0_96, %c0_97] : memref<32x1xf32, #tpu.memory_space<vmem>>, vector<32x1xf32>
    %165 = vector.broadcast %164 : vector<32x1xf32> to vector<32x100xf32>
    %166 = arith.addf %163, %165 : vector<32x100xf32>
    %167 = arith.addf %166, %153 : vector<32x100xf32>
    %c0_98 = arith.constant 0 : index
    %c0_99 = arith.constant 0 : index
    %168 = vector.load %arg7[%c0_98, %c0_99] : memref<32x1xf32, #tpu.memory_space<vmem>>, vector<32x1xf32>
    %c0_100 = arith.constant 0 : index
    %c0_101 = arith.constant 0 : index
    %169 = vector.load %arg8[%c0_100, %c0_101] : memref<32x1xf32, #tpu.memory_space<vmem>>, vector<32x1xf32>
    %cst_102 = arith.constant dense<0.000000e+00> : vector<100xf32>
    %170 = vector.multi_reduction <add>, %167, %cst_102 [0] : vector<32x100xf32> to vector<100xf32>
    %171 = vector.shape_cast %170 : vector<100xf32> to vector<1x100xf32>
    %cst_103 = arith.constant 3.200000e+01 : f32
    %172 = vector.broadcast %cst_103 : f32 to vector<1x100xf32>
    %173 = arith.divf %171, %172 : vector<1x100xf32>
    %174 = vector.broadcast %173 : vector<1x100xf32> to vector<32x100xf32>
    %175 = arith.subf %167, %174 : vector<32x100xf32>
    %176 = arith.mulf %175, %175 : vector<32x100xf32>
    %cst_104 = arith.constant dense<0.000000e+00> : vector<100xf32>
    %177 = vector.multi_reduction <add>, %176, %cst_104 [0] : vector<32x100xf32> to vector<100xf32>
    %178 = vector.shape_cast %177 : vector<100xf32> to vector<1x100xf32>
    %cst_105 = arith.constant 3.200000e+01 : f32
    %179 = vector.broadcast %cst_105 : f32 to vector<1x100xf32>
    %180 = arith.divf %178, %179 : vector<1x100xf32>
    %181 = vector.broadcast %173 : vector<1x100xf32> to vector<32x100xf32>
    %182 = arith.subf %167, %181 : vector<32x100xf32>
    %cst_106 = arith.constant 9.99999974E-6 : f32
    %183 = vector.broadcast %cst_106 : f32 to vector<1x100xf32>
    %184 = arith.addf %180, %183 : vector<1x100xf32>
    %185 = math.rsqrt %184 : vector<1x100xf32>
    %186 = vector.broadcast %185 : vector<1x100xf32> to vector<32x100xf32>
    %187 = arith.mulf %182, %186 : vector<32x100xf32>
    %188 = vector.broadcast %168 : vector<32x1xf32> to vector<32x100xf32>
    %189 = arith.mulf %187, %188 : vector<32x100xf32>
    %190 = vector.broadcast %169 : vector<32x1xf32> to vector<32x100xf32>
    %191 = arith.addf %189, %190 : vector<32x100xf32>
    %c0_107 = arith.constant 0 : index
    %c0_108 = arith.constant 0 : index
    %192 = vector.load %arg9[%c0_107, %c0_108] : memref<256x32xf32, #tpu.memory_space<vmem>>, vector<256x32xf32>
    %cst_109 = arith.constant dense<0.000000e+00> : vector<256x100xf32>
    %193 = tpu.matmul %192, %191, %cst_109 {dimension_numbers = #tpu.dot_dimension_numbers<[1], [0], [0], [1], [0, 0, 1, 1], [], []>} : vector<256x32xf32>, vector<32x100xf32>, vector<256x100xf32> -> vector<256x100xf32>
    %c0_110 = arith.constant 0 : index
    %c0_111 = arith.constant 0 : index
    %194 = vector.load %arg10[%c0_110, %c0_111] : memref<256x1xf32, #tpu.memory_space<vmem>>, vector<256x1xf32>
    %195 = vector.broadcast %194 : vector<256x1xf32> to vector<256x100xf32>
    %196 = arith.addf %193, %195 : vector<256x100xf32>
    %cst_112 = arith.constant 0.000000e+00 : f32
    %197 = vector.broadcast %cst_112 : f32 to vector<256x100xf32>
    %198 = arith.maximumf %196, %197 : vector<256x100xf32>
    %c0_113 = arith.constant 0 : index
    %c0_114 = arith.constant 0 : index
    %199 = vector.load %arg11[%c0_113, %c0_114] : memref<32x256xf32, #tpu.memory_space<vmem>>, vector<32x256xf32>
    %cst_115 = arith.constant dense<0.000000e+00> : vector<32x100xf32>
    %200 = tpu.matmul %199, %198, %cst_115 {dimension_numbers = #tpu.dot_dimension_numbers<[1], [0], [0], [1], [0, 0, 1, 1], [], []>} : vector<32x256xf32>, vector<256x100xf32>, vector<32x100xf32> -> vector<32x100xf32>
    %c0_116 = arith.constant 0 : index
    %c0_117 = arith.constant 0 : index
    %201 = vector.load %arg12[%c0_116, %c0_117] : memref<32x1xf32, #tpu.memory_space<vmem>>, vector<32x1xf32>
    %202 = vector.broadcast %201 : vector<32x1xf32> to vector<32x100xf32>
    %203 = arith.addf %200, %202 : vector<32x100xf32>
    %204 = arith.addf %203, %191 : vector<32x100xf32>
    %c0_118 = arith.constant 0 : index
    %c0_119 = arith.constant 0 : index
    %205 = vector.load %arg13[%c0_118, %c0_119] : memref<32x1xf32, #tpu.memory_space<vmem>>, vector<32x1xf32>
    %c0_120 = arith.constant 0 : index
    %c0_121 = arith.constant 0 : index
    %206 = vector.load %arg14[%c0_120, %c0_121] : memref<32x1xf32, #tpu.memory_space<vmem>>, vector<32x1xf32>
    %cst_122 = arith.constant dense<0.000000e+00> : vector<100xf32>
    %207 = vector.multi_reduction <add>, %204, %cst_122 [0] : vector<32x100xf32> to vector<100xf32>
    %208 = vector.shape_cast %207 : vector<100xf32> to vector<1x100xf32>
    %cst_123 = arith.constant 3.200000e+01 : f32
    %209 = vector.broadcast %cst_123 : f32 to vector<1x100xf32>
    %210 = arith.divf %208, %209 : vector<1x100xf32>
    %211 = vector.broadcast %210 : vector<1x100xf32> to vector<32x100xf32>
    %212 = arith.subf %204, %211 : vector<32x100xf32>
    %213 = arith.mulf %212, %212 : vector<32x100xf32>
    %cst_124 = arith.constant dense<0.000000e+00> : vector<100xf32>
    %214 = vector.multi_reduction <add>, %213, %cst_124 [0] : vector<32x100xf32> to vector<100xf32>
    %215 = vector.shape_cast %214 : vector<100xf32> to vector<1x100xf32>
    %cst_125 = arith.constant 3.100000e+01 : f32
    %216 = vector.broadcast %cst_125 : f32 to vector<1x100xf32>
    %217 = arith.divf %215, %216 : vector<1x100xf32>
    %218 = math.sqrt %217 : vector<1x100xf32>
    %cst_126 = arith.constant 9.99999997E-7 : f32
    %219 = vector.broadcast %cst_126 : f32 to vector<1x100xf32>
    %220 = arith.addf %218, %219 : vector<1x100xf32>
    %221 = tpu.reciprocal %220 : vector<1x100xf32> -> vector<1x100xf32>
    %222 = vector.broadcast %210 : vector<1x100xf32> to vector<32x100xf32>
    %223 = arith.subf %204, %222 : vector<32x100xf32>
    %224 = vector.broadcast %205 : vector<32x1xf32> to vector<32x100xf32>
    %225 = arith.mulf %224, %223 : vector<32x100xf32>
    %226 = vector.broadcast %221 : vector<1x100xf32> to vector<32x100xf32>
    %227 = arith.mulf %225, %226 : vector<32x100xf32>
    %228 = vector.broadcast %206 : vector<32x1xf32> to vector<32x100xf32>
    %229 = arith.addf %227, %228 : vector<32x100xf32>
    %c0_127 = arith.constant 0 : index
    %c0_128 = arith.constant 0 : index
    %230 = vector.load %arg15[%c0_127, %c0_128] : memref<32x32xf32, #tpu.memory_space<vmem>>, vector<32x32xf32>
    %231 = arith.addf %153, %229 : vector<32x100xf32>
    %cst_129 = arith.constant dense<0.000000e+00> : vector<32x100xf32>
    %232 = tpu.matmul %230, %231, %cst_129 {dimension_numbers = #tpu.dot_dimension_numbers<[1], [0], [0], [1], [0, 0, 1, 1], [], []>} : vector<32x32xf32>, vector<32x100xf32>, vector<32x100xf32> -> vector<32x100xf32>
    %c0_130 = arith.constant 0 : index
    %c0_131 = arith.constant 0 : index
    %233 = vector.load %arg16[%c0_130, %c0_131] : memref<32x1xf32, #tpu.memory_space<vmem>>, vector<32x1xf32>
    %cst_132 = arith.constant 2.000000e+00 : f32
    %234 = vector.broadcast %cst_132 : f32 to vector<32x1xf32>
    %235 = arith.mulf %234, %233 : vector<32x1xf32>
    %236 = vector.broadcast %235 : vector<32x1xf32> to vector<32x100xf32>
    %237 = arith.addf %232, %236 : vector<32x100xf32>
    %c0_133 = arith.constant 0 : index
    %c0_134 = arith.constant 0 : index
    %238 = vector.load %arg17[%c0_133, %c0_134] : memref<32x1xf32, #tpu.memory_space<vmem>>, vector<32x1xf32>
    %c0_135 = arith.constant 0 : index
    %c0_136 = arith.constant 0 : index
    %239 = vector.load %arg18[%c0_135, %c0_136] : memref<32x1xf32, #tpu.memory_space<vmem>>, vector<32x1xf32>
    %cst_137 = arith.constant dense<0.000000e+00> : vector<100xf32>
    %240 = vector.multi_reduction <add>, %237, %cst_137 [0] : vector<32x100xf32> to vector<100xf32>
    %241 = vector.shape_cast %240 : vector<100xf32> to vector<1x100xf32>
    %cst_138 = arith.constant 3.200000e+01 : f32
    %242 = vector.broadcast %cst_138 : f32 to vector<1x100xf32>
    %243 = arith.divf %241, %242 : vector<1x100xf32>
    %244 = vector.broadcast %243 : vector<1x100xf32> to vector<32x100xf32>
    %245 = arith.subf %237, %244 : vector<32x100xf32>
    %246 = arith.mulf %245, %245 : vector<32x100xf32>
    %cst_139 = arith.constant dense<0.000000e+00> : vector<100xf32>
    %247 = vector.multi_reduction <add>, %246, %cst_139 [0] : vector<32x100xf32> to vector<100xf32>
    %248 = vector.shape_cast %247 : vector<100xf32> to vector<1x100xf32>
    %cst_140 = arith.constant 3.100000e+01 : f32
    %249 = vector.broadcast %cst_140 : f32 to vector<1x100xf32>
    %250 = arith.divf %248, %249 : vector<1x100xf32>
    %251 = math.sqrt %250 : vector<1x100xf32>
    %cst_141 = arith.constant 9.99999997E-7 : f32
    %252 = vector.broadcast %cst_141 : f32 to vector<1x100xf32>
    %253 = arith.addf %251, %252 : vector<1x100xf32>
    %254 = tpu.reciprocal %253 : vector<1x100xf32> -> vector<1x100xf32>
    %255 = vector.broadcast %243 : vector<1x100xf32> to vector<32x100xf32>
    %256 = arith.subf %237, %255 : vector<32x100xf32>
    %257 = vector.broadcast %238 : vector<32x1xf32> to vector<32x100xf32>
    %258 = arith.mulf %257, %256 : vector<32x100xf32>
    %259 = vector.broadcast %254 : vector<1x100xf32> to vector<32x100xf32>
    %260 = arith.mulf %258, %259 : vector<32x100xf32>
    %261 = vector.broadcast %239 : vector<32x1xf32> to vector<32x100xf32>
    %262 = arith.addf %260, %261 : vector<32x100xf32>
    %c0_142 = arith.constant 0 : index
    %c0_143 = arith.constant 0 : index
    %263 = vector.load %arg19[%c0_142, %c0_143] : memref<256x32xf32, #tpu.memory_space<vmem>>, vector<256x32xf32>
    %cst_144 = arith.constant dense<0.000000e+00> : vector<256x100xf32>
    %264 = tpu.matmul %263, %262, %cst_144 {dimension_numbers = #tpu.dot_dimension_numbers<[1], [0], [0], [1], [0, 0, 1, 1], [], []>} : vector<256x32xf32>, vector<32x100xf32>, vector<256x100xf32> -> vector<256x100xf32>
    %c0_145 = arith.constant 0 : index
    %c0_146 = arith.constant 0 : index
    %265 = vector.load %arg20[%c0_145, %c0_146] : memref<256x1xf32, #tpu.memory_space<vmem>>, vector<256x1xf32>
    %266 = vector.broadcast %265 : vector<256x1xf32> to vector<256x100xf32>
    %267 = arith.addf %264, %266 : vector<256x100xf32>
    %cst_147 = arith.constant 0.000000e+00 : f32
    %268 = vector.broadcast %cst_147 : f32 to vector<256x100xf32>
    %269 = arith.maximumf %267, %268 : vector<256x100xf32>
    %c0_148 = arith.constant 0 : index
    %c0_149 = arith.constant 0 : index
    %270 = vector.load %arg21[%c0_148, %c0_149] : memref<32x256xf32, #tpu.memory_space<vmem>>, vector<32x256xf32>
    %cst_150 = arith.constant dense<0.000000e+00> : vector<32x100xf32>
    %271 = tpu.matmul %270, %269, %cst_150 {dimension_numbers = #tpu.dot_dimension_numbers<[1], [0], [0], [1], [0, 0, 1, 1], [], []>} : vector<32x256xf32>, vector<256x100xf32>, vector<32x100xf32> -> vector<32x100xf32>
    %c0_151 = arith.constant 0 : index
    %c0_152 = arith.constant 0 : index
    %272 = vector.load %arg22[%c0_151, %c0_152] : memref<32x1xf32, #tpu.memory_space<vmem>>, vector<32x1xf32>
    %273 = vector.broadcast %272 : vector<32x1xf32> to vector<32x100xf32>
    %274 = arith.addf %271, %273 : vector<32x100xf32>
    %275 = arith.addf %274, %262 : vector<32x100xf32>
    %c0_153 = arith.constant 0 : index
    %c0_154 = arith.constant 0 : index
    %276 = vector.load %arg23[%c0_153, %c0_154] : memref<32x1xf32, #tpu.memory_space<vmem>>, vector<32x1xf32>
    %c0_155 = arith.constant 0 : index
    %c0_156 = arith.constant 0 : index
    %277 = vector.load %arg24[%c0_155, %c0_156] : memref<32x1xf32, #tpu.memory_space<vmem>>, vector<32x1xf32>
    %cst_157 = arith.constant dense<0.000000e+00> : vector<100xf32>
    %278 = vector.multi_reduction <add>, %275, %cst_157 [0] : vector<32x100xf32> to vector<100xf32>
    %279 = vector.shape_cast %278 : vector<100xf32> to vector<1x100xf32>
    %cst_158 = arith.constant 3.200000e+01 : f32
    %280 = vector.broadcast %cst_158 : f32 to vector<1x100xf32>
    %281 = arith.divf %279, %280 : vector<1x100xf32>
    %282 = vector.broadcast %281 : vector<1x100xf32> to vector<32x100xf32>
    %283 = arith.subf %275, %282 : vector<32x100xf32>
    %284 = arith.mulf %283, %283 : vector<32x100xf32>
    %cst_159 = arith.constant dense<0.000000e+00> : vector<100xf32>
    %285 = vector.multi_reduction <add>, %284, %cst_159 [0] : vector<32x100xf32> to vector<100xf32>
    %286 = vector.shape_cast %285 : vector<100xf32> to vector<1x100xf32>
    %cst_160 = arith.constant 3.100000e+01 : f32
    %287 = vector.broadcast %cst_160 : f32 to vector<1x100xf32>
    %288 = arith.divf %286, %287 : vector<1x100xf32>
    %289 = math.sqrt %288 : vector<1x100xf32>
    %cst_161 = arith.constant 9.99999997E-7 : f32
    %290 = vector.broadcast %cst_161 : f32 to vector<1x100xf32>
    %291 = arith.addf %289, %290 : vector<1x100xf32>
    %292 = tpu.reciprocal %291 : vector<1x100xf32> -> vector<1x100xf32>
    %293 = vector.broadcast %281 : vector<1x100xf32> to vector<32x100xf32>
    %294 = arith.subf %275, %293 : vector<32x100xf32>
    %295 = vector.broadcast %276 : vector<32x1xf32> to vector<32x100xf32>
    %296 = arith.mulf %295, %294 : vector<32x100xf32>
    %297 = vector.broadcast %292 : vector<1x100xf32> to vector<32x100xf32>
    %298 = arith.mulf %296, %297 : vector<32x100xf32>
    %299 = vector.broadcast %277 : vector<32x1xf32> to vector<32x100xf32>
    %300 = arith.addf %298, %299 : vector<32x100xf32>
    %c1_162 = arith.constant 1 : index
    %c0_163 = arith.constant 0 : index
    %c0_164 = arith.constant 0 : index
    %301 = vector.load %arg25[%c1_162, %c0_163, %c0_164] : memref<2x32x100xf32, #tpu.memory_space<vmem>>, vector<1x32x100xf32>
    %302 = vector.shape_cast %301 : vector<1x32x100xf32> to vector<32x100xf32>
    %303 = vector.shape_cast %300 : vector<32x100xf32> to vector<1x32x100xf32>
    tpu.vector_store %arg25[%c1_162, %c0_163, %c0_164], %303 {strides = array<i32>} : memref<2x32x100xf32, #tpu.memory_space<vmem>>, vector<1x32x100xf32>,
    return
  }
  func.func @transform_0(%arg0: i32) -> (i32, i32, i32) {
    %c0_i32 = arith.constant 0 : i32
    %c0_i32_0 = arith.constant 0 : i32
    %c0_i32_1 = arith.constant 0 : i32
    return %arg0, %c0_i32, %c0_i32_0 : i32, i32, i32
  }
  func.func @transform_1(%arg0: i32) -> (i32, i32, i32) {
    %c0_i32 = arith.constant 0 : i32
    %c0_i32_0 = arith.constant 0 : i32
    %c0_i32_1 = arith.constant 0 : i32
    return %arg0, %c0_i32, %c0_i32_0 : i32, i32, i32
  }
  func.func @transform_2(%arg0: i32) -> (i32, i32) {
    %c0_i32 = arith.constant 0 : i32
    %c0_i32_0 = arith.constant 0 : i32
    %c0_i32_1 = arith.constant 0 : i32
    return %c0_i32, %c0_i32_0 : i32, i32
  }
  func.func @transform_3(%arg0: i32) -> (i32, i32) {
    %c0_i32 = arith.constant 0 : i32
    %c0_i32_0 = arith.constant 0 : i32
    %c0_i32_1 = arith.constant 0 : i32
    return %c0_i32, %c0_i32_0 : i32, i32
  }
  func.func @transform_4(%arg0: i32) -> (i32, i32) {
    %c0_i32 = arith.constant 0 : i32
    %c0_i32_0 = arith.constant 0 : i32
    %c0_i32_1 = arith.constant 0 : i32
    return %c0_i32, %c0_i32_0 : i32, i32
  }
  func.func @transform_5(%arg0: i32) -> (i32, i32) {
    %c0_i32 = arith.constant 0 : i32
    %c0_i32_0 = arith.constant 0 : i32
    %c0_i32_1 = arith.constant 0 : i32
    return %c0_i32, %c0_i32_0 : i32, i32
  }
  func.func @transform_6(%arg0: i32) -> (i32, i32) {
    %c0_i32 = arith.constant 0 : i32
    %c0_i32_0 = arith.constant 0 : i32
    %c0_i32_1 = arith.constant 0 : i32
    return %c0_i32, %c0_i32_0 : i32, i32
  }
  func.func @transform_7(%arg0: i32) -> (i32, i32) {
    %c0_i32 = arith.constant 0 : i32
    %c0_i32_0 = arith.constant 0 : i32
    %c0_i32_1 = arith.constant 0 : i32
    return %c0_i32, %c0_i32_0 : i32, i32
  }
  func.func @transform_8(%arg0: i32) -> (i32, i32) {
    %c0_i32 = arith.constant 0 : i32
    %c0_i32_0 = arith.constant 0 : i32
    %c0_i32_1 = arith.constant 0 : i32
    return %c0_i32, %c0_i32_0 : i32, i32
  }
  func.func @transform_9(%arg0: i32) -> (i32, i32) {
    %c0_i32 = arith.constant 0 : i32
    %c0_i32_0 = arith.constant 0 : i32
    %c0_i32_1 = arith.constant 0 : i32
    return %c0_i32, %c0_i32_0 : i32, i32
  }
  func.func @transform_10(%arg0: i32) -> (i32, i32) {
    %c0_i32 = arith.constant 0 : i32
    %c0_i32_0 = arith.constant 0 : i32
    %c0_i32_1 = arith.constant 0 : i32
    return %c0_i32, %c0_i32_0 : i32, i32
  }
  func.func @transform_11(%arg0: i32) -> (i32, i32) {
    %c0_i32 = arith.constant 0 : i32
    %c0_i32_0 = arith.constant 0 : i32
    %c0_i32_1 = arith.constant 0 : i32
    return %c0_i32, %c0_i32_0 : i32, i32
  }
  func.func @transform_12(%arg0: i32) -> (i32, i32) {
    %c0_i32 = arith.constant 0 : i32
    %c0_i32_0 = arith.constant 0 : i32
    %c0_i32_1 = arith.constant 0 : i32
    return %c0_i32, %c0_i32_0 : i32, i32
  }
  func.func @transform_13(%arg0: i32) -> (i32, i32) {
    %c0_i32 = arith.constant 0 : i32
    %c0_i32_0 = arith.constant 0 : i32
    %c0_i32_1 = arith.constant 0 : i32
    return %c0_i32, %c0_i32_0 : i32, i32
  }
  func.func @transform_14(%arg0: i32) -> (i32, i32) {
    %c0_i32 = arith.constant 0 : i32
    %c0_i32_0 = arith.constant 0 : i32
    %c0_i32_1 = arith.constant 0 : i32
    return %c0_i32, %c0_i32_0 : i32, i32
  }
  func.func @transform_15(%arg0: i32) -> (i32, i32) {
    %c0_i32 = arith.constant 0 : i32
    %c0_i32_0 = arith.constant 0 : i32
    %c0_i32_1 = arith.constant 0 : i32
    return %c0_i32, %c0_i32_0 : i32, i32
  }
  func.func @transform_16(%arg0: i32) -> (i32, i32) {
    %c0_i32 = arith.constant 0 : i32
    %c0_i32_0 = arith.constant 0 : i32
    %c0_i32_1 = arith.constant 0 : i32
    return %c0_i32, %c0_i32_0 : i32, i32
  }
  func.func @transform_17(%arg0: i32) -> (i32, i32) {
    %c0_i32 = arith.constant 0 : i32
    %c0_i32_0 = arith.constant 0 : i32
    %c0_i32_1 = arith.constant 0 : i32
    return %c0_i32, %c0_i32_0 : i32, i32
  }
  func.func @transform_18(%arg0: i32) -> (i32, i32) {
    %c0_i32 = arith.constant 0 : i32
    %c0_i32_0 = arith.constant 0 : i32
    %c0_i32_1 = arith.constant 0 : i32
    return %c0_i32, %c0_i32_0 : i32, i32
  }
  func.func @transform_19(%arg0: i32) -> (i32, i32) {
    %c0_i32 = arith.constant 0 : i32
    %c0_i32_0 = arith.constant 0 : i32
    %c0_i32_1 = arith.constant 0 : i32
    return %c0_i32, %c0_i32_0 : i32, i32
  }
  func.func @transform_20(%arg0: i32) -> (i32, i32) {
    %c0_i32 = arith.constant 0 : i32
    %c0_i32_0 = arith.constant 0 : i32
    %c0_i32_1 = arith.constant 0 : i32
    return %c0_i32, %c0_i32_0 : i32, i32
  }
  func.func @transform_21(%arg0: i32) -> (i32, i32) {
    %c0_i32 = arith.constant 0 : i32
    %c0_i32_0 = arith.constant 0 : i32
    %c0_i32_1 = arith.constant 0 : i32
    return %c0_i32, %c0_i32_0 : i32, i32
  }
  func.func @transform_22(%arg0: i32) -> (i32, i32) {
    %c0_i32 = arith.constant 0 : i32
    %c0_i32_0 = arith.constant 0 : i32
    %c0_i32_1 = arith.constant 0 : i32
    return %c0_i32, %c0_i32_0 : i32, i32
  }
  func.func @transform_23(%arg0: i32) -> (i32, i32) {
    %c0_i32 = arith.constant 0 : i32
    %c0_i32_0 = arith.constant 0 : i32
    %c0_i32_1 = arith.constant 0 : i32
    return %c0_i32, %c0_i32_0 : i32, i32
  }
  func.func @transform_24(%arg0: i32) -> (i32, i32, i32) {
    %c0_i32 = arith.constant 0 : i32
    %c0_i32_0 = arith.constant 0 : i32
    %c0_i32_1 = arith.constant 0 : i32
    return %arg0, %c0_i32, %c0_i32_0 : i32, i32, i32
  }
}

</mosaic_0001>

<bundles_post_ra>
// kernel: tpu_custom_call.1
= control target key start
LH: loop header
LB: loop body
LE: loop exit
PB: predicated region body
PF: predicated region fallthrough
CT: control target
= control target key end

     0   :  { %s8486_s0 = inlined_call_operand.vmem [shape: f32[2,32,100], index: 0, kind: input, shape index: {}]   ;;  %s8487_s1 = inlined_call_operand.vmem [shape: f32[2,100,100], index: 1, kind: input, shape index: {}]   ;;  %s8488_s2 = inlined_call_operand.vmem [shape: f32[32,32], index: 2, kind: input, shape index: {}]   ;;  %s8489_s3 = inlined_call_operand.vmem [shape: f32[32,1], index: 3, kind: input, shape index: {}]   ;;  %s8490_s4 = inlined_call_operand.vmem [shape: f32[32,32], index: 4, kind: input, shape index: {}]   ;;  %s8491_s5 = inlined_call_operand.vmem [shape: f32[32,1], index: 5, kind: input, shape index: {}]   ;;  %s8492_s6 = inlined_call_operand.vmem [shape: f32[32,1], index: 6, kind: input, shape index: {}]   ;;  %s8493_s7 = inlined_call_operand.vmem [shape: f32[32,1], index: 7, kind: input, shape index: {}]   ;;  %s8494_s8 = inlined_call_operand.vmem [shape: f32[256,32], index: 8, kind: input, shape index: {}]   ;;  %s8495_s9 = inlined_call_operand.vmem [shape: f32[256,1], index: 9, kind: input, shape index: {}]   ;;  %s8496_s10 = inlined_call_operand.vmem [shape: f32[32,256], index: 10, kind: input, shape index: {}]   ;;  %s8497_s11 = inlined_call_operand.vmem [shape: f32[32,1], index: 11, kind: input, shape index: {}]   ;;  %s8498_s12 = inlined_call_operand.vmem [shape: f32[32,1], index: 12, kind: input, shape index: {}]   ;;  %s8499_s13 = inlined_call_operand.vmem [shape: f32[32,1], index: 13, kind: input, shape index: {}]   ;;  %s8500_s14 = inlined_call_operand.vmem [shape: f32[32,32], index: 14, kind: input, shape index: {}]   ;;  %s8501_s15 = inlined_call_operand.vmem [shape: f32[32,1], index: 15, kind: input, shape index: {}]   ;;  %s8502_s16 = inlined_call_operand.vmem [shape: f32[32,1], index: 16, kind: input, shape index: {}]   ;;  %s8503_s17 = inlined_call_operand.vmem [shape: f32[32,1], index: 17, kind: input, shape index: {}]   ;;  %s8504_s18 = inlined_call_operand.vmem [shape: f32[256,32], index: 18, kind: input, shape index: {}]   ;;  %s8505_s19 = inlined_call_operand.vmem [shape: f32[256,1], index: 19, kind: input, shape index: {}]   ;;  %s8506_s20 = inlined_call_operand.vmem [shape: f32[32,256], index: 20, kind: input, shape index: {}]   ;;  %s8507_s21 = inlined_call_operand.vmem [shape: f32[32,1], index: 21, kind: input, shape index: {}]   ;;  %s8508_s22 = inlined_call_operand.vmem [shape: f32[32,1], index: 22, kind: input, shape index: {}]   ;;  %s8509_s23 = inlined_call_operand.vmem [shape: f32[32,1], index: 23, kind: input, shape index: {}]   ;;  %s8510_s24 = inlined_call_operand.hbm [shape: f32[2,32,100], index: 24, kind: output, shape index: {}]  }
   0x1   :  { %8584 = sst [smem:[#allocation125_spill]] %s8486_s0 }
   0x2   :  { %8585 = sst [smem:[#allocation126_spill]] %s8487_s1 }
   0x3   :  { %8586 = sst [smem:[#allocation127_spill]] %s8488_s2 }
   0x4   :  { %8587 = sst [smem:[#allocation128_spill]] %s8489_s3 }
   0x5   :  { %8588 = sst [smem:[#allocation129_spill]] %s8490_s4 }
   0x6   :  { %8589 = sst [smem:[#allocation130_spill]] %s8491_s5 }
   0x7   :  { %8590 = sst [smem:[#allocation131_spill]] %s8492_s6 }
   0x8   :  { %8591 = sst [smem:[#allocation132_spill]] %s8493_s7 }
   0x9   :  { %8592 = sst [smem:[#allocation133_spill]] %s8494_s8 }
   0xa   :  { %8593 = sst [smem:[#allocation134_spill]] %s8504_s18 }
   0xb   :  { %s8594_s27 = sld [smem:[#allocation125_spill]]  ;;  %v5753_v3 = vmov 0   ;;  %vm123_vm0 = vcmask 261120  }
   0xc   :  { %s8595_s18 = sld [smem:[#allocation128_spill]]  ;;  %5694 = vset.pattern.permute.xlu1 %v5753_v3  ;;  %5693 = vset.pattern.permute.xlu0 %v5753_v3 }
   0xd   :  { %s8596_s25 = sld [smem:[#allocation127_spill]] }
   0xe   :  { %s8597_s30 = sld [smem:[#allocation130_spill]] }
   0xf   :  { %s8599_s26 = sld [smem:[#allocation132_spill]] }
  0x11   :  { %v81_v0 = vld [vmem:[%s8594_s27 + $0x18] sm:$0xff]  ;;  %v80_v4 = vld [vmem:[%s8594_s27 + $0x10] sm:$0xff]  ;;  %v79_v6 = vld [vmem:[%s8594_s27 + $0x8] sm:$0xff] }
  0x12   :  { %v5888_v1 = vld [vmem:[%s8595_s18 + $0x10] sm:$0xff]  ;;  %v5893_v2 = vld [vmem:[%s8595_s18] sm:$0xff]  ;;  %5317 = vmatprep.subr.mxu0 %v81_v0  ;;  %v5909_v7 = vld [vmem:[%s8595_s18 + $0x18] sm:$0xff] }
  0x13   :  { %115 = vperm.xlu1 %5694, %v5888_v1   ;;  %v95_v5 = vld [vmem:[%s8596_s25] sm:$0xff]  ;;  %105 = vperm.xlu0 %5693, %v5893_v2   ;;  %v5914_v8 = vld [vmem:[%s8595_s18 + $0x8] sm:$0xff]  ;;  %v97_v13 = vld [vmem:[%s8596_s25 + $0x10] sm:$0xff]  ;;  %s8598_s18 = sld [smem:[#allocation131_spill]] }
  0x14   :  { %5318 = vmatpush3.msra.mxu0 %v81_v0  ;;  %5325 = vmatprep.mubr.msk.f32.mxu0 %vm123_vm0, %v95_v5  ;;  %v78_v9 = vld [vmem:[%s8594_s27] sm:$0xff]  ;;  %v96_v10 = vld [vmem:[%s8596_s25 + $0x8] sm:$0xff]  ;;  %v98_v14 = vld [vmem:[%s8596_s25 + $0x18] sm:$0xff] }
  0x15   :  { %5319 = vmatprep.subr.mxu0 %v80_v4  ;;  %v5928_v11 = vld [vmem:[%s8597_s30 + $0x8] sm:$0xff]  ;;  %v5933_v12 = vld [vmem:[%s8597_s30] sm:$0xff]  ;;  %v5948_v15 = vld [vmem:[%s8597_s30 + $0x18] sm:$0xff] }
  0x16   :  { %5320 = vmatpush3.msra.mxu0 %v80_v4  ;;  %v5953_v16 = vld [vmem:[%s8597_s30 + $0x10] sm:$0xff]  ;;  %v5978_v20 = vld [vmem:[%s8599_s26 + $0x18] sm:$0xff]  ;;  %v5997_v23 = vld [vmem:[%s8599_s26] sm:$0xff] }
  0x17   :  { %5321 = vmatprep.subr.mxu0 %v79_v6  ;;  %120 = vperm.xlu1 %5694, %v5909_v7   ;;  %v5990_v22 = vld [vmem:[%s8599_s26 + $0x10] sm:$0xff]  ;;  %v6002_v24 = vld [vmem:[%s8599_s26 + $0x8] sm:$0xff] }
  0x18   :  { %110 = vperm.xlu0 %5693, %v5914_v8   ;;  %5322 = vmatpush3.msra.mxu0 %v79_v6 }
  0x19   :  { %5323 = vmatprep.subr.mxu0 %v78_v9  ;;  %v5961_v17 = vld [vmem:[%s8598_s18 + $0x10] sm:$0xff]  ;;  %v5966_v18 = vld [vmem:[%s8598_s18 + $0x18] sm:$0xff]  ;;  %v5973_v19 = vld [vmem:[%s8598_s18 + $0x8] sm:$0xff] }
  0x1a   :  { %5324 = vmatpush3.msra.mxu0 %v78_v9  ;;  %v5985_v21 = vld [vmem:[%s8598_s18] sm:$0xff] }
  0x1b   :  { %5326 = vmatmul.mubr.msk.f32.vlgmr.msra.gmra.mxu0 %vm123_vm0, %v96_v10  ;;  %338 = vperm.xlu1 %5694, %v5928_v11  }
  0x1c   :  { %333 = vperm.xlu0 %5693, %v5933_v12   ;;  %5328 = vmatprep.mubr.msk.f32.mxu0 %vm123_vm0, %v97_v13 }
  0x1f   :  { %5329 = vmatmul.mubr.msk.f32.gmra.mxu0 %vm123_vm0, %v98_v14  ;;  %348 = vperm.xlu1 %5694, %v5948_v15  }
  0x20   :  { %343 = vperm.xlu0 %5693, %v5953_v16  }
  0x23   :  { %515 = vperm.xlu1 %5694, %v5961_v17  }
  0x24   :  { %520 = vperm.xlu0 %5693, %v5966_v18  }
  0x27   :  { %510 = vperm.xlu1 %5694, %v5973_v19  }
  0x28   :  { %544 = vperm.xlu0 %5693, %v5978_v20  }
  0x2b   :  { %505 = vperm.xlu1 %5694, %v5985_v21  }
  0x2c   :  { %539 = vperm.xlu0 %5693, %v5990_v22  }
  0x2d   :  { %29 = vsyncpa [#allocation3], 0  ;;  %v6009_v25 = vld [vmem:[%s8495_s9 + $0x78] sm:$0xff]  ;;  %v6021_v27 = vld [vmem:[%s8495_s9 + $0x70] sm:$0xff]  ;;  %s8600_s3 = sld [smem:[#allocation126_spill]]  ;;  %vm234_vm1 = vcmask 1043456  }
  0x2e   :  { %v6014_v26 = vld [vmem:[%s8495_s9 + $0xf8] sm:$0xff]  ;;  %v6026_v28 = vld [vmem:[%s8495_s9 + $0xf0] sm:$0xff]  ;;  %v6033_v29 = vld [vmem:[%s8495_s9 + $0x68] sm:$0xff]  ;;  %vm221_vm2 = vcmask 818176   ;;  %s8714_s8 = sld [smem:[#allocation129_spill]] }
  0x2f   :  { %529 = vperm.xlu1 %5694, %v5997_v23   ;;  %v6038_v30 = vld [vmem:[%s8495_s9 + $0xe8] sm:$0xff]  ;;  %v6045_v31 = vld [vmem:[%s8495_s9 + $0x60] sm:$0xff]  ;;  %v6057_v33 = vld [vmem:[%s8495_s9 + $0x58] sm:$0xff] }
  0x30   :  { %534 = vperm.xlu0 %5693, %v6002_v24   ;;  %v6050_v32 = vld [vmem:[%s8495_s9 + $0xe0] sm:$0xff]  ;;  %v6062_v34 = vld [vmem:[%s8495_s9 + $0xd8] sm:$0xff]  ;;  %v6069_v35 = vld [vmem:[%s8495_s9 + $0x50] sm:$0xff] }
  0x31   :  { %v6074_v36 = vld [vmem:[%s8495_s9 + $0xd0] sm:$0xff]  ;;  %v6085_v38 = vld [vmem:[%s8495_s9 + $0x48] sm:$0xff]  ;;  %v6104_v42 = vld [vmem:[%s8495_s9 + $0x40] sm:$0xff] }
  0x32   :  { %v6094_v40 = vld [vmem:[%s8495_s9 + $0xc8] sm:$0xff]  ;;  %v6112_v44 = vld [vmem:[%s8495_s9 + $0xc0] sm:$0xff]  ;;  %v6122_v46 = vld [vmem:[%s8495_s9 + $0x38] sm:$0xff] }
  0x33   :  { %692 = vperm.xlu1 %5694, %v6009_v25   ;;  %v94_v37 = vld [vmem:[%s8600_s3 + $0x60] sm:$0xf]  ;;  %v93_v39 = vld [vmem:[%s8600_s3 + $0x58] sm:$0xff]  ;;  %v92_v41 = vld [vmem:[%s8600_s3 + $0x50] sm:$0xff] }
  0x34   :  { %772 = vperm.xlu0 %5693, %v6014_v26   ;;  %5331 = vmatprep.subr.msk.mxu1 %vm234_vm1, %v94_v37  ;;  %v91_v43 = vld [vmem:[%s8600_s3 + $0x48] sm:$0xff]  ;;  %v90_v45 = vld [vmem:[%s8600_s3 + $0x40] sm:$0xff]  ;;  %v89_v47 = vld [vmem:[%s8600_s3 + $0x38] sm:$0xff] }
  0x35   :  { %5332 = vmatpush3.msk.msra.mxu1 %vm234_vm1, %v94_v37  ;;  %v6130_v48 = vld [vmem:[%s8495_s9 + $0xb8] sm:$0xff]  ;;  %v88_v49 = vld [vmem:[%s8600_s3 + $0x30] sm:$0xff]  ;;  %v87_v51 = vld [vmem:[%s8600_s3 + $0x28] sm:$0xff] }
  0x36   :  { %5333 = vmatprep.subr.mxu1 %v93_v39  ;;  %v6140_v50 = vld [vmem:[%s8495_s9 + $0x30] sm:$0xff]  ;;  %v86_v53 = vld [vmem:[%s8600_s3 + $0x20] sm:$0xff]  ;;  %v6158_v54 = vld [vmem:[%s8495_s9 + $0x28] sm:$0xff] }
  0x37   :  { %687 = vperm.xlu1 %5694, %v6021_v27   ;;  %5334 = vmatpush3.msra.mxu1 %v93_v39  ;;  %v6148_v52 = vld [vmem:[%s8495_s9 + $0xb0] sm:$0xff]  ;;  %v85_v55 = vld [vmem:[%s8600_s3 + $0x18] sm:$0xff]  ;;  %v6166_v56 = vld [vmem:[%s8495_s9 + $0xa8] sm:$0xff] }
  0x38   :  { %767 = vperm.xlu0 %5693, %v6026_v28   ;;  %5335 = vmatprep.subr.mxu1 %v92_v41  ;;  %v84_v57 = vld [vmem:[%s8600_s3 + $0x10] sm:$0xff]  ;;  %v6176_v58 = vld [vmem:[%s8495_s9 + $0x20] sm:$0xff]  ;;  %v83_v59 = vld [vmem:[%s8600_s3 + $0x8] sm:$0xff] }
  0x39   :  { %5336 = vmatpush3.msra.mxu1 %v92_v41  ;;  %v6184_v60 = vld [vmem:[%s8495_s9 + $0xa0] sm:$0xff]  ;;  %v6194_v62 = vld [vmem:[%s8495_s9 + $0x18] sm:$0xff]  ;;  %v6206_v0 = vld [vmem:[%s8495_s9 + $0x10] sm:$0xff] }
  0x3a   :  { %5337 = vmatprep.subr.mxu1 %v91_v43  ;;  %v82_v61 = vld [vmem:[%s8600_s3] sm:$0xff]  ;;  %v6199_v63 = vld [vmem:[%s8495_s9 + $0x98] sm:$0xff]  ;;  %v6211_v3 = vld [vmem:[%s8495_s9 + $0x90] sm:$0xff] }
  0x3b   :  { %682 = vperm.xlu1 %5694, %v6033_v29   ;;  %5338 = vmatpush3.msra.mxu1 %v91_v43  ;;  %v6218_v4 = vld [vmem:[%s8495_s9 + $0x8] sm:$0xff]  ;;  %v6230_v6 = vld [vmem:[%s8495_s9] sm:$0xff]  ;;  %v6254_v14 = vld [vmem:[%s8497_s11 + $0x18] sm:$0xff] }
  0x3c   :  { %762 = vperm.xlu0 %5693, %v6038_v30   ;;  %5339 = vmatprep.subr.mxu1 %v90_v45  ;;  %v6223_v5 = vld [vmem:[%s8495_s9 + $0x88] sm:$0xff]  ;;  %v6235_v9 = vld [vmem:[%s8495_s9 + $0x80] sm:$0xff]  ;;  %8603 = vst [vmem:[#allocation7_spill] sm:$0xff] %v6254_v14  ;;  %v6259_v37 = vld [vmem:[%s8497_s11 + $0x10] sm:$0xff] }
  0x3d   :  { %5340 = vmatpush3.msra.mxu1 %v90_v45  ;;  %v6242_v10 = vld [vmem:[%s8497_s11 + $0x8] sm:$0xff]  ;;  %v6247_v13 = vld [vmem:[%s8497_s11] sm:$0xff]  ;;  %8604 = vst [vmem:[#allocation8_spill] sm:$0xff] %v6259_v37  ;;  %v6266_v39 = vld [vmem:[%s8498_s12 + $0x10] sm:$0xff] }
  0x3e   :  { %5341 = vmatprep.subr.mxu1 %v89_v47  ;;  %8601 = vst [vmem:[#allocation5_spill] sm:$0xff] %v6242_v10  ;;  %8602 = vst [vmem:[#allocation6_spill] sm:$0xff] %v6247_v13  ;;  %v6271_v41 = vld [vmem:[%s8498_s12 + $0x18] sm:$0xff]  ;;  %v6283_v45 = vld [vmem:[%s8498_s12 + $0x8] sm:$0xff] }
  0x3f   :  { %677 = vperm.xlu1 %5694, %v6045_v31   ;;  %5342 = vmatpush3.msra.mxu1 %v89_v47  ;;  %8605 = vst [vmem:[#allocation9_spill] sm:$0xff] %v6266_v39  ;;  %8606 = vst [vmem:[#allocation10_spill] sm:$0xff] %v6271_v41  ;;  %v6278_v43 = vld [vmem:[%s8499_s13 + $0x18] sm:$0xff]  ;;  %v6290_v47 = vld [vmem:[%s8499_s13 + $0x10] sm:$0xff] }
  0x40   :  { %757 = vperm.xlu0 %5693, %v6050_v32   ;;  %5343 = vmatprep.subr.mxu1 %v88_v49  ;;  %8607 = vst [vmem:[#allocation11_spill] sm:$0xff] %v6278_v43  ;;  %8608 = vst [vmem:[#allocation12_spill] sm:$0xff] %v6283_v45 }
  0x41   :  { %5344 = vmatpush3.msra.mxu1 %v88_v49  ;;  %8609 = vst [vmem:[#allocation13_spill] sm:$0xff] %v6290_v47  ;;  %v6295_v49 = vld [vmem:[%s8498_s12] sm:$0xff]  ;;  %s8829_s12 = sld [smem:[#allocation133_spill]] }
  0x42   :  { %5345 = vmatprep.subr.mxu1 %v87_v51  ;;  %8610 = vst [vmem:[#allocation14_spill] sm:$0xff] %v6295_v49 }
  0x43   :  { %672 = vperm.xlu1 %5694, %v6057_v33   ;;  %5346 = vmatpush3.msra.mxu1 %v87_v51  ;;  %v6302_v51 = vld [vmem:[%s8499_s13] sm:$0xff] }
  0x44   :  { %752 = vperm.xlu0 %5693, %v6062_v34   ;;  %5347 = vmatprep.subr.mxu1 %v86_v53  ;;  %8611 = vst [vmem:[#allocation15_spill] sm:$0xff] %v6302_v51 }
  0x45   :  { %5348 = vmatpush3.msra.mxu1 %v86_v53  ;;  %v1364_v53 = vld [vmem:[%s8501_s15 + $0x8] sm:$0xff] }
  0x46   :  { %5349 = vmatprep.subr.mxu1 %v85_v55 }
  0x47   :  { %667 = vperm.xlu1 %5694, %v6069_v35   ;;  %5350 = vmatpush3.msra.mxu1 %v85_v55  ;;  %v6310_v55 = vld [vmem:[%s8499_s13 + $0x8] sm:$0xff] }
  0x48   :  { %747 = vperm.xlu0 %5693, %v6074_v36   ;;  %5351 = vmatprep.subr.mxu1 %v84_v57  ;;  %8612 = vst [vmem:[#allocation16_spill] sm:$0xff] %v6310_v55 }
  0x49   :  { %5352 = vmatpush3.msra.mxu1 %v84_v57  ;;  %v1363_v57 = vld [vmem:[%s8501_s15] sm:$0xff] }
  0x4a   :  { %5353 = vmatprep.subr.mxu1 %v83_v59 }
  0x4b   :  { %662 = vperm.xlu1 %5694, %v6085_v38   ;;  %5354 = vmatpush3.msra.mxu1 %v83_v59  ;;  %v6316_v59 = vmul.f32 2.0, %v1364_v53 }
  0x4c   :  { %742 = vperm.xlu0 %5693, %v6094_v40   ;;  %5355 = vmatprep.subr.mxu1 %v82_v61 }
  0x4d   :  { %5356 = vmatpush3.msra.mxu1 %v82_v61  ;;  %8613 = vst [vmem:[#allocation17_spill] sm:$0xff] %v6316_v59  ;;  %v6319_v61 = vmul.f32 2.0, %v1363_v57 }
  0x4f   :  { %657 = vperm.xlu1 %5694, %v6104_v42   ;;  %8614 = vst [vmem:[#allocation18_spill] sm:$0xff] %v6319_v61 }
  0x50   :  { %737 = vperm.xlu0 %5693, %v6112_v44  }
  0x53   :  { %652 = vperm.xlu1 %5694, %v6122_v46  }
  0x54   :  { %732 = vperm.xlu0 %5693, %v6130_v48  }
  0x57   :  { %647 = vperm.xlu1 %5694, %v6140_v50  }
  0x58   :  { %727 = vperm.xlu0 %5693, %v6148_v52  }
  0x5b   :  { %642 = vperm.xlu1 %5694, %v6158_v54  }
  0x5c   :  { %722 = vperm.xlu0 %5693, %v6166_v56  }
  0x5f   :  { %637 = vperm.xlu1 %5694, %v6176_v58  }
  0x60   :  { %717 = vperm.xlu0 %5693, %v6184_v60  }
  0x63   :  { %632 = vperm.xlu1 %5694, %v6194_v62  }
  0x64   :  { %712 = vperm.xlu0 %5693, %v6199_v63  }
  0x67   :  { %627 = vperm.xlu1 %5694, %v6206_v0  }
  0x68   :  { %707 = vperm.xlu0 %5693, %v6211_v3  }
  0x6b   :  { %622 = vperm.xlu1 %5694, %v6218_v4  }
  0x6c   :  { %702 = vperm.xlu0 %5693, %v6223_v5  }
  0x6f   :  { %617 = vperm.xlu1 %5694, %v6230_v6  }
  0x70   :  { %697 = vperm.xlu0 %5693, %v6235_v9  }
  0x73   :  { %1147 = vperm.xlu1 %5694, %v6242_v10  }
  0x74   :  { %1142 = vperm.xlu0 %5693, %v6247_v13  }
  0x77   :  { %1157 = vperm.xlu1 %5694, %v6254_v14  }
  0x78   :  { %1152 = vperm.xlu0 %5693, %v6259_v37  }
  0x7b   :  { %1315 = vperm.xlu1 %5694, %v6266_v39  }
  0x7c   :  { %1320 = vperm.xlu0 %5693, %v6271_v41  }
  0x7f   :  { %1348 = vperm.xlu1 %5694, %v6278_v43  }
  0x80   :  { %1310 = vperm.xlu0 %5693, %v6283_v45  }
  0x83   :  { %1343 = vperm.xlu1 %5694, %v6290_v47   ;;  %v1365_v47 = vld [vmem:[%s8501_s15 + $0x10] sm:$0xff] }
  0x84   :  { %1305 = vperm.xlu0 %5693, %v6295_v49   ;;  %v1366_v49 = vld [vmem:[%s8501_s15 + $0x18] sm:$0xff]  ;;  %v6331_v53 = vmul.f32 2.0, %v1365_v47 }
  0x85   :  { %v6328_v45 = vmul.f32 2.0, %v1366_v49  ;;  %v6347_v49 = vld [vmem:[%s8502_s16 + $0x18] sm:$0xff] }
  0x86   :  { %8616 = vst [vmem:[#allocation20_spill] sm:$0xff] %v6331_v53  ;;  %8618 = vst [vmem:[#allocation22_spill] sm:$0xff] %v6347_v49 }
  0x87   :  { %1333 = vperm.xlu1 %5694, %v6302_v51   ;;  %8615 = vst [vmem:[#allocation19_spill] sm:$0xff] %v6328_v45 }
  0x88   :  { %1338 = vperm.xlu0 %5693, %v6310_v55   ;;  %v6342_v55 = vld [vmem:[%s8502_s16 + $0x10] sm:$0xff] }
  0x89   :  { %8617 = vst [vmem:[#allocation21_spill] sm:$0xff] %v6342_v55 }
  0x8b   :  { %1378 = vperm.xlu1 %5694, %v6316_v59  }
  0x8c   :  { %1373 = vperm.xlu0 %5693, %v6319_v61  }
  0x8e   :  { %v6333_v51 = vpop.permute.xlu1 %115  ;;  %v6335_v57 = vpop.permute.xlu0 %105 }
  0x8f   :  { %1388 = vperm.xlu1 %5694, %v6328_v45   ;;  %v6363_v45 = vld [vmem:[%s8502_s16 + $0x8] sm:$0xff] }
  0x90   :  { %1383 = vperm.xlu0 %5693, %v6331_v53   ;;  %v6358_v53 = vld [vmem:[%s8503_s17 + $0x18] sm:$0xff]  ;;  %8620 = vst [vmem:[#allocation24_spill] sm:$0xff] %v6363_v45 }
  0x91   :  { %8619 = vst [vmem:[#allocation23_spill] sm:$0xff] %v6358_v53 }
  0x92   :  { %v6349_v47 = vpop.permute.xlu1 %120 }
  0x93   :  { %v6351_v61 = vpop.permute.xlu0 %110  ;;  %1553 = vperm.xlu1 %5694, %v6342_v55   ;;  %v6379_v55 = vld [vmem:[%s8502_s16] sm:$0xff] }
  0x94   :  { %1558 = vperm.xlu0 %5693, %v6347_v49   ;;  %v6374_v49 = vld [vmem:[%s8503_s17 + $0x10] sm:$0xff]  ;;  %8624 = vst [vmem:[#allocation28_spill] sm:$0xff] %v6379_v55 }
  0x95   :  { %8623 = vst [vmem:[#allocation27_spill] sm:$0xff] %v6374_v49 }
  0x96   :  { %v6365_v59 = vpop.permute.xlu1 %338 }
  0x97   :  { %8621 = vst [vmem:[#allocation25_spill] sm:$0xff] %v6365_v59  ;;  %v6367_v43 = vpop.permute.xlu0 %333  ;;  %1586 = vperm.xlu1 %5694, %v6358_v53   ;;  %v6395_v59 = vld [vmem:[%s8503_s17 + $0x8] sm:$0xff] }
  0x98   :  { %8622 = vst [vmem:[#allocation26_spill] sm:$0xff] %v6367_v43  ;;  %1548 = vperm.xlu0 %5693, %v6363_v45   ;;  %v6390_v43 = vld [vmem:[%s8503_s17] sm:$0xff]  ;;  %8628 = vst [vmem:[#allocation32_spill] sm:$0xff] %v6395_v59 }
  0x99   :  { %8627 = vst [vmem:[#allocation31_spill] sm:$0xff] %v6390_v43 }
  0x9a   :  { %v6381_v41 = vpop.permute.xlu1 %348 }
  0x9b   :  { %8625 = vst [vmem:[#allocation29_spill] sm:$0xff] %v6381_v41  ;;  %v6383_v39 = vpop.permute.xlu0 %343  ;;  %1581 = vperm.xlu1 %5694, %v6374_v49   ;;  %v6411_v41 = vld [vmem:[%s8505_s19 + $0xf8] sm:$0xff] }
  0x9c   :  { %8626 = vst [vmem:[#allocation30_spill] sm:$0xff] %v6383_v39  ;;  %1543 = vperm.xlu0 %5693, %v6379_v55   ;;  %v6406_v39 = vld [vmem:[%s8505_s19 + $0x78] sm:$0xff]  ;;  %8632 = vst [vmem:[#allocation36_spill] sm:$0xff] %v6411_v41 }
  0x9d   :  { %8631 = vst [vmem:[#allocation35_spill] sm:$0xff] %v6406_v39 }
  0x9e   :  { %v6397_v45 = vpop.permute.xlu1 %515 }
  0x9f   :  { %8629 = vst [vmem:[#allocation33_spill] sm:$0xff] %v6397_v45  ;;  %v6399_v53 = vpop.permute.xlu0 %520  ;;  %1571 = vperm.xlu1 %5694, %v6390_v43   ;;  %v6422_v45 = vld [vmem:[%s8505_s19 + $0x70] sm:$0xff] }
  0xa0   :  { %8630 = vst [vmem:[#allocation34_spill] sm:$0xff] %v6399_v53  ;;  %1576 = vperm.xlu0 %5693, %v6395_v59   ;;  %8635 = vst [vmem:[#allocation39_spill] sm:$0xff] %v6422_v45  ;;  %v6427_v53 = vld [vmem:[%s8505_s19 + $0xf0] sm:$0xff] }
  0xa1   :  { %8636 = vst [vmem:[#allocation40_spill] sm:$0xff] %v6427_v53 }
  0xa2   :  { %v6413_v55 = vpop.permute.xlu1 %510 }
  0xa3   :  { %8633 = vst [vmem:[#allocation37_spill] sm:$0xff] %v6413_v55  ;;  %v6415_v49 = vpop.permute.xlu0 %544  ;;  %1734 = vperm.xlu1 %5694, %v6406_v39   ;;  %v6438_v55 = vld [vmem:[%s8505_s19 + $0x68] sm:$0xff] }
  0xa4   :  { %8634 = vst [vmem:[#allocation38_spill] sm:$0xff] %v6415_v49  ;;  %1814 = vperm.xlu0 %5693, %v6411_v41   ;;  %8639 = vst [vmem:[#allocation43_spill] sm:$0xff] %v6438_v55  ;;  %v6443_v49 = vld [vmem:[%s8505_s19 + $0xe8] sm:$0xff] }
  0xa5   :  { %8640 = vst [vmem:[#allocation44_spill] sm:$0xff] %v6443_v49 }
  0xa6   :  { %v6429_v59 = vpop.permute.xlu1 %505 }
  0xa7   :  { %8637 = vst [vmem:[#allocation41_spill] sm:$0xff] %v6429_v59  ;;  %v6431_v43 = vpop.permute.xlu0 %539  ;;  %1729 = vperm.xlu1 %5694, %v6422_v45   ;;  %v6454_v59 = vld [vmem:[%s8505_s19 + $0x60] sm:$0xff] }
  0xa8   :  { %8638 = vst [vmem:[#allocation42_spill] sm:$0xff] %v6431_v43  ;;  %1809 = vperm.xlu0 %5693, %v6427_v53   ;;  %8643 = vst [vmem:[#allocation47_spill] sm:$0xff] %v6454_v59  ;;  %v6459_v43 = vld [vmem:[%s8505_s19 + $0xe0] sm:$0xff] }
  0xa9   :  { %8644 = vst [vmem:[#allocation48_spill] sm:$0xff] %v6459_v43 }
  0xaa   :  { %v6445_v41 = vpop.permute.xlu1 %529 }
  0xab   :  { %8641 = vst [vmem:[#allocation45_spill] sm:$0xff] %v6445_v41  ;;  %v6447_v39 = vpop.permute.xlu0 %534  ;;  %1724 = vperm.xlu1 %5694, %v6438_v55   ;;  %v6470_v41 = vld [vmem:[%s8505_s19 + $0x58] sm:$0xff] }
  0xac   :  { %8642 = vst [vmem:[#allocation46_spill] sm:$0xff] %v6447_v39  ;;  %1804 = vperm.xlu0 %5693, %v6443_v49   ;;  %8647 = vst [vmem:[#allocation51_spill] sm:$0xff] %v6470_v41  ;;  %v6475_v39 = vld [vmem:[%s8505_s19 + $0xd8] sm:$0xff] }
  0xad   :  { %8648 = vst [vmem:[#allocation52_spill] sm:$0xff] %v6475_v39 }
  0xae   :  { %v6461_v53 = vpop.permute.xlu1 %692 }
  0xaf   :  { %8645 = vst [vmem:[#allocation49_spill] sm:$0xff] %v6461_v53  ;;  %v6463_v45 = vpop.permute.xlu0 %772  ;;  %1719 = vperm.xlu1 %5694, %v6454_v59   ;;  %v6491_v53 = vld [vmem:[%s8505_s19 + $0xd0] sm:$0xff] }
  0xb0   :  { %8646 = vst [vmem:[#allocation50_spill] sm:$0xff] %v6463_v45  ;;  %1799 = vperm.xlu0 %5693, %v6459_v43   ;;  %v6486_v45 = vld [vmem:[%s8505_s19 + $0x50] sm:$0xff]  ;;  %8652 = vst [vmem:[#allocation56_spill] sm:$0xff] %v6491_v53 }
  0xb1   :  { %8651 = vst [vmem:[#allocation55_spill] sm:$0xff] %v6486_v45 }
  0xb2   :  { %v6477_v49 = vpop.permute.xlu1 %687 }
  0xb3   :  { %8649 = vst [vmem:[#allocation53_spill] sm:$0xff] %v6477_v49  ;;  %v6479_v55 = vpop.permute.xlu0 %767  ;;  %1714 = vperm.xlu1 %5694, %v6470_v41   ;;  %v6507_v49 = vld [vmem:[%s8505_s19 + $0xc8] sm:$0xff] }
  0xb4   :  { %8650 = vst [vmem:[#allocation54_spill] sm:$0xff] %v6479_v55  ;;  %1794 = vperm.xlu0 %5693, %v6475_v39   ;;  %v6502_v55 = vld [vmem:[%s8505_s19 + $0x48] sm:$0xff]  ;;  %8656 = vst [vmem:[#allocation60_spill] sm:$0xff] %v6507_v49 }
  0xb5   :  { %8655 = vst [vmem:[#allocation59_spill] sm:$0xff] %v6502_v55 }
  0xb6   :  { %v6493_v43 = vpop.permute.xlu1 %682 }
  0xb7   :  { %8653 = vst [vmem:[#allocation57_spill] sm:$0xff] %v6493_v43  ;;  %v6495_v59 = vpop.permute.xlu0 %762  ;;  %1709 = vperm.xlu1 %5694, %v6486_v45   ;;  %v6518_v43 = vld [vmem:[%s8505_s19 + $0x40] sm:$0xff] }
  0xb8   :  { %8654 = vst [vmem:[#allocation58_spill] sm:$0xff] %v6495_v59  ;;  %1789 = vperm.xlu0 %5693, %v6491_v53   ;;  %8659 = vst [vmem:[#allocation63_spill] sm:$0xff] %v6518_v43  ;;  %v6523_v59 = vld [vmem:[%s8505_s19 + $0xc0] sm:$0xff] }
  0xb9   :  { %8660 = vst [vmem:[#allocation64_spill] sm:$0xff] %v6523_v59 }
  0xba   :  { %v6509_v39 = vpop.permute.xlu1 %677 }
  0xbb   :  { %8657 = vst [vmem:[#allocation61_spill] sm:$0xff] %v6509_v39  ;;  %v6511_v41 = vpop.permute.xlu0 %757  ;;  %1704 = vperm.xlu1 %5694, %v6502_v55   ;;  %v6534_v39 = vld [vmem:[%s8505_s19 + $0x38] sm:$0xff] }
  0xbc   :  { %8658 = vst [vmem:[#allocation62_spill] sm:$0xff] %v6511_v41  ;;  %1784 = vperm.xlu0 %5693, %v6507_v49   ;;  %8663 = vst [vmem:[#allocation67_spill] sm:$0xff] %v6534_v39  ;;  %v6539_v41 = vld [vmem:[%s8505_s19 + $0xb8] sm:$0xff] }
  0xbd   :  { %8664 = vst [vmem:[#allocation68_spill] sm:$0xff] %v6539_v41 }
  0xbe   :  { %v6525_v53 = vpop.permute.xlu1 %672 }
  0xbf   :  { %8661 = vst [vmem:[#allocation65_spill] sm:$0xff] %v6525_v53  ;;  %v6527_v45 = vpop.permute.xlu0 %752  ;;  %1699 = vperm.xlu1 %5694, %v6518_v43   ;;  %v6550_v53 = vld [vmem:[%s8505_s19 + $0x30] sm:$0xff] }
  0xc0   :  { %8662 = vst [vmem:[#allocation66_spill] sm:$0xff] %v6527_v45  ;;  %1779 = vperm.xlu0 %5693, %v6523_v59   ;;  %8667 = vst [vmem:[#allocation71_spill] sm:$0xff] %v6550_v53  ;;  %v6555_v45 = vld [vmem:[%s8505_s19 + $0xb0] sm:$0xff] }
  0xc1   :  { %8668 = vst [vmem:[#allocation72_spill] sm:$0xff] %v6555_v45 }
  0xc2   :  { %v6541_v49 = vpop.permute.xlu1 %667 }
  0xc3   :  { %8665 = vst [vmem:[#allocation69_spill] sm:$0xff] %v6541_v49  ;;  %v6543_v55 = vpop.permute.xlu0 %747  ;;  %1694 = vperm.xlu1 %5694, %v6534_v39   ;;  %v6566_v49 = vld [vmem:[%s8505_s19 + $0x28] sm:$0xff] }
  0xc4   :  { %8666 = vst [vmem:[#allocation70_spill] sm:$0xff] %v6543_v55  ;;  %1774 = vperm.xlu0 %5693, %v6539_v41   ;;  %8671 = vst [vmem:[#allocation75_spill] sm:$0xff] %v6566_v49  ;;  %v6571_v55 = vld [vmem:[%s8505_s19 + $0xa8] sm:$0xff] }
  0xc5   :  { %8672 = vst [vmem:[#allocation76_spill] sm:$0xff] %v6571_v55 }
  0xc6   :  { %v6557_v59 = vpop.permute.xlu1 %662 }
  0xc7   :  { %8669 = vst [vmem:[#allocation73_spill] sm:$0xff] %v6557_v59  ;;  %v6559_v43 = vpop.permute.xlu0 %742  ;;  %1689 = vperm.xlu1 %5694, %v6550_v53   ;;  %v6582_v59 = vld [vmem:[%s8505_s19 + $0x20] sm:$0xff] }
  0xc8   :  { %8670 = vst [vmem:[#allocation74_spill] sm:$0xff] %v6559_v43  ;;  %1769 = vperm.xlu0 %5693, %v6555_v45   ;;  %8675 = vst [vmem:[#allocation79_spill] sm:$0xff] %v6582_v59  ;;  %v6587_v43 = vld [vmem:[%s8505_s19 + $0xa0] sm:$0xff] }
  0xc9   :  { %8676 = vst [vmem:[#allocation80_spill] sm:$0xff] %v6587_v43 }
  0xca   :  { %v6573_v41 = vpop.permute.xlu1 %657 }
  0xcb   :  { %8673 = vst [vmem:[#allocation77_spill] sm:$0xff] %v6573_v41  ;;  %v6575_v39 = vpop.permute.xlu0 %737  ;;  %1684 = vperm.xlu1 %5694, %v6566_v49   ;;  %v6598_v41 = vld [vmem:[%s8505_s19 + $0x18] sm:$0xff] }
  0xcc   :  { %8674 = vst [vmem:[#allocation78_spill] sm:$0xff] %v6575_v39  ;;  %1764 = vperm.xlu0 %5693, %v6571_v55   ;;  %8679 = vst [vmem:[#allocation83_spill] sm:$0xff] %v6598_v41  ;;  %v6603_v39 = vld [vmem:[%s8505_s19 + $0x98] sm:$0xff] }
  0xcd   :  { %8680 = vst [vmem:[#allocation84_spill] sm:$0xff] %v6603_v39 }
  0xce   :  { %v6589_v45 = vpop.permute.xlu1 %652 }
  0xcf   :  { %8677 = vst [vmem:[#allocation81_spill] sm:$0xff] %v6589_v45  ;;  %v6591_v53 = vpop.permute.xlu0 %732  ;;  %1679 = vperm.xlu1 %5694, %v6582_v59   ;;  %v6614_v45 = vld [vmem:[%s8505_s19 + $0x10] sm:$0xff] }
  0xd0   :  { %8678 = vst [vmem:[#allocation82_spill] sm:$0xff] %v6591_v53  ;;  %1759 = vperm.xlu0 %5693, %v6587_v43   ;;  %8683 = vst [vmem:[#allocation87_spill] sm:$0xff] %v6614_v45  ;;  %v6619_v53 = vld [vmem:[%s8505_s19 + $0x90] sm:$0xff] }
  0xd1   :  { %8684 = vst [vmem:[#allocation88_spill] sm:$0xff] %v6619_v53 }
  0xd2   :  { %v6605_v55 = vpop.permute.xlu1 %647 }
  0xd3   :  { %8681 = vst [vmem:[#allocation85_spill] sm:$0xff] %v6605_v55  ;;  %v6607_v49 = vpop.permute.xlu0 %727  ;;  %1674 = vperm.xlu1 %5694, %v6598_v41   ;;  %v6630_v55 = vld [vmem:[%s8505_s19 + $0x8] sm:$0xff] }
  0xd4   :  { %8682 = vst [vmem:[#allocation86_spill] sm:$0xff] %v6607_v49  ;;  %1754 = vperm.xlu0 %5693, %v6603_v39   ;;  %8687 = vst [vmem:[#allocation91_spill] sm:$0xff] %v6630_v55  ;;  %v6635_v49 = vld [vmem:[%s8505_s19 + $0x88] sm:$0xff] }
  0xd5   :  { %8688 = vst [vmem:[#allocation92_spill] sm:$0xff] %v6635_v49 }
  0xd6   :  { %v6621_v43 = vpop.permute.xlu1 %642 }
  0xd7   :  { %8685 = vst [vmem:[#allocation89_spill] sm:$0xff] %v6621_v43  ;;  %v6623_v59 = vpop.permute.xlu0 %722  ;;  %1669 = vperm.xlu1 %5694, %v6614_v45   ;;  %v6651_v45 = vld [vmem:[%s8505_s19 + $0x80] sm:$0xff] }
  0xd8   :  { %8686 = vst [vmem:[#allocation90_spill] sm:$0xff] %v6623_v59  ;;  %1749 = vperm.xlu0 %5693, %v6619_v53   ;;  %v6646_v59 = vld [vmem:[%s8505_s19] sm:$0xff]  ;;  %s8885_s19 = sld [smem:[#allocation134_spill]] }
  0xda   :  { %v6637_v39 = vpop.permute.xlu1 %637 }
  0xdb   :  { %8689 = vst [vmem:[#allocation93_spill] sm:$0xff] %v6637_v39  ;;  %v6639_v41 = vpop.permute.xlu0 %717  ;;  %v5327_v43 = vpop.f32.mrf.mxu0  ;;  %1664 = vperm.xlu1 %5694, %v6630_v55  }
  0xdc   :  { %8690 = vst [vmem:[#allocation94_spill] sm:$0xff] %v6639_v41  ;;  %1744 = vperm.xlu0 %5693, %v6635_v49   ;;  %v208_v55 = vadd.f32 %v5327_v43, %v6351_v61 }
  0xdd   :  { %v202_v53 = vpop.f32.mrf.mxu0 }
  0xde   :  { %v203_v39 = vadd.f32 %v202_v53, %v6335_v57  ;;  %v6654_v41 = vpop.permute.xlu1 %632 }
  0xdf   :  { %v6657_v37 = vpop.permute.xlu0 %712  ;;  %v5330_v49 = vpop.f32.mrf.mxu0  ;;  %1659 = vperm.xlu1 %5694, %v6646_v59  }
  0xe0   :  { %1739 = vperm.xlu0 %5693, %v6651_v45   ;;  %5357 = vmatprep.mubr.msk.f32.mxu1 %vm221_vm2, %v203_v39  ;;  %v218_v53 = vadd.f32 %v5330_v49, %v6349_v47  ;;  %v8739_v49 = vld [vmem:[#allocation15_spill] sm:$0xff]  ;;  %v8740_v47 = vld [vmem:[#allocation16_spill] sm:$0xff] }
  0xe1   :  { %v212_v14 = vpop.f32.mrf.mxu0  ;;  %5358 = vmatmul.mubr.msk.f32.vlgmr.msra.gmra.mxu1 %vm221_vm2, %v208_v55 }
  0xe2   :  { %v213_v13 = vadd.f32 %v212_v14, %v6333_v51  ;;  %v6664_v10 = vpop.permute.xlu1 %627 }
  0xe3   :  { %v6667_v57 = vpop.permute.xlu0 %707  ;;  %2434 = vperm.xlu1 %5694, %v5914_v8  }
  0xe4   :  { %2429 = vperm.xlu0 %5693, %v5893_v2   ;;  %5360 = vmatprep.mubr.msk.f32.mxu1 %vm221_vm2, %v213_v13 }
  0xe5   :  { %5361 = vmatmul.mubr.msk.f32.gmra.mxu1 %vm221_vm2, %v218_v53 }
  0xe6   :  { %v6673_v39 = vpop.permute.xlu1 %622 }
  0xe7   :  { %v6675_v43 = vpop.permute.xlu0 %702  ;;  %2444 = vperm.xlu1 %5694, %v5909_v7  }
  0xe8   :  { %2439 = vperm.xlu0 %5693, %v5888_v1  }
  0xea   :  { %v6679_v14 = vpop.permute.xlu1 %617 }
  0xeb   :  { %v6681_v51 = vpop.permute.xlu0 %697  ;;  %2659 = vperm.xlu1 %5694, %v5928_v11  }
  0xec   :  { %2654 = vperm.xlu0 %5693, %v5933_v12  }
  0xee   :  { %v6685_v2 = vpop.permute.xlu1 %1147 }
  0xef   :  { %v6687_v8 = vpop.permute.xlu0 %1142  ;;  %2669 = vperm.xlu1 %5694, %v5948_v15  }
  0xf0   :  { %2664 = vperm.xlu0 %5693, %v5953_v16  }
  0xf2   :  { %v6691_v13 = vpop.permute.xlu1 %1157 }
  0xf3   :  { %8691 = vst [vmem:[#allocation95_spill] sm:$0xff] %v6691_v13  ;;  %v6693_v7 = vpop.permute.xlu0 %1152  ;;  %2835 = vperm.xlu1 %5694, %v5961_v17   ;;  %v8854_v13 = vld [vmem:[#allocation61_spill] sm:$0xff] }
  0xf4   :  { %2840 = vperm.xlu0 %5693, %v5966_v18  }
  0xf6   :  { %v6697_v1 = vpop.permute.xlu1 %1315 }
  0xf7   :  { %8692 = vst [vmem:[#allocation96_spill] sm:$0xff] %v6697_v1  ;;  %v6699_v11 = vpop.permute.xlu0 %1320  ;;  %2830 = vperm.xlu1 %5694, %v5973_v19   ;;  %v8853_v1 = vld [vmem:[#allocation62_spill] sm:$0xff] }
  0xf8   :  { %8693 = vst [vmem:[#allocation97_spill] sm:$0xff] %v6699_v11  ;;  %2864 = vperm.xlu0 %5693, %v5978_v20  }
  0xfa   :  { %v6703_v12 = vpop.permute.xlu1 %1348 }
  0xfb   :  { %8694 = vst [vmem:[#allocation98_spill] sm:$0xff] %v6703_v12  ;;  %v6705_v15 = vpop.permute.xlu0 %1310  ;;  %2825 = vperm.xlu1 %5694, %v5985_v21   ;;  %v8852_v12 = vld [vmem:[#allocation57_spill] sm:$0xff] }
  0xfc   :  { %8695 = vst [vmem:[#allocation99_spill] sm:$0xff] %v6705_v15  ;;  %2859 = vperm.xlu0 %5693, %v5990_v22  }
  0xfe   :  { %v6709_v16 = vpop.permute.xlu1 %1343 }
  0xff   :  { %8696 = vst [vmem:[#allocation100_spill] sm:$0xff] %v6709_v16  ;;  %v6711_v17 = vpop.permute.xlu0 %1305  ;;  %2849 = vperm.xlu1 %5694, %v5997_v23  }
 0x100   :  { %8697 = vst [vmem:[#allocation101_spill] sm:$0xff] %v6711_v17  ;;  %2854 = vperm.xlu0 %5693, %v6002_v24  }
 0x102   :  { %v6715_v18 = vpop.permute.xlu1 %1333 }
 0x103   :  { %8698 = vst [vmem:[#allocation102_spill] sm:$0xff] %v6715_v18  ;;  %v6717_v19 = vpop.permute.xlu0 %1338  ;;  %3012 = vperm.xlu1 %5694, %v6009_v25   ;;  %v8850_v18 = vld [vmem:[#allocation58_spill] sm:$0xff] }
 0x104   :  { %8699 = vst [vmem:[#allocation103_spill] sm:$0xff] %v6717_v19  ;;  %3092 = vperm.xlu0 %5693, %v6014_v26  }
 0x106   :  { %v6721_v20 = vpop.permute.xlu1 %1378 }
 0x107   :  { %8700 = vst [vmem:[#allocation104_spill] sm:$0xff] %v6721_v20  ;;  %3007 = vperm.xlu1 %5694, %v6021_v27   ;;  %v6724_v21 = vpop.permute.xlu0 %1373  ;;  %v8849_v20 = vld [vmem:[#allocation53_spill] sm:$0xff] }
 0x108   :  { %8701 = vst [vmem:[#allocation105_spill] sm:$0xff] %v6724_v21  ;;  %3087 = vperm.xlu0 %5693, %v6026_v28  }
 0x10a   :  { %v6729_v22 = vpop.permute.xlu1 %1388 }
 0x10b   :  { %3002 = vperm.xlu1 %5694, %v6033_v29   ;;  %8702 = vst [vmem:[#allocation106_spill] sm:$0xff] %v6729_v22  ;;  %v6731_v23 = vpop.permute.xlu0 %1383  ;;  %v8848_v22 = vld [vmem:[#allocation50_spill] sm:$0xff] }
 0x10c   :  { %3082 = vperm.xlu0 %5693, %v6038_v30   ;;  %8703 = vst [vmem:[#allocation107_spill] sm:$0xff] %v6731_v23 }
 0x10e   :  { %v6735_v24 = vpop.permute.xlu1 %1553 }
 0x10f   :  { %2997 = vperm.xlu1 %5694, %v6045_v31   ;;  %8704 = vst [vmem:[#allocation108_spill] sm:$0xff] %v6735_v24  ;;  %v6738_v25 = vpop.permute.xlu0 %1558 }
 0x110   :  { %3077 = vperm.xlu0 %5693, %v6050_v32   ;;  %8705 = vst [vmem:[#allocation109_spill] sm:$0xff] %v6738_v25  ;;  %v8847_v25 = vld [vmem:[#allocation49_spill] sm:$0xff] }
 0x112   :  { %v6743_v26 = vpop.permute.xlu1 %1586 }
 0x113   :  { %2992 = vperm.xlu1 %5694, %v6057_v33   ;;  %8706 = vst [vmem:[#allocation110_spill] sm:$0xff] %v6743_v26  ;;  %v6745_v27 = vpop.permute.xlu0 %1548 }
 0x114   :  { %3072 = vperm.xlu0 %5693, %v6062_v34   ;;  %8707 = vst [vmem:[#allocation111_spill] sm:$0xff] %v6745_v27  ;;  %v323_v34 = vld [vmem:[%s8714_s8] sm:$0xff] }
 0x115   :  { %5371 = vmatprep.mubr.msk.f32.mxu0 %vm123_vm0, %v323_v34  ;;  %v8742_v34 = vld [vmem:[#allocation17_spill] sm:$0xff] }
 0x116   :  { %v6749_v28 = vpop.permute.xlu1 %1581 }
 0x117   :  { %2987 = vperm.xlu1 %5694, %v6069_v35   ;;  %8708 = vst [vmem:[#allocation112_spill] sm:$0xff] %v6749_v28  ;;  %v6752_v29 = vpop.permute.xlu0 %1543 }
 0x118   :  { %3067 = vperm.xlu0 %5693, %v6074_v36   ;;  %8709 = vst [vmem:[#allocation113_spill] sm:$0xff] %v6752_v29 }
 0x11a   :  { %v6757_v30 = vpop.permute.xlu1 %1571 }
 0x11b   :  { %2982 = vperm.xlu1 %5694, %v6085_v38   ;;  %8710 = vst [vmem:[#allocation114_spill] sm:$0xff] %v6757_v30  ;;  %v6759_v31 = vpop.permute.xlu0 %1576 }
 0x11c   :  { %3062 = vperm.xlu0 %5693, %v6094_v40   ;;  %8711 = vst [vmem:[#allocation115_spill] sm:$0xff] %v6759_v31 }
 0x11e   :  { %v6763_v32 = vpop.permute.xlu1 %1734 }
 0x11f   :  { %2977 = vperm.xlu1 %5694, %v6104_v42   ;;  %8712 = vst [vmem:[#allocation116_spill] sm:$0xff] %v6763_v32  ;;  %v6766_v33 = vpop.permute.xlu0 %1814 }
 0x120   :  { %3057 = vperm.xlu0 %5693, %v6112_v44   ;;  %8713 = vst [vmem:[#allocation117_spill] sm:$0xff] %v6766_v33 }
 0x122   :  { %v6775_v35 = vpop.permute.xlu1 %1729 }
 0x123   :  { %2972 = vperm.xlu1 %5694, %v6122_v46   ;;  %8715 = vst [vmem:[#allocation118_spill] sm:$0xff] %v6775_v35  ;;  %v6777_v36 = vpop.permute.xlu0 %1809 }
 0x124   :  { %3052 = vperm.xlu0 %5693, %v6130_v48   ;;  %8716 = vst [vmem:[#allocation119_spill] sm:$0xff] %v6777_v36  ;;  %v8722_v48 = vld [vmem:[#allocation5_spill] sm:$0xff] }
 0x126   :  { %v6781_v38 = vpop.permute.xlu1 %1724 }
 0x127   :  { %2967 = vperm.xlu1 %5694, %v6140_v50   ;;  %8717 = vst [vmem:[#allocation120_spill] sm:$0xff] %v6781_v38  ;;  %v6784_v40 = vpop.permute.xlu0 %1804 }
 0x128   :  { %3047 = vperm.xlu0 %5693, %v6148_v52   ;;  %8718 = vst [vmem:[#allocation121_spill] sm:$0xff] %v6784_v40  ;;  %v8724_v52 = vld [vmem:[#allocation6_spill] sm:$0xff] }
 0x12a   :  { %v6789_v42 = vpop.permute.xlu1 %1719 }
 0x12b   :  { %2962 = vperm.xlu1 %5694, %v6158_v54   ;;  %8719 = vst [vmem:[#allocation122_spill] sm:$0xff] %v6789_v42  ;;  %v6791_v44 = vpop.permute.xlu0 %1799  ;;  %v8725_v54 = vld [vmem:[#allocation7_spill] sm:$0xff] }
 0x12c   :  { %3042 = vperm.xlu0 %5693, %v6166_v56   ;;  %8720 = vst [vmem:[#allocation123_spill] sm:$0xff] %v6791_v44  ;;  %v8726_v56 = vld [vmem:[#allocation8_spill] sm:$0xff] }
 0x12e   :  { %v6795_v46 = vpop.permute.xlu1 %1714 }
 0x12f   :  { %2957 = vperm.xlu1 %5694, %v6176_v58   ;;  %8721 = vst [vmem:[#allocation124_spill] sm:$0xff] %v6795_v46  ;;  %v6798_v50 = vpop.permute.xlu0 %1794 }
 0x130   :  { %3037 = vperm.xlu0 %5693, %v6184_v60   ;;  %8723 = vst [vmem:[#allocation5_spill] sm:$0xff] %v6798_v50 }
 0x132   :  { %v6803_v58 = vpop.permute.xlu1 %1709 }
 0x133   :  { %2952 = vperm.xlu1 %5694, %v6194_v62   ;;  %8727 = vst [vmem:[#allocation6_spill] sm:$0xff] %v6803_v58  ;;  %v6805_v60 = vpop.permute.xlu0 %1789  ;;  %v8729_v62 = vld [vmem:[#allocation9_spill] sm:$0xff] }
 0x134   :  { %3032 = vperm.xlu0 %5693, %v6199_v63   ;;  %8728 = vst [vmem:[#allocation7_spill] sm:$0xff] %v6805_v60  ;;  %v8730_v63 = vld [vmem:[#allocation10_spill] sm:$0xff] }
 0x137   :  { %2947 = vperm.xlu1 %5694, %v6206_v0   ;;  %v6809_v0 = vpop.permute.xlu1 %1704 }
 0x138   :  { %3027 = vperm.xlu0 %5693, %v6211_v3   ;;  %8731 = vst [vmem:[#allocation8_spill] sm:$0xff] %v6809_v0  ;;  %v8732_v3 = vld [vmem:[#allocation11_spill] sm:$0xff] }
 0x13b   :  { %2942 = vperm.xlu1 %5694, %v6218_v4   ;;  %v6812_v4 = vpop.permute.xlu0 %1784  ;;  %v6817_v55 = vpop.permute.xlu1 %1699 }
 0x13c   :  { %3022 = vperm.xlu0 %5693, %v6223_v5   ;;  %8733 = vst [vmem:[#allocation9_spill] sm:$0xff] %v6812_v4  ;;  %v8734_v5 = vld [vmem:[#allocation12_spill] sm:$0xff]  ;;  %8737 = vst [vmem:[#allocation10_spill] sm:$0xff] %v6817_v55 }
 0x13f   :  { %2937 = vperm.xlu1 %5694, %v6230_v6   ;;  %v8735_v6 = vld [vmem:[#allocation13_spill] sm:$0xff]  ;;  %v6819_v61 = vpop.permute.xlu0 %1779  ;;  %v6823_v53 = vpop.permute.xlu1 %1694 }
 0x140   :  { %3017 = vperm.xlu0 %5693, %v6235_v9   ;;  %v8736_v9 = vld [vmem:[#allocation14_spill] sm:$0xff]  ;;  %8738 = vst [vmem:[#allocation11_spill] sm:$0xff] %v6819_v61  ;;  %8741 = vst [vmem:[#allocation12_spill] sm:$0xff] %v6823_v53 }
 0x143   :  { %3467 = vperm.xlu1 %5694, %v8722_v48   ;;  %v6826_v48 = vpop.permute.xlu0 %1774 }
 0x144   :  { %3462 = vperm.xlu0 %5693, %v8724_v52   ;;  %8743 = vst [vmem:[#allocation13_spill] sm:$0xff] %v6826_v48  ;;  %v8744_v52 = vld [vmem:[#allocation18_spill] sm:$0xff] }
 0x147   :  { %3477 = vperm.xlu1 %5694, %v8725_v54   ;;  %v8745_v54 = vld [vmem:[#allocation19_spill] sm:$0xff] }
 0x148   :  { %3472 = vperm.xlu0 %5693, %v8726_v56   ;;  %v8746_v56 = vld [vmem:[#allocation20_spill] sm:$0xff] }
 0x14b   :  { %3634 = vperm.xlu1 %5694, %v8729_v62   ;;  %v6831_v62 = vpop.permute.xlu1 %1689 }
 0x14c   :  { %3639 = vperm.xlu0 %5693, %v8730_v63   ;;  %8747 = vst [vmem:[#allocation14_spill] sm:$0xff] %v6831_v62  ;;  %v6833_v63 = vpop.permute.xlu0 %1769  ;;  %v8759_v62 = vld [vmem:[#allocation31_spill] sm:$0xff] }
 0x14d   :  { %8748 = vst [vmem:[#allocation15_spill] sm:$0xff] %v6833_v63  ;;  %v8802_v63 = vld [vmem:[#allocation83_spill] sm:$0xff] }
 0x14f   :  { %3667 = vperm.xlu1 %5694, %v8732_v3   ;;  %v8749_v3 = vld [vmem:[#allocation21_spill] sm:$0xff] }
 0x150   :  { %3629 = vperm.xlu0 %5693, %v8734_v5   ;;  %v8750_v5 = vld [vmem:[#allocation22_spill] sm:$0xff] }
 0x153   :  { %3662 = vperm.xlu1 %5694, %v8735_v6   ;;  %v6837_v6 = vpop.permute.xlu1 %1684 }
 0x154   :  { %3624 = vperm.xlu0 %5693, %v8736_v9   ;;  %8751 = vst [vmem:[#allocation16_spill] sm:$0xff] %v6837_v6  ;;  %v8752_v9 = vld [vmem:[#allocation23_spill] sm:$0xff] }
 0x155   :  { %v8762_v6 = vld [vmem:[#allocation35_spill] sm:$0xff] }
 0x157   :  { %3652 = vperm.xlu1 %5694, %v8739_v49   ;;  %v6840_v49 = vpop.permute.xlu0 %1764 }
 0x158   :  { %3657 = vperm.xlu0 %5693, %v8740_v47   ;;  %8753 = vst [vmem:[#allocation17_spill] sm:$0xff] %v6840_v49  ;;  %v8754_v47 = vld [vmem:[#allocation24_spill] sm:$0xff] }
 0x159   :  { %v8764_v49 = vld [vmem:[#allocation36_spill] sm:$0xff] }
 0x15b   :  { %3697 = vperm.xlu1 %5694, %v8742_v34   ;;  %v8755_v34 = vld [vmem:[#allocation27_spill] sm:$0xff] }
 0x15c   :  { %3692 = vperm.xlu0 %5693, %v8744_v52   ;;  %v8756_v52 = vld [vmem:[#allocation28_spill] sm:$0xff] }
 0x15f   :  { %3707 = vperm.xlu1 %5694, %v8745_v54   ;;  %v6845_v54 = vpop.permute.xlu1 %1679 }
 0x160   :  { %3702 = vperm.xlu0 %5693, %v8746_v56   ;;  %8757 = vst [vmem:[#allocation18_spill] sm:$0xff] %v6845_v54  ;;  %v6847_v56 = vpop.permute.xlu0 %1759 }
 0x161   :  { %8758 = vst [vmem:[#allocation19_spill] sm:$0xff] %v6847_v56  ;;  %v8769_v56 = vld [vmem:[#allocation43_spill] sm:$0xff] }
 0x163   :  { %3872 = vperm.xlu1 %5694, %v8749_v3   ;;  %v8760_v3 = vld [vmem:[#allocation32_spill] sm:$0xff] }
 0x164   :  { %3877 = vperm.xlu0 %5693, %v8750_v5   ;;  %v6851_v5 = vpop.permute.xlu1 %1674 }
 0x165   :  { %8761 = vst [vmem:[#allocation20_spill] sm:$0xff] %v6851_v5  ;;  %v8772_v5 = vld [vmem:[#allocation47_spill] sm:$0xff] }
 0x167   :  { %3905 = vperm.xlu1 %5694, %v8752_v9   ;;  %v6854_v9 = vpop.permute.xlu0 %1754 }
 0x168   :  { %3867 = vperm.xlu0 %5693, %v8754_v47   ;;  %8763 = vst [vmem:[#allocation21_spill] sm:$0xff] %v6854_v9  ;;  %v8765_v47 = vld [vmem:[#allocation39_spill] sm:$0xff]  ;;  %v8774_v9 = vld [vmem:[#allocation48_spill] sm:$0xff] }
 0x16b   :  { %3900 = vperm.xlu1 %5694, %v8755_v34   ;;  %v8766_v34 = vld [vmem:[#allocation40_spill] sm:$0xff]  ;;  %v6861_v54 = vpop.permute.xlu0 %1749 }
 0x16c   :  { %3862 = vperm.xlu0 %5693, %v8756_v52   ;;  %v6859_v52 = vpop.permute.xlu1 %1669  ;;  %8768 = vst [vmem:[#allocation23_spill] sm:$0xff] %v6861_v54  ;;  %v8779_v54 = vld [vmem:[#allocation55_spill] sm:$0xff] }
 0x16d   :  { %8767 = vst [vmem:[#allocation22_spill] sm:$0xff] %v6859_v52 }
 0x16f   :  { %3890 = vperm.xlu1 %5694, %v8759_v62   ;;  %v8770_v62 = vld [vmem:[#allocation44_spill] sm:$0xff] }
 0x170   :  { %3895 = vperm.xlu0 %5693, %v8760_v3   ;;  %v6865_v3 = vpop.permute.xlu1 %1664 }
 0x171   :  { %8771 = vst [vmem:[#allocation24_spill] sm:$0xff] %v6865_v3  ;;  %v8782_v3 = vld [vmem:[#allocation59_spill] sm:$0xff] }
 0x173   :  { %4053 = vperm.xlu1 %5694, %v8762_v6   ;;  %v6868_v6 = vpop.permute.xlu0 %1744 }
 0x174   :  { %4133 = vperm.xlu0 %5693, %v8764_v49   ;;  %8773 = vst [vmem:[#allocation27_spill] sm:$0xff] %v6868_v6  ;;  %v8775_v49 = vld [vmem:[#allocation51_spill] sm:$0xff]  ;;  %v8784_v6 = vld [vmem:[#allocation60_spill] sm:$0xff] }
 0x177   :  { %4048 = vperm.xlu1 %5694, %v8765_v47   ;;  %v8776_v47 = vld [vmem:[#allocation52_spill] sm:$0xff]  ;;  %v6875_v52 = vpop.permute.xlu0 %1739 }
 0x178   :  { %4128 = vperm.xlu0 %5693, %v8766_v34   ;;  %v6873_v34 = vpop.permute.xlu1 %1659  ;;  %8778 = vst [vmem:[#allocation31_spill] sm:$0xff] %v6875_v52  ;;  %v8789_v52 = vld [vmem:[#allocation67_spill] sm:$0xff] }
 0x179   :  { %8777 = vst [vmem:[#allocation28_spill] sm:$0xff] %v6873_v34 }
 0x17b   :  { %4043 = vperm.xlu1 %5694, %v8769_v56   ;;  %v8780_v56 = vld [vmem:[#allocation56_spill] sm:$0xff] }
 0x17c   :  { %4123 = vperm.xlu0 %5693, %v8770_v62   ;;  %v6879_v62 = vpop.permute.xlu1 %2434 }
 0x17d   :  { %8781 = vst [vmem:[#allocation32_spill] sm:$0xff] %v6879_v62  ;;  %v8792_v62 = vld [vmem:[#allocation71_spill] sm:$0xff] }
 0x17f   :  { %4038 = vperm.xlu1 %5694, %v8772_v5   ;;  %v6882_v5 = vpop.permute.xlu0 %2429 }
 0x180   :  { %4118 = vperm.xlu0 %5693, %v8774_v9   ;;  %8783 = vst [vmem:[#allocation35_spill] sm:$0xff] %v6882_v5  ;;  %v8785_v9 = vld [vmem:[#allocation63_spill] sm:$0xff]  ;;  %v8794_v5 = vld [vmem:[#allocation72_spill] sm:$0xff] }
 0x183   :  { %4033 = vperm.xlu1 %5694, %v8775_v49   ;;  %v8786_v49 = vld [vmem:[#allocation64_spill] sm:$0xff]  ;;  %v6889_v34 = vpop.permute.xlu0 %2439 }
 0x184   :  { %4113 = vperm.xlu0 %5693, %v8776_v47   ;;  %v6887_v47 = vpop.permute.xlu1 %2444  ;;  %8788 = vst [vmem:[#allocation39_spill] sm:$0xff] %v6889_v34  ;;  %v8799_v34 = vld [vmem:[#allocation79_spill] sm:$0xff] }
 0x185   :  { %8787 = vst [vmem:[#allocation36_spill] sm:$0xff] %v6887_v47 }
 0x187   :  { %4028 = vperm.xlu1 %5694, %v8779_v54   ;;  %v8790_v54 = vld [vmem:[#allocation68_spill] sm:$0xff] }
 0x188   :  { %4108 = vperm.xlu0 %5693, %v8780_v56   ;;  %v6893_v56 = vpop.permute.xlu1 %2659 }
 0x189   :  { %8791 = vst [vmem:[#allocation40_spill] sm:$0xff] %v6893_v56 }
 0x18b   :  { %4023 = vperm.xlu1 %5694, %v8782_v3   ;;  %v6896_v3 = vpop.permute.xlu0 %2654 }
 0x18c   :  { %4103 = vperm.xlu0 %5693, %v8784_v6   ;;  %8793 = vst [vmem:[#allocation43_spill] sm:$0xff] %v6896_v3  ;;  %v8795_v6 = vld [vmem:[#allocation75_spill] sm:$0xff] }
 0x18f   :  { %4018 = vperm.xlu1 %5694, %v8785_v9   ;;  %v8796_v9 = vld [vmem:[#allocation76_spill] sm:$0xff]  ;;  %v6903_v47 = vpop.permute.xlu0 %2664 }
 0x190   :  { %4098 = vperm.xlu0 %5693, %v8786_v49   ;;  %v6901_v49 = vpop.permute.xlu1 %2669  ;;  %8798 = vst [vmem:[#allocation47_spill] sm:$0xff] %v6903_v47  ;;  %v8806_v47 = vld [vmem:[#allocation88_spill] sm:$0xff] }
 0x191   :  { %8797 = vst [vmem:[#allocation44_spill] sm:$0xff] %v6901_v49  ;;  %v8805_v49 = vld [vmem:[#allocation87_spill] sm:$0xff] }
 0x193   :  { %4013 = vperm.xlu1 %5694, %v8789_v52   ;;  %v8800_v52 = vld [vmem:[#allocation80_spill] sm:$0xff]  ;;  %v6910_v3 = vpop.permute.xlu0 %2840 }
 0x194   :  { %4093 = vperm.xlu0 %5693, %v8790_v54   ;;  %v6907_v56 = vpop.permute.xlu1 %2835  ;;  %8803 = vst [vmem:[#allocation51_spill] sm:$0xff] %v6910_v3 }
 0x195   :  { %8801 = vst [vmem:[#allocation48_spill] sm:$0xff] %v6907_v56  ;;  %v8810_v56 = vld [vmem:[#allocation92_spill] sm:$0xff] }
 0x197   :  { %4008 = vperm.xlu1 %5694, %v8792_v62  }
 0x198   :  { %4088 = vperm.xlu0 %5693, %v8794_v5   ;;  %v8804_v5 = vld [vmem:[#allocation84_spill] sm:$0xff] }
 0x19b   :  { %4003 = vperm.xlu1 %5694, %v8795_v6  }
 0x19c   :  { %4083 = vperm.xlu0 %5693, %v8796_v9  }
 0x19f   :  { %3998 = vperm.xlu1 %5694, %v8799_v34   ;;  %v6915_v34 = vpop.permute.xlu1 %2830 }
 0x1a0   :  { %4078 = vperm.xlu0 %5693, %v8800_v52   ;;  %8807 = vst [vmem:[#allocation52_spill] sm:$0xff] %v6915_v34  ;;  %v6917_v52 = vpop.permute.xlu0 %2864 }
 0x1a1   :  { %v5359_v54 = vpop.f32.mrf.mxu1  ;;  %8808 = vst [vmem:[#allocation55_spill] sm:$0xff] %v6917_v52  ;;  %v8831_v52 = vld [vmem:[#allocation26_spill] sm:$0xff] }
 0x1a3   :  { %v304_v62 = vpop.f32.mrf.mxu1  ;;  %3993 = vperm.xlu1 %5694, %v8802_v63   ;;  %v8809_v63 = vld [vmem:[#allocation91_spill] sm:$0xff] }
 0x1a4   :  { %4073 = vperm.xlu0 %5693, %v8804_v5   ;;  %v324_v5 = vld [vmem:[%s8714_s8 + $0x8] sm:$0xff] }
 0x1a5   :  { %v5362_v6 = vpop.f32.mrf.mxu1 }
 0x1a6   :  { %5363 = vmatprep.subr.mxu0 %v5362_v6 }
 0x1a7   :  { %v314_v9 = vpop.f32.mrf.mxu1  ;;  %5364 = vmatpush3.msra.mxu0 %v5362_v6  ;;  %3988 = vperm.xlu1 %5694, %v8805_v49   ;;  %v6928_v49 = vpop.permute.xlu1 %2825 }
 0x1a8   :  { %4068 = vperm.xlu0 %5693, %v8806_v47   ;;  %5365 = vmatprep.subr.mxu0 %v314_v9  ;;  %v325_v47 = vld [vmem:[%s8714_s8 + $0x10] sm:$0xff]  ;;  %8811 = vst [vmem:[#allocation56_spill] sm:$0xff] %v6928_v49  ;;  %v6935_v6 = vpop.permute.xlu0 %2859 }
 0x1a9   :  { %5366 = vmatpush3.msra.mxu0 %v314_v9  ;;  %8812 = vst [vmem:[#allocation59_spill] sm:$0xff] %v6935_v6  ;;  %v8830_v6 = vld [vmem:[#allocation25_spill] sm:$0xff] }
 0x1aa   :  { %5367 = vmatprep.subr.mxu0 %v5359_v54 }
 0x1ab   :  { %5368 = vmatpush3.msra.mxu0 %v5359_v54  ;;  %3983 = vperm.xlu1 %5694, %v8809_v63   ;;  %v326_v54 = vld [vmem:[%s8714_s8 + $0x18] sm:$0xff] }
 0x1ac   :  { %4063 = vperm.xlu0 %5693, %v8810_v56   ;;  %5369 = vmatprep.subr.mxu0 %v304_v62  ;;  %v2179_v56 = vld [vmem:[%s8507_s21 + $0x8] sm:$0xff]  ;;  %v6947_v9 = vpop.permute.xlu0 %2854 }
 0x1ad   :  { %5370 = vmatpush3.msra.mxu0 %v304_v62  ;;  %v2178_v62 = vld [vmem:[%s8507_s21] sm:$0xff]  ;;  %8814 = vst [vmem:[#allocation63_spill] sm:$0xff] %v6947_v9  ;;  %v2296_v9 = vld [vmem:[%s8509_s23 + $0x8] sm:$0xff] }
 0x1ae   :  { %5372 = vmatmul.mubr.msk.f32.vlgmr.msra.gmra.mxu0 %vm123_vm0, %v324_v5 }
 0x1af   :  { %3978 = vperm.xlu1 %5694, %v6646_v59   ;;  %5374 = vmatprep.mubr.msk.f32.mxu0 %vm123_vm0, %v325_v47  ;;  %v6945_v59 = vpop.permute.xlu1 %2849  ;;  %v4500_v47 = vld [vmem:[%s8507_s21 + $0x18] sm:$0xff] }
 0x1b0   :  { %4058 = vperm.xlu0 %5693, %v6651_v45   ;;  %8813 = vst [vmem:[#allocation60_spill] sm:$0xff] %v6945_v59  ;;  %v4499_v45 = vld [vmem:[%s8507_s21 + $0x10] sm:$0xff]  ;;  %v6954_v5 = vpop.permute.xlu0 %3092 }
 0x1b1   :  { %8816 = vst [vmem:[#allocation67_spill] sm:$0xff] %v6954_v5 }
 0x1b2   :  { %5375 = vmatmul.mubr.msk.f32.gmra.mxu0 %vm123_vm0, %v326_v54  ;;  %v2292_v54 = vld [vmem:[%s8508_s22 + $0x8] sm:$0xff] }
 0x1b3   :  { %2189 = vperm.xlu1 %5694, %v2179_v56   ;;  %v6952_v63 = vpop.permute.xlu1 %3012 }
 0x1b4   :  { %2184 = vperm.xlu0 %5693, %v2178_v62   ;;  %8815 = vst [vmem:[#allocation64_spill] sm:$0xff] %v6952_v63  ;;  %v6967_v63 = vpop.permute.xlu0 %3087 }
 0x1b5   :  { %8818 = vst [vmem:[#allocation71_spill] sm:$0xff] %v6967_v63 }
 0x1b7   :  { %4508 = vperm.xlu1 %5694, %v2179_v56   ;;  %v6962_v56 = vpop.permute.xlu1 %3007 }
 0x1b8   :  { %4503 = vperm.xlu0 %5693, %v2178_v62   ;;  %8817 = vst [vmem:[#allocation68_spill] sm:$0xff] %v6962_v56  ;;  %v2291_v62 = vld [vmem:[%s8508_s22] sm:$0xff]  ;;  %v6977_v56 = vpop.permute.xlu0 %3082 }
 0x1b9   :  { %8820 = vst [vmem:[#allocation75_spill] sm:$0xff] %v6977_v56 }
 0x1bb   :  { %4513 = vperm.xlu1 %5694, %v4499_v45   ;;  %v6975_v5 = vpop.permute.xlu1 %3002 }
 0x1bc   :  { %2194 = vperm.xlu0 %5693, %v4499_v45   ;;  %v2294_v45 = vld [vmem:[%s8508_s22 + $0x18] sm:$0xff]  ;;  %8819 = vst [vmem:[#allocation72_spill] sm:$0xff] %v6975_v5  ;;  %v6981_v63 = vpop.permute.xlu0 %3077  ;;  %v2295_v5 = vld [vmem:[%s8509_s23] sm:$0xff] }
 0x1bd   :  { %8822 = vst [vmem:[#allocation79_spill] sm:$0xff] %v6981_v63 }
 0x1bf   :  { %4518 = vperm.xlu1 %5694, %v4500_v47   ;;  %v6979_v59 = vpop.permute.xlu1 %2997 }
 0x1c0   :  { %2199 = vperm.xlu0 %5693, %v4500_v47   ;;  %v2293_v47 = vld [vmem:[%s8508_s22 + $0x10] sm:$0xff]  ;;  %8821 = vst [vmem:[#allocation76_spill] sm:$0xff] %v6979_v59  ;;  %v6991_v56 = vpop.permute.xlu0 %3072  ;;  %v551_v59 = vld [vmem:[%s8829_s12] sm:$0xff] }
 0x1c1   :  { %8824 = vst [vmem:[#allocation83_spill] sm:$0xff] %v6991_v56  ;;  %5385 = vmatprep.mubr.msk.f32.mxu0 %vm123_vm0, %v551_v59 }
 0x1c3   :  { %2351 = vperm.xlu1 %5694, %v2292_v54   ;;  %v6989_v49 = vpop.permute.xlu1 %2992 }
 0x1c4   :  { %2346 = vperm.xlu0 %5693, %v2291_v62   ;;  %8823 = vst [vmem:[#allocation80_spill] sm:$0xff] %v6989_v49 }
 0x1c7   :  { %2361 = vperm.xlu1 %5694, %v2294_v45  }
 0x1c8   :  { %2356 = vperm.xlu0 %5693, %v2293_v47  }
 0x1cb   :  { %4670 = vperm.xlu1 %5694, %v2292_v54   ;;  %v2298_v54 = vld [vmem:[%s8509_s23 + $0x18] sm:$0xff] }
 0x1cc   :  { %4665 = vperm.xlu0 %5693, %v2291_v62   ;;  %v2297_v62 = vld [vmem:[%s8509_s23 + $0x10] sm:$0xff] }
 0x1cf   :  { %4680 = vperm.xlu1 %5694, %v2294_v45   ;;  %v6999_v45 = vpop.permute.xlu1 %2987 }
 0x1d0   :  { %4675 = vperm.xlu0 %5693, %v2293_v47   ;;  %8825 = vst [vmem:[#allocation84_spill] sm:$0xff] %v6999_v45  ;;  %v7001_v47 = vpop.permute.xlu0 %3067 }
 0x1d1   :  { %8826 = vst [vmem:[#allocation87_spill] sm:$0xff] %v7001_v47 }
 0x1d3   :  { %2379 = vperm.xlu1 %5694, %v2296_v9   ;;  %v7003_v49 = vpop.permute.xlu1 %2982 }
 0x1d4   :  { %2374 = vperm.xlu0 %5693, %v2295_v5   ;;  %8827 = vst [vmem:[#allocation88_spill] sm:$0xff] %v7003_v49  ;;  %v7005_v56 = vpop.permute.xlu0 %3062  ;;  %v8834_v49 = vld [vmem:[#allocation29_spill] sm:$0xff] }
 0x1d5   :  { %8828 = vst [vmem:[#allocation91_spill] sm:$0xff] %v7005_v56 }
 0x1d7   :  { %2389 = vperm.xlu1 %5694, %v2298_v54  }
 0x1d8   :  { %2384 = vperm.xlu0 %5693, %v2297_v62  }
 0x1db   :  { %4698 = vperm.xlu1 %5694, %v2296_v9  }
 0x1dc   :  { %4693 = vperm.xlu0 %5693, %v2295_v5   ;;  %v7016_v5 = vld [vmem:[%s8594_s27 + $0x8] sm:$0xff] }
 0x1dd   :  { %8832 = vst [vmem:[#allocation92_spill] sm:$0xff] %v7016_v5 }
 0x1df   :  { %4708 = vperm.xlu1 %5694, %v2298_v54  }
 0x1e0   :  { %4703 = vperm.xlu0 %5693, %v2297_v62   ;;  %v7022_v62 = vld [vmem:[%s8594_s27] sm:$0xff] }
 0x1e1   :  { %8833 = vst [vmem:[#allocation25_spill] sm:$0xff] %v7022_v62 }
 0x26e   :  { %v5373_v63 = vpop.f32.mrf.mxu0 }
 0x26f   :  { %v435_v34 = vadd.f32 %v5373_v63, %v8830_v6 }
 0x270   :  { %v429_v45 = vpop.f32.mrf.mxu0 }
 0x271   :  { %v430_v47 = vadd.f32 %v429_v45, %v8831_v52  ;;  %v449_v54 = vadd.f32 %v7016_v5, %v435_v34  ;;  %v8835_v45 = vld [vmem:[#allocation30_spill] sm:$0xff]  ;;  %v7032_v34 = vld [vmem:[%s8594_s27 + $0x18] sm:$0xff] }
 0x272   :  { %v5376_v9 = vpop.f32.mrf.mxu0  ;;  %8836 = vst [vmem:[#allocation26_spill] sm:$0xff] %v7032_v34 }
 0x273   :  { %v448_v59 = vadd.f32 %v7022_v62, %v430_v47  ;;  %v445_v6 = vadd.f32 %v5376_v9, %v8834_v49  ;;  %v461_v3 = vsel %vm221_vm2, %v449_v54, 0.0  ;;  %v7038_v47 = vld [vmem:[%s8594_s27 + $0x10] sm:$0xff] }
 0x274   :  { %v439_v63 = vpop.f32.mrf.mxu0  ;;  %8837 = vst [vmem:[#allocation29_spill] sm:$0xff] %v7038_v47 }
 0x275   :  { %v460_v52 = vsel %vm221_vm2, %v448_v59, 0.0  ;;  %v440_v56 = vadd.f32 %v439_v63, %v8835_v45  ;;  %v451_v53 = vadd.f32 %v7032_v34, %v445_v6  ;;  %v8851_v34 = vld [vmem:[#allocation54_spill] sm:$0xff] }
 0x276   :  { %v462_v9 = vadd.f32 %v461_v3, %v460_v52 }
 0x277   :  { %v450_v49 = vadd.f32 %v7038_v47, %v440_v56  ;;  %v465_v45 = vsel %vm221_vm2, %v451_v53, 0.0 }
 0x279   :  { %v463_v48 = vsel %vm221_vm2, %v450_v49, 0.0 }
 0x27a   :  { %v464_v63 = vadd.f32 %v463_v48, %v462_v9 }
 0x27c   :  { %v466_v55 = vadd.f32 %v465_v45, %v464_v63 }
 0x27e   :  { %v467_v61 = vrot.slane %v466_v55, 4 }
 0x280   :  { %v468_v0 = vadd.f32 %v467_v61, %v466_v55 }
 0x282   :  { %v469_v4 = vrot.slane %v468_v0, 2 }
 0x284   :  { %v470_v58 = vadd.f32 %v469_v4, %v468_v0 }
 0x286   :  { %v471_v60 = vrot.slane %v470_v58, 1 }
 0x288   :  { %v472_v6 = vadd.f32 %v471_v60, %v470_v58 }
 0x28a   :  { %v474_v46 = vmul.f32 0.03125, %v472_v6 }
 0x28c   :  { %v475_v50 = vsub.f32 %v448_v59, %v474_v46  ;;  %v476_v42 = vsub.f32 %v449_v54, %v474_v46  ;;  %v477_v44 = vsub.f32 %v450_v49, %v474_v46  ;;  %v478_v38 = vsub.f32 %v451_v53, %v474_v46 }
 0x28e   :  { %v479_v36 = vmul.f32 %v475_v50, %v475_v50  ;;  %v480_v56 = vmul.f32 %v476_v42, %v476_v42  ;;  %v481_v3 = vmul.f32 %v477_v44, %v477_v44  ;;  %v482_v52 = vmul.f32 %v478_v38, %v478_v38 }
 0x290   :  { %v483_v48 = vsel %vm221_vm2, %v479_v36, 0.0  ;;  %v484_v9 = vsel %vm221_vm2, %v480_v56, 0.0  ;;  %v486_v55 = vsel %vm221_vm2, %v481_v3, 0.0  ;;  %v488_v0 = vsel %vm221_vm2, %v482_v52, 0.0  ;;  %v8839_v3 = vld [vmem:[#allocation33_spill] sm:$0xff]  ;;  %v8840_v52 = vld [vmem:[#allocation38_spill] sm:$0xff] }
 0x291   :  { %v485_v63 = vadd.f32 %v484_v9, %v483_v48  ;;  %v8838_v48 = vld [vmem:[#allocation34_spill] sm:$0xff] }
 0x293   :  { %v487_v61 = vadd.f32 %v486_v55, %v485_v63 }
 0x295   :  { %v489_v58 = vadd.f32 %v488_v0, %v487_v61  ;;  %v8842_v0 = vld [vmem:[#allocation37_spill] sm:$0xff] }
 0x297   :  { %v490_v60 = vrot.slane %v489_v58, 4 }
 0x299   :  { %v491_v4 = vadd.f32 %v490_v60, %v489_v58  ;;  %v8843_v60 = vld [vmem:[#allocation42_spill] sm:$0xff] }
 0x29b   :  { %v492_v54 = vrot.slane %v491_v4, 2 }
 0x29d   :  { %v493_v59 = vadd.f32 %v492_v54, %v491_v4  ;;  %v8844_v54 = vld [vmem:[#allocation41_spill] sm:$0xff] }
 0x29f   :  { %v494_v46 = vrot.slane %v493_v59, 1 }
 0x2a1   :  { %v495_v53 = vadd.f32 %v494_v46, %v493_v59  ;;  %v553_v46 = vld [vmem:[%s8829_s12 + $0x10] sm:$0xff] }
 0x2a3   :  { %v496_v49 = vmul.f32 0.03125, %v495_v53  ;;  %v554_v53 = vld [vmem:[%s8829_s12 + $0x18] sm:$0xff] }
 0x2a5   :  { %v497_v45 = vadd.f32 1e-05, %v496_v49  ;;  %v555_v49 = vld [vmem:[%s8829_s12 + $0x20] sm:$0xff] }
 0x2a7   :  { %5695 = vrsqrt.f32 %v497_v45  ;;  %v556_v45 = vld [vmem:[%s8829_s12 + $0x28] sm:$0xff] }
 0x2b4   :  { %v5696_v6 = vpop.eup %5695 }
 0x2b5   :  { %v501_v36 = vmul.f32 %v5696_v6, %v477_v44  ;;  %v502_v40 = vmul.f32 %v5696_v6, %v478_v38  ;;  %v500_v56 = vmul.f32 %v5696_v6, %v476_v42  ;;  %v499_v55 = vmul.f32 %v5696_v6, %v475_v50  ;;  %v8845_v38 = vld [vmem:[#allocation46_spill] sm:$0xff]  ;;  %v8846_v42 = vld [vmem:[#allocation45_spill] sm:$0xff]  ;;  %v557_v6 = vld [vmem:[%s8829_s12 + $0x30] sm:$0xff] }
 0x2b6   :  { %v552_v50 = vld [vmem:[%s8829_s12 + $0x8] sm:$0xff] }
 0x2b7   :  { %v526_v9 = vmul.f32 %v8838_v48, %v502_v40  ;;  %v525_v63 = vmul.f32 %v8839_v3, %v501_v36  ;;  %v524_v58 = vmul.f32 %v8842_v0, %v500_v56  ;;  %v523_v59 = vmul.f32 %v8844_v54, %v499_v55  ;;  %v558_v36 = vld [vmem:[%s8829_s12 + $0x38] sm:$0xff]  ;;  %v559_v56 = vld [vmem:[%s8829_s12 + $0x40] sm:$0xff]  ;;  %v560_v48 = vld [vmem:[%s8829_s12 + $0x48] sm:$0xff] }
 0x2b8   :  { %v562_v3 = vld [vmem:[%s8829_s12 + $0x58] sm:$0xff]  ;;  %v564_v55 = vld [vmem:[%s8829_s12 + $0x68] sm:$0xff]  ;;  %v569_v54 = vld [vmem:[%s8829_s12 + $0x90] sm:$0xff] }
 0x2b9   :  { %v7050_v61 = vadd.f32 %v8840_v52, %v526_v9  ;;  %v7055_v4 = vadd.f32 %v8843_v60, %v525_v63  ;;  %v7061_v40 = vadd.f32 %v8845_v38, %v524_v58  ;;  %v7066_v44 = vadd.f32 %v8846_v42, %v523_v59  ;;  %v561_v9 = vld [vmem:[%s8829_s12 + $0x50] sm:$0xff]  ;;  %v563_v63 = vld [vmem:[%s8829_s12 + $0x60] sm:$0xff]  ;;  %v566_v0 = vld [vmem:[%s8829_s12 + $0x78] sm:$0xff] }
 0x2ba   :  { %v565_v52 = vld [vmem:[%s8829_s12 + $0x70] sm:$0xff]  ;;  %v567_v58 = vld [vmem:[%s8829_s12 + $0x80] sm:$0xff]  ;;  %v568_v60 = vld [vmem:[%s8829_s12 + $0x88] sm:$0xff] }
 0x2bb   :  { %8841 = vst [vmem:[#allocation30_spill] sm:$0xff] %v7050_v61  ;;  %5377 = vmatprep.subr.mxu0 %v7050_v61  ;;  %v570_v59 = vld [vmem:[%s8829_s12 + $0x98] sm:$0xff]  ;;  %v571_v38 = vld [vmem:[%s8829_s12 + $0xa0] sm:$0xff]  ;;  %v572_v42 = vld [vmem:[%s8829_s12 + $0xa8] sm:$0xff] }
 0x2bc   :  { %5378 = vmatpush3.msra.mxu0 %v7050_v61 }
 0x2bd   :  { %5379 = vmatprep.subr.mxu0 %v7055_v4 }
 0x2be   :  { %5380 = vmatpush3.msra.mxu0 %v7055_v4 }
 0x2bf   :  { %5381 = vmatprep.subr.mxu0 %v7061_v40 }
 0x2c0   :  { %5382 = vmatpush3.msra.mxu0 %v7061_v40 }
 0x2c1   :  { %5383 = vmatprep.subr.mxu0 %v7066_v44 }
 0x2c2   :  { %5384 = vmatpush3.msra.mxu0 %v7066_v44 }
 0x2c3   :  { %5386 = vmatmul.mubr.msk.f32.vlgmr.msra.gmra.mxu0 %vm123_vm0, %v552_v50  ;;  %v573_v50 = vld [vmem:[%s8829_s12 + $0xb0] sm:$0xff] }
 0x2c4   :  { %5388 = vmatprep.mubr.msk.f32.mxu0 %vm123_vm0, %v553_v46  ;;  %v574_v46 = vld [vmem:[%s8829_s12 + $0xb8] sm:$0xff] }
 0x2c7   :  { %5389 = vmatmul.mubr.msk.f32.gmra.mxu0 %vm123_vm0, %v554_v53  ;;  %v575_v53 = vld [vmem:[%s8829_s12 + $0xc0] sm:$0xff] }
 0x2c8   :  { %5391 = vmatprep.mubr.msk.f32.mxu0 %vm123_vm0, %v555_v49  ;;  %v576_v49 = vld [vmem:[%s8829_s12 + $0xc8] sm:$0xff] }
 0x2cb   :  { %5392 = vmatmul.mubr.msk.f32.gmra.mxu0 %vm123_vm0, %v556_v45  ;;  %v577_v45 = vld [vmem:[%s8829_s12 + $0xd0] sm:$0xff] }
 0x2cc   :  { %5394 = vmatprep.mubr.msk.f32.mxu0 %vm123_vm0, %v557_v6  ;;  %v578_v6 = vld [vmem:[%s8829_s12 + $0xd8] sm:$0xff] }
 0x2cf   :  { %5395 = vmatmul.mubr.msk.f32.gmra.mxu0 %vm123_vm0, %v558_v36  ;;  %v579_v36 = vld [vmem:[%s8829_s12 + $0xe0] sm:$0xff] }
 0x2d0   :  { %5397 = vmatprep.mubr.msk.f32.mxu0 %vm123_vm0, %v559_v56  ;;  %v580_v56 = vld [vmem:[%s8829_s12 + $0xe8] sm:$0xff] }
 0x2d3   :  { %5398 = vmatmul.mubr.msk.f32.gmra.mxu0 %vm123_vm0, %v560_v48  ;;  %v581_v48 = vld [vmem:[%s8829_s12 + $0xf0] sm:$0xff] }
 0x2d4   :  { %5400 = vmatprep.mubr.msk.f32.mxu0 %vm123_vm0, %v561_v9  ;;  %v582_v9 = vld [vmem:[%s8829_s12 + $0xf8] sm:$0xff] }
 0x2d7   :  { %5401 = vmatmul.mubr.msk.f32.gmra.mxu0 %vm123_vm0, %v562_v3  ;;  %v1129_v3 = vld [vmem:[%s8496_s10 + $0x8] sm:$0xff] }
 0x2d8   :  { %5403 = vmatprep.mubr.msk.f32.mxu0 %vm123_vm0, %v563_v63  ;;  %1224 = vmatprep.mubr.f32.mxu1 %v1129_v3 }
 0x2db   :  { %5404 = vmatmul.mubr.msk.f32.gmra.mxu0 %vm123_vm0, %v564_v55 }
 0x2dc   :  { %5406 = vmatprep.mubr.msk.f32.mxu0 %vm123_vm0, %v565_v52 }
 0x2df   :  { %5407 = vmatmul.mubr.msk.f32.gmra.mxu0 %vm123_vm0, %v566_v0 }
 0x2e0   :  { %5409 = vmatprep.mubr.msk.f32.mxu0 %vm123_vm0, %v567_v58 }
 0x2e3   :  { %5410 = vmatmul.mubr.msk.f32.gmra.mxu0 %vm123_vm0, %v568_v60 }
 0x2e4   :  { %5412 = vmatprep.mubr.msk.f32.mxu0 %vm123_vm0, %v569_v54 }
 0x2e7   :  { %5413 = vmatmul.mubr.msk.f32.gmra.mxu0 %vm123_vm0, %v570_v59 }
 0x2e8   :  { %5415 = vmatprep.mubr.msk.f32.mxu0 %vm123_vm0, %v571_v38 }
 0x2eb   :  { %5416 = vmatmul.mubr.msk.f32.gmra.mxu0 %vm123_vm0, %v572_v42 }
 0x2ec   :  { %5418 = vmatprep.mubr.msk.f32.mxu0 %vm123_vm0, %v573_v50 }
 0x2ef   :  { %5419 = vmatmul.mubr.msk.f32.gmra.mxu0 %vm123_vm0, %v574_v46 }
 0x2f0   :  { %5421 = vmatprep.mubr.msk.f32.mxu0 %vm123_vm0, %v575_v53 }
 0x2f3   :  { %5422 = vmatmul.mubr.msk.f32.gmra.mxu0 %vm123_vm0, %v576_v49 }
 0x2f4   :  { %5424 = vmatprep.mubr.msk.f32.mxu0 %vm123_vm0, %v577_v45 }
 0x2f7   :  { %5425 = vmatmul.mubr.msk.f32.gmra.mxu0 %vm123_vm0, %v578_v6 }
 0x2f8   :  { %5427 = vmatprep.mubr.msk.f32.mxu0 %vm123_vm0, %v579_v36 }
 0x2fb   :  { %5428 = vmatmul.mubr.msk.f32.gmra.mxu0 %vm123_vm0, %v580_v56 }
 0x2fc   :  { %5430 = vmatprep.mubr.msk.f32.mxu0 %vm123_vm0, %v581_v48 }
 0x2ff   :  { %5431 = vmatmul.mubr.msk.f32.gmra.mxu0 %vm123_vm0, %v582_v9 }
 0x383   :  { %v7198_v63 = vpop.f32.mrf.mxu0 }
 0x385   :  { %v7200_v55 = vpop.f32.mrf.mxu0 }
 0x387   :  { %v7202_v52 = vpop.f32.mrf.mxu0 }
 0x389   :  { %v7204_v0 = vpop.f32.mrf.mxu0 }
 0x38b   :  { %v7206_v58 = vpop.f32.mrf.mxu0 }
 0x38d   :  { %v7208_v60 = vpop.f32.mrf.mxu0 }
 0x38f   :  { %v7210_v54 = vpop.f32.mrf.mxu0 }
 0x391   :  { %v7212_v59 = vpop.f32.mrf.mxu0 }
 0x393   :  { %v5399_v38 = vpop.f32.mrf.mxu0 }
 0x395   :  { %v977_v42 = vpop.f32.mrf.mxu0 }
 0x397   :  { %v5402_v50 = vpop.f32.mrf.mxu0 }
 0x399   :  { %v987_v46 = vpop.f32.mrf.mxu0 }
 0x39b   :  { %v5405_v53 = vpop.f32.mrf.mxu0 }
 0x39c   :  { %v1003_v17 = vadd.f32 %v5405_v53, %v8852_v12 }
 0x39d   :  { %v997_v49 = vpop.f32.mrf.mxu0 }
 0x39f   :  { %v5408_v45 = vpop.f32.mrf.mxu0 }
 0x3a0   :  { %v1013_v24 = vadd.f32 %v5408_v45, %v8847_v25  ;;  %v998_v25 = vadd.f32 %v997_v49, %v8854_v13  ;;  %v8864_v49 = vld [vmem:[#allocation81_spill] sm:$0xff] }
 0x3a1   :  { %v1007_v6 = vpop.f32.mrf.mxu0 }
 0x3a2   :  { %v1008_v62 = vadd.f32 %v1007_v6, %v8849_v20  ;;  %v1111_v15 = vmax.f32 %v1013_v24, 0.0  ;;  %v8856_v6 = vld [vmem:[#allocation65_spill] sm:$0xff] }
 0x3a3   :  { %v7214_v36 = vpop.f32.mrf.mxu0  ;;  %v8858_v24 = vld [vmem:[#allocation69_spill] sm:$0xff] }
 0x3a4   :  { %v1110_v45 = vmax.f32 %v1008_v62, 0.0 }
 0x3a5   :  { %v7216_v56 = vpop.f32.mrf.mxu0 }
 0x3a7   :  { %v7218_v48 = vpop.f32.mrf.mxu0 }
 0x3a9   :  { %v7220_v9 = vpop.f32.mrf.mxu0 }
 0x3ab   :  { %v5417_v3 = vpop.f32.mrf.mxu0 }
 0x3ad   :  { %v7222_v35 = vpop.f32.mrf.mxu0 }
 0x3af   :  { %v5420_v33 = vpop.f32.mrf.mxu0 }
 0x3b1   :  { %v1047_v32 = vpop.f32.mrf.mxu0 }
 0x3b3   :  { %v5423_v30 = vpop.f32.mrf.mxu0 }
 0x3b5   :  { %v1057_v31 = vpop.f32.mrf.mxu0 }
 0x3b7   :  { %v5426_v28 = vpop.f32.mrf.mxu0 }
 0x3b9   :  { %v1067_v29 = vpop.f32.mrf.mxu0 }
 0x3bb   :  { %v5429_v26 = vpop.f32.mrf.mxu0 }
 0x3bc   :  { %v1083_v47 = vadd.f32 %v5429_v26, %v8850_v18  ;;  %v993_v18 = vadd.f32 %v5402_v50, %v8856_v6  ;;  %v8857_v26 = vld [vmem:[#allocation70_spill] sm:$0xff] }
 0x3bd   :  { %v1077_v27 = vpop.f32.mrf.mxu0  ;;  %v8863_v50 = vld [vmem:[#allocation82_spill] sm:$0xff] }
 0x3be   :  { %v1078_v11 = vadd.f32 %v1077_v27, %v8853_v1  ;;  %v1125_v20 = vmax.f32 %v1083_v47, 0.0  ;;  %v988_v1 = vadd.f32 %v987_v46, %v8858_v24  ;;  %v1107_v62 = vmax.f32 %v993_v18, 0.0 }
 0x3bf   :  { %v5432_v23 = vpop.f32.mrf.mxu0  ;;  %v1053_v46 = vadd.f32 %v5420_v33, %v8863_v50  ;;  %v8868_v33 = vld [vmem:[#allocation89_spill] sm:$0xff] }
 0x3c0   :  { %v1093_v21 = vadd.f32 %v5432_v23, %v8848_v22  ;;  %v8855_v22 = vld [vmem:[#allocation66_spill] sm:$0xff]  ;;  %v1124_v12 = vmax.f32 %v1078_v11, 0.0  ;;  %v1106_v11 = vmax.f32 %v988_v1, 0.0 }
 0x3c1   :  { %v1087_v5 = vpop.f32.mrf.mxu0  ;;  %v1073_v23 = vadd.f32 %v5426_v28, %v8855_v22  ;;  %v1119_v18 = vmax.f32 %v1053_v46, 0.0 }
 0x3c2   :  { %v1127_v19 = vmax.f32 %v1093_v21, 0.0  ;;  %v1088_v16 = vadd.f32 %v1087_v5, %v8851_v34  ;;  %v1109_v21 = vmax.f32 %v1003_v17, 0.0  ;;  %v1068_v5 = vadd.f32 %v1067_v29, %v8857_v26  ;;  %v8861_v34 = vld [vmem:[#allocation78_spill] sm:$0xff] }
 0x3c3   :  { %v1123_v27 = vmax.f32 %v1073_v23, 0.0  ;;  %v1058_v47 = vadd.f32 %v1057_v31, %v8861_v34  ;;  %v8866_v31 = vld [vmem:[#allocation85_spill] sm:$0xff] }
 0x3c4   :  { %v1126_v61 = vmax.f32 %v1088_v16, 0.0  ;;  %4984 = vmatprep.subr.mxu1 %v1127_v19  ;;  %v1108_v16 = vmax.f32 %v998_v25, 0.0  ;;  %v8859_v19 = vld [vmem:[#allocation74_spill] sm:$0xff]  ;;  %v1122_v17 = vmax.f32 %v1068_v5, 0.0  ;;  %v968_v23 = vadd.f32 %v7212_v59, %v8866_v31 }
 0x3c5   :  { %4985 = vmatpush3.msra.mxu1 %v1111_v15  ;;  %v1063_v13 = vadd.f32 %v5423_v30, %v8859_v19  ;;  %v8860_v15 = vld [vmem:[#allocation73_spill] sm:$0xff]  ;;  %v973_v30 = vadd.f32 %v7210_v54, %v8864_v49  ;;  %v1120_v22 = vmax.f32 %v1058_v47, 0.0  ;;  %v8869_v54 = vld [vmem:[#allocation94_spill] sm:$0xff] }
 0x3c6   :  { %4986 = vmatprep.subr.mxu1 %v1126_v61  ;;  %v983_v28 = vadd.f32 %v5399_v38, %v8860_v15  ;;  %v8862_v61 = vld [vmem:[#allocation77_spill] sm:$0xff]  ;;  %v8865_v38 = vld [vmem:[#allocation86_spill] sm:$0xff]  ;;  %v1038_v5 = vadd.f32 %v7222_v35, %v8869_v54  ;;  %v1102_v59 = vmax.f32 %v968_v23, 0.0  ;;  %v1028_v35 = vadd.f32 %v7220_v9, %v6667_v57 }
 0x3c7   :  { %4987 = vmatpush3.msra.mxu1 %v1110_v45  ;;  %v978_v29 = vadd.f32 %v977_v42, %v8862_v61  ;;  %v1121_v53 = vmax.f32 %v1063_v13, 0.0  ;;  %v1048_v45 = vadd.f32 %v1047_v32, %v8865_v38  ;;  %v8867_v42 = vld [vmem:[#allocation90_spill] sm:$0xff]  ;;  %v1103_v26 = vmax.f32 %v973_v30, 0.0 }
 0x3c8   :  { %4988 = vmatprep.subr.mxu1 %v1125_v20  ;;  %v1105_v25 = vmax.f32 %v983_v28, 0.0  ;;  %v1043_v6 = vadd.f32 %v5417_v3, %v8867_v42  ;;  %v1033_v3 = vadd.f32 %v7218_v48, %v6657_v37  ;;  %v1116_v19 = vmax.f32 %v1038_v5, 0.0  ;;  %v1134_v28 = vld [vmem:[%s8496_s10 + $0x30] sm:$0xff] }
 0x3c9   :  { %4989 = vmatpush3.msra.mxu1 %v1109_v21  ;;  %v1104_v20 = vmax.f32 %v978_v29, 0.0  ;;  %v963_v21 = vadd.f32 %v7206_v58, %v8868_v33  ;;  %v1118_v32 = vmax.f32 %v1048_v45, 0.0  ;;  %v953_v58 = vadd.f32 %v7202_v52, %v6654_v41 }
 0x3ca   :  { %4990 = vmatprep.subr.mxu1 %v1124_v12  ;;  %v8870_v12 = vld [vmem:[#allocation93_spill] sm:$0xff]  ;;  %v1117_v1 = vmax.f32 %v1043_v6, 0.0  ;;  %v1023_v37 = vadd.f32 %v7214_v36, %v6675_v43  ;;  %v1115_v48 = vmax.f32 %v1033_v3, 0.0  ;;  %v943_v41 = vadd.f32 %v7198_v63, %v6673_v39  ;;  %v1133_v63 = vld [vmem:[%s8496_s10 + $0x28] sm:$0xff] }
 0x3cb   :  { %4991 = vmatpush3.msra.mxu1 %v1108_v16  ;;  %v958_v24 = vadd.f32 %v7208_v60, %v8870_v12  ;;  %v1101_v16 = vmax.f32 %v963_v21, 0.0  ;;  %v948_v60 = vadd.f32 %v7204_v0, %v6664_v10  ;;  %v1099_v52 = vmax.f32 %v953_v58, 0.0  ;;  %v1128_v39 = vld [vmem:[%s8496_s10] sm:$0xff] }
 0x3cc   :  { %4992 = vmatprep.subr.mxu1 %v1123_v27  ;;  %v1018_v57 = vadd.f32 %v7216_v56, %v6681_v51  ;;  %v1114_v9 = vmax.f32 %v1028_v35, 0.0  ;;  %v938_v10 = vadd.f32 %v7200_v55, %v6679_v14  ;;  %v1113_v27 = vmax.f32 %v1023_v37, 0.0  ;;  %v1131_v51 = vld [vmem:[%s8496_s10 + $0x18] sm:$0xff]  ;;  %v1130_v14 = vld [vmem:[%s8496_s10 + $0x10] sm:$0xff]  ;;  %v1132_v55 = vld [vmem:[%s8496_s10 + $0x20] sm:$0xff] }
 0x3cd   :  { %4993 = vmatpush3.msra.mxu1 %v1107_v62  ;;  %v1100_v13 = vmax.f32 %v958_v24, 0.0  ;;  %v1098_v0 = vmax.f32 %v948_v60, 0.0  ;;  %v1097_v43 = vmax.f32 %v943_v41, 0.0  ;;  %v1135_v56 = vld [vmem:[%s8496_s10 + $0x38] sm:$0xff]  ;;  %v1355_v62 = vld [vmem:[%s8500_s14] sm:$0xff] }
 0x3ce   :  { %4994 = vmatprep.subr.mxu1 %v1122_v17  ;;  %v1112_v36 = vmax.f32 %v1018_v57, 0.0  ;;  %v1096_v15 = vmax.f32 %v938_v10, 0.0 }
 0x3cf   :  { %4995 = vmatpush3.msra.mxu1 %v1106_v11 }
 0x3d0   :  { %4996 = vmatprep.subr.mxu1 %v1121_v53 }
 0x3d1   :  { %4997 = vmatpush3.msra.mxu1 %v1105_v25 }
 0x3d2   :  { %4998 = vmatprep.subr.mxu1 %v1120_v22 }
 0x3d3   :  { %4999 = vmatpush3.msra.mxu1 %v1104_v20 }
 0x3d4   :  { %5000 = vmatprep.subr.mxu1 %v1119_v18 }
 0x3d5   :  { %5001 = vmatpush3.msra.mxu1 %v1103_v26 }
 0x3d6   :  { %5002 = vmatprep.subr.mxu1 %v1118_v32 }
 0x3d7   :  { %5003 = vmatpush3.msra.mxu1 %v1102_v59 }
 0x3d8   :  { %5004 = vmatprep.subr.mxu1 %v1117_v1 }
 0x3d9   :  { %5005 = vmatpush3.msra.mxu1 %v1101_v16 }
 0x3da   :  { %5006 = vmatprep.subr.mxu1 %v1116_v19 }
 0x3db   :  { %5007 = vmatpush3.msra.mxu1 %v1100_v13 }
 0x3dc   :  { %5008 = vmatprep.subr.mxu1 %v1115_v48 }
 0x3dd   :  { %5009 = vmatpush3.msra.mxu1 %v1099_v52 }
 0x3de   :  { %5010 = vmatprep.subr.mxu1 %v1114_v9 }
 0x3df   :  { %5011 = vmatpush3.msra.mxu1 %v1098_v0 }
 0x3e0   :  { %5012 = vmatprep.subr.mxu1 %v1113_v27 }
 0x3e1   :  { %5013 = vmatpush3.msra.mxu1 %v1097_v43 }
 0x3e2   :  { %5014 = vmatprep.subr.mxu1 %v1112_v36 }
 0x3e3   :  { %5015 = vmatpush3.msra.mxu1 %v1096_v15 }
 0x3e4   :  { %1225 = vmatmul.mubr.f32.vlgmr.msra.gmra.mxu1 %v1128_v39 }
 0x3e5   :  { %1229 = vmatprep.mubr.f32.mxu1 %v1131_v51 }
 0x3e8   :  { %1230 = vmatmul.mubr.f32.gmra.mxu1 %v1130_v14 }
 0x3e9   :  { %1234 = vmatprep.mubr.f32.mxu1 %v1133_v63 }
 0x3ec   :  { %1235 = vmatmul.mubr.f32.gmra.mxu1 %v1132_v55 }
 0x3ed   :  { %1239 = vmatprep.mubr.f32.mxu1 %v1135_v56 }
 0x3f0   :  { %1240 = vmatmul.mubr.f32.gmra.mxu1 %v1134_v28 }
 0x3f1   :  { %5441 = vmatprep.mubr.msk.f32.mxu1 %vm123_vm0, %v1355_v62 }
 0x4a4   :  { %v5016_v34 = vpop.f32.mrf.mxu1 }
 0x4a6   :  { %v5017_v47 = vpop.f32.mrf.mxu1 }
 0x4a7   :  { %v5018_v61 = vadd.f32 %v5017_v47, %v5016_v34  ;;  %v8873_v34 = vld [vmem:[#allocation97_spill] sm:$0xff] }
 0x4a8   :  { %v5019_v17 = vpop.f32.mrf.mxu1 }
 0x4a9   :  { %v1227_v46 = vadd.f32 %v5018_v61, %v6687_v8 }
 0x4aa   :  { %v5020_v29 = vpop.f32.mrf.mxu1 }
 0x4ab   :  { %v5021_v11 = vadd.f32 %v5020_v29, %v5019_v17  ;;  %v1245_v45 = vadd.f32 %v1227_v46, %v7066_v44  ;;  %v8874_v17 = vld [vmem:[#allocation96_spill] sm:$0xff]  ;;  %v8875_v29 = vld [vmem:[#allocation99_spill] sm:$0xff] }
 0x4ac   :  { %v5022_v50 = vpop.f32.mrf.mxu1 }
 0x4ad   :  { %v1232_v53 = vadd.f32 %v5021_v11, %v6685_v2  ;;  %v1257_v6 = vsel %vm221_vm2, %v1245_v45, 0.0  ;;  %v8871_v2 = vld [vmem:[#allocation95_spill] sm:$0xff] }
 0x4ae   :  { %v5023_v49 = vpop.f32.mrf.mxu1 }
 0x4af   :  { %v1246_v30 = vadd.f32 %v1232_v53, %v7061_v40  ;;  %v5024_v25 = vadd.f32 %v5023_v49, %v5022_v50  ;;  %v8872_v40 = vld [vmem:[#allocation30_spill] sm:$0xff] }
 0x4b0   :  { %v5025_v38 = vpop.f32.mrf.mxu1 }
 0x4b1   :  { %v1237_v22 = vadd.f32 %v5024_v25, %v6693_v7  ;;  %v1258_v23 = vsel %vm221_vm2, %v1246_v30, 0.0 }
 0x4b2   :  { %v5026_v31 = vpop.f32.mrf.mxu1  ;;  %v1259_v33 = vadd.f32 %v1258_v23, %v1257_v6  ;;  %v8880_v6 = vld [vmem:[#allocation103_spill] sm:$0xff] }
 0x4b3   :  { %v1247_v20 = vadd.f32 %v1237_v22, %v7055_v4  ;;  %v5027_v42 = vadd.f32 %v5026_v31, %v5025_v38  ;;  %v8877_v38 = vld [vmem:[#allocation98_spill] sm:$0xff]  ;;  %v8878_v22 = vld [vmem:[#allocation100_spill] sm:$0xff] }
 0x4b5   :  { %v1260_v8 = vsel %vm221_vm2, %v1247_v20, 0.0  ;;  %v1242_v18 = vadd.f32 %v5027_v42, %v8871_v2  ;;  %v8881_v2 = vld [vmem:[#allocation29_spill] sm:$0xff] }
 0x4b6   :  { %v1261_v26 = vadd.f32 %v1260_v8, %v1259_v33  ;;  %v8882_v33 = vld [vmem:[#allocation102_spill] sm:$0xff] }
 0x4b7   :  { %v1248_v21 = vadd.f32 %v1242_v18, %v8872_v40 }
 0x4b9   :  { %v1262_v44 = vsel %vm221_vm2, %v1248_v21, 0.0 }
 0x4ba   :  { %v1263_v54 = vadd.f32 %v1262_v44, %v1261_v26  ;;  %v8884_v44 = vld [vmem:[#allocation25_spill] sm:$0xff] }
 0x4bc   :  { %v1264_v7 = vrot.slane %v1263_v54, 4 }
 0x4be   :  { %v1265_v5 = vadd.f32 %v1264_v7, %v1263_v54  ;;  %v1356_v7 = vld [vmem:[%s8500_s14 + $0x8] sm:$0xff] }
 0x4c0   :  { %v1266_v32 = vrot.slane %v1265_v5, 2 }
 0x4c2   :  { %v1267_v12 = vadd.f32 %v1266_v32, %v1265_v5  ;;  %v1357_v5 = vld [vmem:[%s8500_s14 + $0x10] sm:$0xff]  ;;  %v1358_v32 = vld [vmem:[%s8500_s14 + $0x18] sm:$0xff] }
 0x4c4   :  { %v1268_v24 = vrot.slane %v1267_v12, 1 }
 0x4c6   :  { %v1269_v4 = vadd.f32 %v1268_v24, %v1267_v12  ;;  %v1593_v12 = vld [vmem:[%s8885_s19] sm:$0xff] }
 0x4c8   :  { %v1270_v59 = vmul.f32 0.03125, %v1269_v4 }
 0x4ca   :  { %v1271_v3 = vsub.f32 %v1245_v45, %v1270_v59  ;;  %v1272_v1 = vsub.f32 %v1246_v30, %v1270_v59  ;;  %v1273_v58 = vsub.f32 %v1247_v20, %v1270_v59  ;;  %v1274_v16 = vsub.f32 %v1248_v21, %v1270_v59  ;;  %v8876_v30 = vld [vmem:[#allocation101_spill] sm:$0xff]  ;;  %v8879_v20 = vld [vmem:[#allocation26_spill] sm:$0xff]  ;;  %v8883_v21 = vld [vmem:[#allocation92_spill] sm:$0xff] }
 0x4cb   :  { %v8886_v59 = vld [vmem:[#allocation104_spill] sm:$0xff] }
 0x4cc   :  { %v1275_v35 = vmul.f32 %v1271_v3, %v1271_v3  ;;  %v1276_v19 = vmul.f32 %v1272_v1, %v1272_v1  ;;  %v1277_v60 = vmul.f32 %v1273_v58, %v1273_v58  ;;  %v1278_v13 = vmul.f32 %v1274_v16, %v1274_v16 }
 0x4cd   :  { %v1326_v47 = vmul.f32 %v8873_v34, %v1274_v16  ;;  %v1325_v61 = vmul.f32 %v8874_v17, %v1273_v58  ;;  %v1324_v11 = vmul.f32 %v8875_v29, %v1272_v1  ;;  %v1323_v25 = vmul.f32 %v8876_v30, %v1271_v3  ;;  %v8887_v1 = vld [vmem:[#allocation105_spill] sm:$0xff] }
 0x4ce   :  { %v1279_v37 = vsel %vm221_vm2, %v1275_v35, 0.0  ;;  %v1280_v48 = vsel %vm221_vm2, %v1276_v19, 0.0  ;;  %v1282_v52 = vsel %vm221_vm2, %v1277_v60, 0.0  ;;  %v1284_v9 = vsel %vm221_vm2, %v1278_v13, 0.0  ;;  %v8888_v13 = vld [vmem:[#allocation106_spill] sm:$0xff] }
 0x4cf   :  { %v1281_v41 = vadd.f32 %v1280_v48, %v1279_v37  ;;  %v8889_v48 = vld [vmem:[#allocation107_spill] sm:$0xff] }
 0x4d1   :  { %v1283_v57 = vadd.f32 %v1282_v52, %v1281_v41 }
 0x4d3   :  { %v1285_v10 = vadd.f32 %v1284_v9, %v1283_v57 }
 0x4d5   :  { %v1286_v0 = vrot.slane %v1285_v10, 4 }
 0x4d7   :  { %v1287_v27 = vadd.f32 %v1286_v0, %v1285_v10 }
 0x4d9   :  { %v1288_v43 = vrot.slane %v1287_v27, 2 }
 0x4db   :  { %v1289_v36 = vadd.f32 %v1288_v43, %v1287_v27 }
 0x4dd   :  { %v1290_v15 = vrot.slane %v1289_v36, 1 }
 0x4df   :  { %v1291_v39 = vadd.f32 %v1290_v15, %v1289_v36 }
 0x4e1   :  { %v1293_v51 = vmul.f32 0.032258064, %v1291_v39 }
 0x4e3   :  { %5697 = vrsqrt.f32 %v1293_v51  ;;  %vm1296_vm3 = vcmp.eq.f32.partialorder %v1293_v51, inf  ;;  %v1299_v55 = vand.u32 2147483648, %v1293_v51  ;;  %vm1298_vm4 = vcmp.eq.f32.partialorder %v1293_v51, 0.0 }
 0x4f0   :  { %v5698_v14 = vpop.eup %5697 }
 0x4f1   :  { %v1295_v63 = vmul.f32 %v5698_v14, %v1293_v51 }
 0x4f3   :  { %v1297_v56 = vsel %vm1296_vm3, %v1293_v51, %v1295_v63 }
 0x4f4   :  { %v1300_v28 = vsel %vm1298_vm4, %v1299_v55, %v1297_v56 }
 0x4f5   :  { %v1301_v62 = vadd.f32 1e-06, %v1300_v28 }
 0x4f7   :  { %5699 = vrcp.f32 %v1301_v62 }
 0x504   :  { %v5700_v50 = vpop.eup %5699 }
 0x505   :  { %v1330_v46 = vmul.f32 %v5700_v50, %v1326_v47  ;;  %v1329_v53 = vmul.f32 %v5700_v50, %v1325_v61  ;;  %v1328_v49 = vmul.f32 %v5700_v50, %v1324_v11  ;;  %v1327_v23 = vmul.f32 %v5700_v50, %v1323_v25 }
 0x507   :  { %v1354_v45 = vadd.f32 %v8877_v38, %v1330_v46  ;;  %v1353_v31 = vadd.f32 %v8878_v22, %v1329_v53  ;;  %v1352_v8 = vadd.f32 %v8880_v6, %v1328_v49  ;;  %v1351_v40 = vadd.f32 %v8882_v33, %v1327_v23  ;;  %v8890_v33 = vld [vmem:[#allocation108_spill] sm:$0xff] }
 0x509   :  { %v1362_v42 = vadd.f32 %v8879_v20, %v1354_v45  ;;  %v1361_v18 = vadd.f32 %v8881_v2, %v1353_v31  ;;  %v1360_v26 = vadd.f32 %v8883_v21, %v1352_v8  ;;  %v1359_v54 = vadd.f32 %v8884_v44, %v1351_v40  ;;  %v8891_v21 = vld [vmem:[#allocation109_spill] sm:$0xff] }
 0x50b   :  { %5433 = vmatprep.subr.mxu1 %v1362_v42 }
 0x50c   :  { %5434 = vmatpush3.msra.mxu1 %v1362_v42 }
 0x50d   :  { %5435 = vmatprep.subr.mxu1 %v1361_v18 }
 0x50e   :  { %5436 = vmatpush3.msra.mxu1 %v1361_v18 }
 0x50f   :  { %5437 = vmatprep.subr.mxu1 %v1360_v26 }
 0x510   :  { %5438 = vmatpush3.msra.mxu1 %v1360_v26 }
 0x511   :  { %5439 = vmatprep.subr.mxu1 %v1359_v54 }
 0x512   :  { %5440 = vmatpush3.msra.mxu1 %v1359_v54 }
 0x513   :  { %5442 = vmatmul.mubr.msk.f32.vlgmr.msra.gmra.mxu1 %vm123_vm0, %v1356_v7 }
 0x514   :  { %5444 = vmatprep.mubr.msk.f32.mxu1 %vm123_vm0, %v1357_v5  ;;  %v8892_v5 = vld [vmem:[#allocation111_spill] sm:$0xff] }
 0x517   :  { %5445 = vmatmul.mubr.msk.f32.gmra.mxu1 %vm123_vm0, %v1358_v32 }
 0x518   :  { %5455 = vmatprep.mubr.msk.f32.mxu1 %vm123_vm0, %v1593_v12  ;;  %v8893_v12 = vld [vmem:[#allocation110_spill] sm:$0xff] }
 0x5d3   :  { %v5443_v24 = vpop.f32.mrf.mxu1 }
 0x5d4   :  { %v1475_v3 = vadd.f32 %v5443_v24, %v8886_v59  ;;  %v8894_v59 = vld [vmem:[#allocation113_spill] sm:$0xff] }
 0x5d5   :  { %v1469_v4 = vpop.f32.mrf.mxu1 }
 0x5d6   :  { %v1470_v58 = vadd.f32 %v1469_v4, %v8887_v1  ;;  %v1497_v60 = vsel %vm221_vm2, %v1475_v3, 0.0  ;;  %v8895_v1 = vld [vmem:[#allocation112_spill] sm:$0xff] }
 0x5d7   :  { %v5446_v16 = vpop.f32.mrf.mxu1 }
 0x5d8   :  { %v1496_v35 = vsel %vm221_vm2, %v1470_v58, 0.0  ;;  %v1485_v37 = vadd.f32 %v5446_v16, %v8888_v13 }
 0x5d9   :  { %v1479_v19 = vpop.f32.mrf.mxu1  ;;  %v1498_v52 = vadd.f32 %v1497_v60, %v1496_v35  ;;  %v8896_v35 = vld [vmem:[#allocation115_spill] sm:$0xff]  ;;  %v8897_v60 = vld [vmem:[#allocation114_spill] sm:$0xff] }
 0x5da   :  { %v1480_v41 = vadd.f32 %v1479_v19, %v8889_v48  ;;  %v1501_v10 = vsel %vm221_vm2, %v1485_v37, 0.0  ;;  %v1595_v48 = vld [vmem:[%s8885_s19 + $0x10] sm:$0xff] }
 0x5dc   :  { %v1499_v57 = vsel %vm221_vm2, %v1480_v41, 0.0 }
 0x5dd   :  { %v1500_v9 = vadd.f32 %v1499_v57, %v1498_v52  ;;  %v1597_v52 = vld [vmem:[%s8885_s19 + $0x20] sm:$0xff]  ;;  %v1598_v57 = vld [vmem:[%s8885_s19 + $0x28] sm:$0xff] }
 0x5df   :  { %v1502_v0 = vadd.f32 %v1501_v10, %v1500_v9  ;;  %v1599_v9 = vld [vmem:[%s8885_s19 + $0x30] sm:$0xff]  ;;  %v1600_v10 = vld [vmem:[%s8885_s19 + $0x38] sm:$0xff] }
 0x5e1   :  { %v1503_v27 = vrot.slane %v1502_v0, 4 }
 0x5e3   :  { %v1504_v43 = vadd.f32 %v1503_v27, %v1502_v0  ;;  %v1601_v0 = vld [vmem:[%s8885_s19 + $0x40] sm:$0xff]  ;;  %v1602_v27 = vld [vmem:[%s8885_s19 + $0x48] sm:$0xff] }
 0x5e5   :  { %v1505_v36 = vrot.slane %v1504_v43, 2 }
 0x5e7   :  { %v1506_v15 = vadd.f32 %v1505_v36, %v1504_v43  ;;  %v1603_v43 = vld [vmem:[%s8885_s19 + $0x50] sm:$0xff]  ;;  %v1604_v36 = vld [vmem:[%s8885_s19 + $0x58] sm:$0xff] }
 0x5e9   :  { %v1507_v39 = vrot.slane %v1506_v15, 1 }
 0x5eb   :  { %v1508_v51 = vadd.f32 %v1507_v39, %v1506_v15  ;;  %v1605_v15 = vld [vmem:[%s8885_s19 + $0x60] sm:$0xff]  ;;  %v1606_v39 = vld [vmem:[%s8885_s19 + $0x68] sm:$0xff] }
 0x5ed   :  { %v1509_v14 = vmul.f32 0.03125, %v1508_v51  ;;  %v1607_v51 = vld [vmem:[%s8885_s19 + $0x70] sm:$0xff] }
 0x5ef   :  { %v1510_v63 = vsub.f32 %v1470_v58, %v1509_v14  ;;  %v1511_v55 = vsub.f32 %v1475_v3, %v1509_v14  ;;  %v1512_v56 = vsub.f32 %v1480_v41, %v1509_v14  ;;  %v1513_v28 = vsub.f32 %v1485_v37, %v1509_v14  ;;  %v1594_v37 = vld [vmem:[%s8885_s19 + $0x8] sm:$0xff]  ;;  %v1596_v41 = vld [vmem:[%s8885_s19 + $0x18] sm:$0xff] }
 0x5f0   :  { %v1608_v14 = vld [vmem:[%s8885_s19 + $0x78] sm:$0xff] }
 0x5f1   :  { %v1514_v62 = vmul.f32 %v1510_v63, %v1510_v63  ;;  %v1515_v34 = vmul.f32 %v1511_v55, %v1511_v55  ;;  %v1516_v47 = vmul.f32 %v1512_v56, %v1512_v56  ;;  %v1517_v17 = vmul.f32 %v1513_v28, %v1513_v28 }
 0x5f2   :  { %v1563_v40 = vmul.f32 %v8890_v33, %v1512_v56  ;;  %v1564_v26 = vmul.f32 %v8891_v21, %v1513_v28  ;;  %v1562_v32 = vmul.f32 %v8892_v5, %v1511_v55  ;;  %v1561_v3 = vmul.f32 %v8894_v59, %v1510_v63  ;;  %v1609_v63 = vld [vmem:[%s8885_s19 + $0x80] sm:$0xff]  ;;  %v1610_v55 = vld [vmem:[%s8885_s19 + $0x88] sm:$0xff]  ;;  %v1611_v56 = vld [vmem:[%s8885_s19 + $0x90] sm:$0xff] }
 0x5f3   :  { %v1518_v61 = vsel %vm221_vm2, %v1514_v62, 0.0  ;;  %v1519_v29 = vsel %vm221_vm2, %v1515_v34, 0.0  ;;  %v1521_v50 = vsel %vm221_vm2, %v1516_v47, 0.0  ;;  %v1523_v53 = vsel %vm221_vm2, %v1517_v17, 0.0  ;;  %v1612_v28 = vld [vmem:[%s8885_s19 + $0x98] sm:$0xff]  ;;  %v1613_v62 = vld [vmem:[%s8885_s19 + $0xa0] sm:$0xff] }
 0x5f4   :  { %v1520_v11 = vadd.f32 %v1519_v29, %v1518_v61  ;;  %v1614_v34 = vld [vmem:[%s8885_s19 + $0xa8] sm:$0xff]  ;;  %v1615_v47 = vld [vmem:[%s8885_s19 + $0xb0] sm:$0xff]  ;;  %v1616_v17 = vld [vmem:[%s8885_s19 + $0xb8] sm:$0xff] }
 0x5f5   :  { %v1617_v61 = vld [vmem:[%s8885_s19 + $0xc0] sm:$0xff]  ;;  %v1618_v29 = vld [vmem:[%s8885_s19 + $0xc8] sm:$0xff] }
 0x5f6   :  { %v1522_v46 = vadd.f32 %v1521_v50, %v1520_v11  ;;  %v1619_v11 = vld [vmem:[%s8885_s19 + $0xd0] sm:$0xff]  ;;  %v1620_v50 = vld [vmem:[%s8885_s19 + $0xd8] sm:$0xff] }
 0x5f8   :  { %v1524_v49 = vadd.f32 %v1523_v53, %v1522_v46  ;;  %v1621_v46 = vld [vmem:[%s8885_s19 + $0xe0] sm:$0xff]  ;;  %v1622_v53 = vld [vmem:[%s8885_s19 + $0xe8] sm:$0xff] }
 0x5fa   :  { %v1525_v30 = vrot.slane %v1524_v49, 4 }
 0x5fc   :  { %v1526_v25 = vadd.f32 %v1525_v30, %v1524_v49  ;;  %v1623_v49 = vld [vmem:[%s8885_s19 + $0xf0] sm:$0xff]  ;;  %v1624_v30 = vld [vmem:[%s8885_s19 + $0xf8] sm:$0xff] }
 0x5fe   :  { %v1527_v38 = vrot.slane %v1526_v25, 2 }
 0x600   :  { %v1528_v45 = vadd.f32 %v1527_v38, %v1526_v25  ;;  %v2171_v25 = vld [vmem:[%s8506_s20 + $0x8] sm:$0xff] }
 0x601   :  { %2266 = vmatprep.mubr.f32.mxu0 %v2171_v25  ;;  %v8908_v25 = vld [vmem:[#allocation7_spill] sm:$0xff] }
 0x602   :  { %v1529_v22 = vrot.slane %v1528_v45, 1 }
 0x604   :  { %v1530_v31 = vadd.f32 %v1529_v22, %v1528_v45 }
 0x606   :  { %v1531_v23 = vmul.f32 0.032258064, %v1530_v31 }
 0x608   :  { %5701 = vrsqrt.f32 %v1531_v23  ;;  %vm1534_vm5 = vcmp.eq.f32.partialorder %v1531_v23, inf  ;;  %v1537_v6 = vand.u32 2147483648, %v1531_v23  ;;  %vm1536_vm6 = vcmp.eq.f32.partialorder %v1531_v23, 0.0 }
 0x615   :  { %v5702_v20 = vpop.eup %5701 }
 0x616   :  { %v1533_v42 = vmul.f32 %v5702_v20, %v1531_v23 }
 0x618   :  { %v1535_v8 = vsel %vm1534_vm5, %v1531_v23, %v1533_v42 }
 0x619   :  { %v1538_v2 = vsel %vm1536_vm6, %v1537_v6, %v1535_v8 }
 0x61a   :  { %v1539_v18 = vadd.f32 1e-06, %v1538_v2 }
 0x61c   :  { %5703 = vrcp.f32 %v1539_v18 }
 0x629   :  { %v5704_v44 = vpop.eup %5703 }
 0x62a   :  { %v1568_v54 = vmul.f32 %v5704_v44, %v1564_v26  ;;  %v1567_v7 = vmul.f32 %v5704_v44, %v1563_v40  ;;  %v1566_v4 = vmul.f32 %v5704_v44, %v1562_v32  ;;  %v1565_v16 = vmul.f32 %v5704_v44, %v1561_v3 }
 0x62c   :  { %v7354_v24 = vadd.f32 %v8893_v12, %v1568_v54  ;;  %v7359_v58 = vadd.f32 %v8895_v1, %v1567_v7  ;;  %v7364_v19 = vadd.f32 %v8896_v35, %v1566_v4  ;;  %v7369_v13 = vadd.f32 %v8897_v60, %v1565_v16 }
 0x62e   :  { %5447 = vmatprep.subr.mxu1 %v7354_v24 }
 0x62f   :  { %5448 = vmatpush3.msra.mxu1 %v7354_v24 }
 0x630   :  { %5449 = vmatprep.subr.mxu1 %v7359_v58 }
 0x631   :  { %5450 = vmatpush3.msra.mxu1 %v7359_v58 }
 0x632   :  { %5451 = vmatprep.subr.mxu1 %v7364_v19 }
 0x633   :  { %5452 = vmatpush3.msra.mxu1 %v7364_v19 }
 0x634   :  { %5453 = vmatprep.subr.mxu1 %v7369_v13 }
 0x635   :  { %5454 = vmatpush3.msra.mxu1 %v7369_v13 }
 0x636   :  { %5456 = vmatmul.mubr.msk.f32.vlgmr.msra.gmra.mxu1 %vm123_vm0, %v1594_v37 }
 0x637   :  { %5458 = vmatprep.mubr.msk.f32.mxu1 %vm123_vm0, %v1595_v48 }
 0x63a   :  { %5459 = vmatmul.mubr.msk.f32.gmra.mxu1 %vm123_vm0, %v1596_v41  ;;  %v8898_v41 = vld [vmem:[#allocation116_spill] sm:$0xff] }
 0x63b   :  { %5461 = vmatprep.mubr.msk.f32.mxu1 %vm123_vm0, %v1597_v52 }
 0x63e   :  { %5462 = vmatmul.mubr.msk.f32.gmra.mxu1 %vm123_vm0, %v1598_v57 }
 0x63f   :  { %5464 = vmatprep.mubr.msk.f32.mxu1 %vm123_vm0, %v1599_v9  ;;  %v8899_v9 = vld [vmem:[#allocation117_spill] sm:$0xff] }
 0x642   :  { %5465 = vmatmul.mubr.msk.f32.gmra.mxu1 %vm123_vm0, %v1600_v10 }
 0x643   :  { %5467 = vmatprep.mubr.msk.f32.mxu1 %vm123_vm0, %v1601_v0  ;;  %v8900_v0 = vld [vmem:[#allocation118_spill] sm:$0xff] }
 0x646   :  { %5468 = vmatmul.mubr.msk.f32.gmra.mxu1 %vm123_vm0, %v1602_v27 }
 0x647   :  { %5470 = vmatprep.mubr.msk.f32.mxu1 %vm123_vm0, %v1603_v43 }
 0x64a   :  { %5471 = vmatmul.mubr.msk.f32.gmra.mxu1 %vm123_vm0, %v1604_v36  ;;  %v8901_v36 = vld [vmem:[#allocation121_spill] sm:$0xff] }
 0x64b   :  { %5473 = vmatprep.mubr.msk.f32.mxu1 %vm123_vm0, %v1605_v15 }
 0x64e   :  { %5474 = vmatmul.mubr.msk.f32.gmra.mxu1 %vm123_vm0, %v1606_v39 }
 0x64f   :  { %5476 = vmatprep.mubr.msk.f32.mxu1 %vm123_vm0, %v1607_v51  ;;  %v8902_v51 = vld [vmem:[#allocation119_spill] sm:$0xff] }
 0x652   :  { %5477 = vmatmul.mubr.msk.f32.gmra.mxu1 %vm123_vm0, %v1608_v14 }
 0x653   :  { %5479 = vmatprep.mubr.msk.f32.mxu1 %vm123_vm0, %v1609_v63  ;;  %v8903_v63 = vld [vmem:[#allocation120_spill] sm:$0xff] }
 0x656   :  { %5480 = vmatmul.mubr.msk.f32.gmra.mxu1 %vm123_vm0, %v1610_v55 }
 0x657   :  { %5482 = vmatprep.mubr.msk.f32.mxu1 %vm123_vm0, %v1611_v56 }
 0x65a   :  { %5483 = vmatmul.mubr.msk.f32.gmra.mxu1 %vm123_vm0, %v1612_v28  ;;  %v7535_v28 = vpop.permute.xlu0 %3057 }
 0x65b   :  { %5485 = vmatprep.mubr.msk.f32.mxu1 %vm123_vm0, %v1613_v62  ;;  %v8904_v62 = vld [vmem:[#allocation123_spill] sm:$0xff] }
 0x65e   :  { %5486 = vmatmul.mubr.msk.f32.gmra.mxu1 %vm123_vm0, %v1614_v34 }
 0x65f   :  { %5488 = vmatprep.mubr.msk.f32.mxu1 %vm123_vm0, %v1615_v47 }
 0x662   :  { %5489 = vmatmul.mubr.msk.f32.gmra.mxu1 %vm123_vm0, %v1616_v17  ;;  %v8905_v17 = vld [vmem:[#allocation122_spill] sm:$0xff] }
 0x663   :  { %5491 = vmatprep.mubr.msk.f32.mxu1 %vm123_vm0, %v1617_v61 }
 0x666   :  { %5492 = vmatmul.mubr.msk.f32.gmra.mxu1 %vm123_vm0, %v1618_v29 }
 0x667   :  { %5494 = vmatprep.mubr.msk.f32.mxu1 %vm123_vm0, %v1619_v11  ;;  %v8906_v11 = vld [vmem:[#allocation5_spill] sm:$0xff] }
 0x66a   :  { %5495 = vmatmul.mubr.msk.f32.gmra.mxu1 %vm123_vm0, %v1620_v50 }
 0x66b   :  { %5497 = vmatprep.mubr.msk.f32.mxu1 %vm123_vm0, %v1621_v46 }
 0x66e   :  { %5498 = vmatmul.mubr.msk.f32.gmra.mxu1 %vm123_vm0, %v1622_v53  ;;  %v8907_v53 = vld [vmem:[#allocation124_spill] sm:$0xff] }
 0x66f   :  { %5500 = vmatprep.mubr.msk.f32.mxu1 %vm123_vm0, %v1623_v49 }
 0x672   :  { %5501 = vmatmul.mubr.msk.f32.gmra.mxu1 %vm123_vm0, %v1624_v30 }
 0x6f6   :  { %v7501_v38 = vpop.f32.mrf.mxu1 }
 0x6f8   :  { %v7503_v45 = vpop.f32.mrf.mxu1 }
 0x6fa   :  { %v7505_v22 = vpop.f32.mrf.mxu1 }
 0x6fc   :  { %v7507_v31 = vpop.f32.mrf.mxu1 }
 0x6fe   :  { %v7509_v23 = vpop.f32.mrf.mxu1 }
 0x700   :  { %v7511_v20 = vpop.f32.mrf.mxu1 }
 0x702   :  { %v7513_v42 = vpop.f32.mrf.mxu1 }
 0x704   :  { %v7515_v6 = vpop.f32.mrf.mxu1 }
 0x706   :  { %v5469_v8 = vpop.f32.mrf.mxu1 }
 0x708   :  { %v2019_v2 = vpop.f32.mrf.mxu1 }
 0x70a   :  { %v5472_v18 = vpop.f32.mrf.mxu1 }
 0x70b   :  { %v2035_v49 = vadd.f32 %v5472_v18, %v8907_v53  ;;  %v8912_v18 = vld [vmem:[#allocation11_spill] sm:$0xff] }
 0x70c   :  { %v2029_v33 = vpop.f32.mrf.mxu1 }
 0x70e   :  { %v5475_v40 = vpop.f32.mrf.mxu1 }
 0x70f   :  { %v2045_v55 = vadd.f32 %v5475_v40, %v8903_v63 }
 0x710   :  { %v2039_v21 = vpop.f32.mrf.mxu1 }
 0x711   :  { %v2040_v61 = vadd.f32 %v2039_v21, %v8905_v17  ;;  %v2151_v30 = vmax.f32 %v2045_v55, 0.0  ;;  %v8910_v21 = vld [vmem:[#allocation9_spill] sm:$0xff] }
 0x712   :  { %v5478_v26 = vpop.f32.mrf.mxu1 }
 0x713   :  { %v2055_v52 = vadd.f32 %v5478_v26, %v8898_v41  ;;  %v7543_v41 = vpop.permute.xlu0 %3052 }
 0x714   :  { %v2049_v44 = vpop.f32.mrf.mxu1 }
 0x715   :  { %v2050_v27 = vadd.f32 %v2049_v44, %v8900_v0  ;;  %v2153_v56 = vmax.f32 %v2055_v52, 0.0  ;;  %v8909_v44 = vld [vmem:[#allocation6_spill] sm:$0xff] }
 0x716   :  { %v7517_v54 = vpop.f32.mrf.mxu1 }
 0x717   :  { %v2152_v29 = vmax.f32 %v2050_v27, 0.0  ;;  %v7554_v63 = vpop.permute.xlu0 %3047 }
 0x718   :  { %v7519_v7 = vpop.f32.mrf.mxu1 }
 0x71a   :  { %v7521_v5 = vpop.f32.mrf.mxu1 }
 0x71c   :  { %v7523_v32 = vpop.f32.mrf.mxu1 }
 0x71e   :  { %v7525_v12 = vpop.f32.mrf.mxu1 }
 0x720   :  { %v7527_v4 = vpop.f32.mrf.mxu1 }
 0x722   :  { %v5490_v59 = vpop.f32.mrf.mxu1 }
 0x724   :  { %v2089_v3 = vpop.f32.mrf.mxu1 }
 0x726   :  { %v5493_v1 = vpop.f32.mrf.mxu1 }
 0x727   :  { %v2105_v52 = vadd.f32 %v5493_v1, %v8910_v21  ;;  %v8915_v1 = vld [vmem:[#allocation12_spill] sm:$0xff] }
 0x728   :  { %v2099_v16 = vpop.f32.mrf.mxu1 }
 0x729   :  { %v2100_v0 = vadd.f32 %v2099_v16, %v8912_v18  ;;  %v8916_v16 = vld [vmem:[#allocation15_spill] sm:$0xff] }
 0x72a   :  { %v5496_v35 = vpop.f32.mrf.mxu1  ;;  %v2090_v55 = vadd.f32 %v2089_v3, %v8916_v16  ;;  %v8920_v3 = vld [vmem:[#allocation19_spill] sm:$0xff] }
 0x72b   :  { %v2115_v50 = vadd.f32 %v5496_v35, %v8906_v11  ;;  %v8911_v35 = vld [vmem:[#allocation8_spill] sm:$0xff]  ;;  %v2172_v16 = vld [vmem:[%s8506_s20 + $0x10] sm:$0xff] }
 0x72c   :  { %v2109_v60 = vpop.f32.mrf.mxu1 }
 0x72d   :  { %v2110_v40 = vadd.f32 %v2109_v60, %v8908_v25  ;;  %v8913_v60 = vld [vmem:[#allocation10_spill] sm:$0xff] }
 0x72e   :  { %v5499_v37 = vpop.f32.mrf.mxu1 }
 0x72f   :  { %v2125_v15 = vadd.f32 %v5499_v37, %v8901_v36  ;;  %v2030_v37 = vadd.f32 %v2029_v33, %v8909_v44  ;;  %v2164_v27 = vmax.f32 %v2110_v40, 0.0  ;;  %v7549_v33 = vpop.permute.xlu1 %2977  ;;  %v8923_v40 = vld [vmem:[#allocation20_spill] sm:$0xff] }
 0x730   :  { %v2119_v48 = vpop.f32.mrf.mxu1 }
 0x731   :  { %v2120_v34 = vadd.f32 %v2119_v48, %v8904_v62  ;;  %v2167_v46 = vmax.f32 %v2125_v15, 0.0  ;;  %v2150_v48 = vmax.f32 %v2040_v61, 0.0  ;;  %v2148_v36 = vmax.f32 %v2030_v37, 0.0  ;;  %v8914_v15 = vld [vmem:[#allocation13_spill] sm:$0xff]  ;;  %v8919_v61 = vld [vmem:[#allocation16_spill] sm:$0xff] }
 0x732   :  { %v5502_v57 = vpop.f32.mrf.mxu1 }
 0x733   :  { %v2135_v10 = vadd.f32 %v5502_v57, %v8899_v9  ;;  %v2166_v26 = vmax.f32 %v2120_v34, 0.0  ;;  %v2165_v57 = vmax.f32 %v2115_v50, 0.0  ;;  %v2025_v9 = vadd.f32 %v5469_v8, %v8911_v35  ;;  %v7563_v11 = vpop.permute.xlu1 %2972 }
 0x734   :  { %v2129_v43 = vpop.f32.mrf.mxu1  ;;  %v2080_v50 = vadd.f32 %v7527_v4, %v8920_v3  ;;  %v8924_v4 = vld [vmem:[#allocation23_spill] sm:$0xff]  ;;  %v2419_v3 = vld [vmem:[%s8596_s25] sm:$0xff] }
 0x735   :  { %v2169_v39 = vmax.f32 %v2135_v10, 0.0  ;;  %v2130_v14 = vadd.f32 %v2129_v43, %v8902_v51  ;;  %v2149_v10 = vmax.f32 %v2035_v49, 0.0  ;;  %v2020_v43 = vadd.f32 %v2019_v2, %v8913_v60  ;;  %v8917_v2 = vld [vmem:[#allocation14_spill] sm:$0xff]  ;;  %v8929_v60 = vld [vmem:[#allocation28_spill] sm:$0xff] }
 0x736   :  { %v2163_v51 = vmax.f32 %v2105_v52, 0.0  ;;  %v2147_v8 = vmax.f32 %v2025_v9, 0.0  ;;  %v2010_v62 = vadd.f32 %v7515_v6, %v8917_v2  ;;  %v8921_v6 = vld [vmem:[#allocation18_spill] sm:$0xff]  ;;  %v2070_v37 = vadd.f32 %v7523_v32, %v8924_v4 }
 0x737   :  { %v2168_v47 = vmax.f32 %v2130_v14, 0.0  ;;  %5072 = vmatprep.subr.mxu0 %v2169_v39  ;;  %v2095_v39 = vadd.f32 %v5490_v59, %v8914_v15  ;;  %v2015_v14 = vadd.f32 %v7513_v42, %v8915_v1  ;;  %v2146_v34 = vmax.f32 %v2020_v43, 0.0  ;;  %v2175_v2 = vld [vmem:[%s8506_s20 + $0x28] sm:$0xff] }
 0x738   :  { %5073 = vmatpush3.msra.mxu0 %v2153_v56  ;;  %v2162_v56 = vmax.f32 %v2100_v0, 0.0  ;;  %v2005_v42 = vadd.f32 %v7509_v23, %v8919_v61  ;;  %v2000_v53 = vadd.f32 %v7511_v20, %v8921_v6  ;;  %v2144_v49 = vmax.f32 %v2010_v62, 0.0  ;;  %v8925_v20 = vld [vmem:[#allocation22_spill] sm:$0xff]  ;;  %v8928_v0 = vld [vmem:[#allocation31_spill] sm:$0xff]  ;;  %v7631_v62 = vld [vmem:[%s8594_s27 + $0x20] sm:$0xff] }
 0x739   :  { %5074 = vmatprep.subr.mxu0 %v2168_v47  ;;  %v8918_v47 = vld [vmem:[#allocation17_spill] sm:$0xff]  ;;  %v2161_v17 = vmax.f32 %v2095_v39, 0.0  ;;  %v1990_v21 = vadd.f32 %v7507_v31, %v8925_v20  ;;  %v2156_v31 = vmax.f32 %v2070_v37, 0.0  ;;  %v1980_v43 = vadd.f32 %v7503_v45, %v8929_v60  ;;  %v7599_v45 = vld [vmem:[%s8594_s27 + $0x38] sm:$0xff]  ;;  %v2421_v6 = vld [vmem:[%s8596_s25 + $0x10] sm:$0xff] }
 0x73a   :  { %5075 = vmatpush3.msra.mxu0 %v2152_v29  ;;  %v2085_v59 = vadd.f32 %v7525_v12, %v8918_v47  ;;  %v2145_v29 = vmax.f32 %v2015_v14, 0.0  ;;  %v7569_v12 = vpop.permute.xlu0 %3042  ;;  %v2143_v44 = vmax.f32 %v2005_v42, 0.0  ;;  %v2142_v52 = vmax.f32 %v2000_v53, 0.0  ;;  %v2173_v14 = vld [vmem:[%s8506_s20 + $0x18] sm:$0xff]  ;;  %v2174_v47 = vld [vmem:[%s8506_s20 + $0x20] sm:$0xff]  ;;  %v2176_v42 = vld [vmem:[%s8506_s20 + $0x30] sm:$0xff] }
 0x73b   :  { %5076 = vmatprep.subr.mxu0 %v2167_v46  ;;  %v2160_v46 = vmax.f32 %v2090_v55, 0.0  ;;  %v7619_v55 = vld [vmem:[%s8594_s27 + $0x28] sm:$0xff]  ;;  %v4832_v53 = vld [vmem:[%s8600_s3 + $0xc0] sm:$0xff] }
 0x73c   :  { %5077 = vmatpush3.msra.mxu0 %v2151_v30  ;;  %v8922_v30 = vld [vmem:[#allocation21_spill] sm:$0xff]  ;;  %v2159_v23 = vmax.f32 %v2085_v59, 0.0  ;;  %v4833_v59 = vld [vmem:[%s8600_s3 + $0xc8] sm:$0xf] }
 0x73d   :  { %5078 = vmatprep.subr.mxu0 %v2166_v26  ;;  %v2075_v25 = vadd.f32 %v7521_v5, %v8922_v30  ;;  %v1995_v26 = vadd.f32 %v7505_v22, %v8923_v40  ;;  %v8926_v5 = vld [vmem:[#allocation27_spill] sm:$0xff]  ;;  %v8927_v22 = vld [vmem:[#allocation24_spill] sm:$0xff] }
 0x73e   :  { %5079 = vmatpush3.msra.mxu0 %v2150_v48  ;;  %v2158_v48 = vmax.f32 %v2080_v50, 0.0  ;;  %v2065_v35 = vadd.f32 %v7517_v54, %v8926_v5  ;;  %v7585_v32 = vpop.permute.xlu0 %3037  ;;  %v2420_v50 = vld [vmem:[%s8596_s25 + $0x8] sm:$0xff]  ;;  %v2422_v30 = vld [vmem:[%s8596_s25 + $0x18] sm:$0xff] }
 0x73f   :  { %5080 = vmatprep.subr.mxu0 %v2165_v57  ;;  %v7579_v57 = vpop.permute.xlu1 %2967  ;;  %v2157_v9 = vmax.f32 %v2075_v25, 0.0  ;;  %v2141_v18 = vmax.f32 %v1995_v26, 0.0 }
 0x740   :  { %5081 = vmatpush3.msra.mxu0 %v2149_v10  ;;  %v1985_v10 = vadd.f32 %v7501_v38, %v8927_v22  ;;  %v2155_v54 = vmax.f32 %v2065_v35, 0.0 }
 0x741   :  { %5082 = vmatprep.subr.mxu0 %v2164_v27  ;;  %v2060_v27 = vadd.f32 %v7519_v7, %v8928_v0  ;;  %v2170_v7 = vld [vmem:[%s8506_s20] sm:$0xff]  ;;  %v4830_v0 = vld [vmem:[%s8600_s3 + $0xb0] sm:$0xff] }
 0x742   :  { %5083 = vmatpush3.msra.mxu0 %v2148_v36  ;;  %v2140_v36 = vmax.f32 %v1990_v21, 0.0  ;;  %v2139_v15 = vmax.f32 %v1985_v10, 0.0  ;;  %v7601_v1 = vpop.permute.xlu0 %3032 }
 0x743   :  { %5084 = vmatprep.subr.mxu0 %v2163_v51  ;;  %v7591_v39 = vpop.permute.xlu1 %2962  ;;  %v2154_v38 = vmax.f32 %v2060_v27, 0.0  ;;  %v2138_v51 = vmax.f32 %v1980_v43, 0.0  ;;  %v4828_v43 = vld [vmem:[%s8600_s3 + $0xa0] sm:$0xff] }
 0x744   :  { %5085 = vmatpush3.msra.mxu0 %v2147_v8  ;;  %v7609_v8 = vld [vmem:[%s8594_s27 + $0x30] sm:$0xff] }
 0x745   :  { %5086 = vmatprep.subr.mxu0 %v2162_v56 }
 0x746   :  { %5087 = vmatpush3.msra.mxu0 %v2146_v34  ;;  %v7633_v34 = vpop.permute.xlu0 %3027 }
 0x747   :  { %5088 = vmatprep.subr.mxu0 %v2161_v17  ;;  %v7621_v56 = vpop.permute.xlu1 %2957  ;;  %v2177_v17 = vld [vmem:[%s8506_s20 + $0x38] sm:$0xff] }
 0x748   :  { %5089 = vmatpush3.msra.mxu0 %v2145_v29 }
 0x749   :  { %5090 = vmatprep.subr.mxu0 %v2160_v46 }
 0x74a   :  { %5091 = vmatpush3.msra.mxu0 %v2144_v49  ;;  %v7654_v29 = vpop.permute.xlu0 %3022 }
 0x74b   :  { %5092 = vmatprep.subr.mxu0 %v2159_v23  ;;  %v7648_v61 = vpop.permute.xlu1 %2952 }
 0x74c   :  { %5093 = vmatpush3.msra.mxu0 %v2143_v44 }
 0x74d   :  { %5094 = vmatprep.subr.mxu0 %v2158_v48 }
 0x74e   :  { %5095 = vmatpush3.msra.mxu0 %v2142_v52  ;;  %v7671_v49 = vpop.permute.xlu0 %3017 }
 0x74f   :  { %5096 = vmatprep.subr.mxu0 %v2157_v9  ;;  %v7663_v46 = vpop.permute.xlu1 %2947  ;;  %8930 = vst [vmem:[#allocation34_spill] sm:$0xff] %v7671_v49  ;;  %v9025_v49 = vld [vmem:[#allocation76_spill] sm:$0xff] }
 0x750   :  { %5097 = vmatpush3.msra.mxu0 %v2141_v18  ;;  %v4831_v18 = vld [vmem:[%s8600_s3 + $0xb8] sm:$0xff] }
 0x751   :  { %5098 = vmatprep.subr.mxu0 %v2156_v31  ;;  %v4829_v31 = vld [vmem:[%s8600_s3 + $0xa8] sm:$0xff] }
 0x752   :  { %5099 = vmatpush3.msra.mxu0 %v2140_v36  ;;  %v7682_v23 = vpop.permute.xlu0 %3462  ;;  %v4827_v36 = vld [vmem:[%s8600_s3 + $0x98] sm:$0xff] }
 0x753   :  { %5100 = vmatprep.subr.mxu0 %v2155_v54  ;;  %v7679_v25 = vpop.permute.xlu1 %2942  ;;  %8931 = vst [vmem:[#allocation33_spill] sm:$0xff] %v7682_v23 }
 0x754   :  { %5101 = vmatpush3.msra.mxu0 %v2139_v15  ;;  %v4826_v15 = vld [vmem:[%s8600_s3 + $0x90] sm:$0xff] }
 0x755   :  { %5102 = vmatprep.subr.mxu0 %v2154_v38 }
 0x756   :  { %5103 = vmatpush3.msra.mxu0 %v2138_v51  ;;  %v7686_v26 = vpop.permute.xlu0 %3472  ;;  %v4825_v51 = vld [vmem:[%s8600_s3 + $0x88] sm:$0xff] }
 0x757   :  { %2267 = vmatmul.mubr.f32.vlgmr.msra.gmra.mxu0 %v2170_v7  ;;  %5503 = vmatprep.subr.mxu0 %v7599_v45  ;;  %v7684_v40 = vpop.permute.xlu1 %2937  ;;  %8933 = vst [vmem:[#allocation37_spill] sm:$0xff] %v7686_v26  ;;  %v4824_v7 = vld [vmem:[%s8600_s3 + $0x80] sm:$0xff]  ;;  %v9022_v26 = vld [vmem:[#allocation71_spill] sm:$0xff] }
 0x758   :  { %2271 = vmatprep.mubr.f32.mxu0 %v2173_v14  ;;  %5504 = vmatpush3.msra.mxu0 %v7599_v45  ;;  %8932 = vst [vmem:[#allocation38_spill] sm:$0xff] %v7684_v40 }
 0x759   :  { %5505 = vmatprep.subr.mxu0 %v7609_v8 }
 0x75a   :  { %5506 = vmatpush3.msra.mxu0 %v7609_v8  ;;  %v7690_v4 = vpop.permute.xlu0 %3639 }
 0x75b   :  { %2272 = vmatmul.mubr.f32.gmra.mxu0 %v2172_v16  ;;  %5507 = vmatprep.subr.mxu0 %v7619_v55  ;;  %v7688_v44 = vpop.permute.xlu1 %3467  ;;  %8935 = vst [vmem:[#allocation41_spill] sm:$0xff] %v7690_v4  ;;  %v4823_v16 = vld [vmem:[%s8600_s3 + $0x78] sm:$0xff] }
 0x75c   :  { %2276 = vmatprep.mubr.f32.mxu0 %v2175_v2  ;;  %5508 = vmatpush3.msra.mxu0 %v7619_v55  ;;  %8934 = vst [vmem:[#allocation42_spill] sm:$0xff] %v7688_v44 }
 0x75d   :  { %5509 = vmatprep.subr.mxu0 %v7631_v62 }
 0x75e   :  { %5510 = vmatpush3.msra.mxu0 %v7631_v62  ;;  %v7694_v48 = vpop.permute.xlu0 %3629 }
 0x75f   :  { %2277 = vmatmul.mubr.f32.gmra.mxu0 %v2174_v47  ;;  %5517 = vmatprep.subr.msk.mxu0 %vm234_vm1, %v4833_v59  ;;  %v7692_v37 = vpop.permute.xlu1 %3477  ;;  %8937 = vst [vmem:[#allocation45_spill] sm:$0xff] %v7694_v48  ;;  %v4822_v47 = vld [vmem:[%s8600_s3 + $0x70] sm:$0xff]  ;;  %v9020_v48 = vld [vmem:[#allocation68_spill] sm:$0xff] }
 0x760   :  { %2281 = vmatprep.mubr.f32.mxu0 %v2177_v17  ;;  %8936 = vst [vmem:[#allocation46_spill] sm:$0xff] %v7692_v37 }
 0x762   :  { %v7698_v21 = vpop.permute.xlu0 %3624 }
 0x763   :  { %2282 = vmatmul.mubr.f32.gmra.mxu0 %v2176_v42  ;;  %v7696_v20 = vpop.permute.xlu1 %3634  ;;  %8939 = vst [vmem:[#allocation50_spill] sm:$0xff] %v7698_v21 }
 0x764   :  { %5511 = vmatprep.mubr.msk.f32.mxu0 %vm123_vm0, %v2419_v3  ;;  %8938 = vst [vmem:[#allocation49_spill] sm:$0xff] %v7696_v20 }
 0x766   :  { %v7702_v5 = vpop.permute.xlu0 %3657 }
 0x767   :  { %5512 = vmatmul.mubr.msk.f32.vlgmr.msra.gmra.mxu0 %vm123_vm0, %v2420_v50  ;;  %v7700_v52 = vpop.permute.xlu1 %3667  ;;  %8941 = vst [vmem:[#allocation58_spill] sm:$0xff] %v7702_v5 }
 0x768   :  { %5514 = vmatprep.mubr.msk.f32.mxu0 %vm123_vm0, %v2421_v6  ;;  %5518 = vmatpush3.msk.msra.mxu0 %vm234_vm1, %v4833_v59  ;;  %8940 = vst [vmem:[#allocation53_spill] sm:$0xff] %v7700_v52  ;;  %v4821_v59 = vld [vmem:[%s8600_s3 + $0x68] sm:$0xff]  ;;  %v9019_v52 = vld [vmem:[#allocation67_spill] sm:$0xff] }
 0x769   :  { %5519 = vmatprep.subr.mxu0 %v4832_v53 }
 0x76a   :  { %5520 = vmatpush3.msra.mxu0 %v4832_v53  ;;  %v7706_v9 = vpop.permute.xlu0 %3692 }
 0x76b   :  { %5515 = vmatmul.mubr.msk.f32.gmra.mxu0 %vm123_vm0, %v2422_v30  ;;  %v7704_v35 = vpop.permute.xlu1 %3662  ;;  %8943 = vst [vmem:[#allocation57_spill] sm:$0xff] %v7706_v9  ;;  %5521 = vmatprep.subr.mxu0 %v4831_v18 }
 0x76c   :  { %8942 = vst [vmem:[#allocation54_spill] sm:$0xff] %v7704_v35  ;;  %5522 = vmatpush3.msra.mxu0 %v4831_v18 }
 0x76d   :  { %5523 = vmatprep.subr.mxu0 %v4830_v0 }
 0x76e   :  { %v7710_v10 = vpop.permute.xlu0 %3702  ;;  %5524 = vmatpush3.msra.mxu0 %v4830_v0 }
 0x76f   :  { %v7708_v22 = vpop.permute.xlu1 %3652  ;;  %8945 = vst [vmem:[#allocation61_spill] sm:$0xff] %v7710_v10  ;;  %5525 = vmatprep.subr.mxu0 %v4829_v31 }
 0x770   :  { %8944 = vst [vmem:[#allocation62_spill] sm:$0xff] %v7708_v22  ;;  %5526 = vmatpush3.msra.mxu0 %v4829_v31  ;;  %v9018_v22 = vld [vmem:[#allocation64_spill] sm:$0xff] }
 0x771   :  { %5527 = vmatprep.subr.mxu0 %v4828_v43 }
 0x772   :  { %v7723_v60 = vpop.permute.xlu0 %3877  ;;  %5528 = vmatpush3.msra.mxu0 %v4828_v43 }
 0x773   :  { %v7718_v27 = vpop.permute.xlu1 %3697  ;;  %8947 = vst [vmem:[#allocation65_spill] sm:$0xff] %v7723_v60  ;;  %5529 = vmatprep.subr.mxu0 %v4827_v36 }
 0x774   :  { %8946 = vst [vmem:[#allocation66_spill] sm:$0xff] %v7718_v27  ;;  %5530 = vmatpush3.msra.mxu0 %v4827_v36 }
 0x775   :  { %5531 = vmatprep.subr.mxu0 %v4826_v15 }
 0x776   :  { %v7736_v38 = vpop.permute.xlu0 %3867  ;;  %5532 = vmatpush3.msra.mxu0 %v4826_v15 }
 0x777   :  { %v7731_v54 = vpop.permute.xlu1 %3707  ;;  %8949 = vst [vmem:[#allocation69_spill] sm:$0xff] %v7736_v38  ;;  %5533 = vmatprep.subr.mxu0 %v4825_v51 }
 0x778   :  { %8948 = vst [vmem:[#allocation70_spill] sm:$0xff] %v7731_v54  ;;  %5534 = vmatpush3.msra.mxu0 %v4825_v51 }
 0x779   :  { %5535 = vmatprep.subr.mxu0 %v4824_v7 }
 0x77a   :  { %5536 = vmatpush3.msra.mxu0 %v4824_v7  ;;  %v7749_v2 = vpop.permute.xlu0 %3862 }
 0x77b   :  { %v7744_v14 = vpop.permute.xlu1 %3872  ;;  %5537 = vmatprep.subr.mxu0 %v4823_v16  ;;  %8951 = vst [vmem:[#allocation73_spill] sm:$0xff] %v7749_v2 }
 0x77c   :  { %8950 = vst [vmem:[#allocation74_spill] sm:$0xff] %v7744_v14  ;;  %5538 = vmatpush3.msra.mxu0 %v4823_v16 }
 0x77d   :  { %5539 = vmatprep.subr.mxu0 %v4822_v47 }
 0x77e   :  { %5540 = vmatpush3.msra.mxu0 %v4822_v47  ;;  %v7759_v42 = vpop.permute.xlu0 %3895 }
 0x77f   :  { %5541 = vmatprep.subr.mxu0 %v4821_v59  ;;  %v7757_v17 = vpop.permute.xlu1 %3905  ;;  %8953 = vst [vmem:[#allocation77_spill] sm:$0xff] %v7759_v42 }
 0x780   :  { %8952 = vst [vmem:[#allocation78_spill] sm:$0xff] %v7757_v17  ;;  %5542 = vmatpush3.msra.mxu0 %v4821_v59 }
 0x782   :  { %v7763_v50 = vpop.permute.xlu0 %4133 }
 0x783   :  { %v7761_v3 = vpop.permute.xlu1 %3900  ;;  %8955 = vst [vmem:[#allocation81_spill] sm:$0xff] %v7763_v50 }
 0x784   :  { %8954 = vst [vmem:[#allocation82_spill] sm:$0xff] %v7761_v3 }
 0x786   :  { %v7767_v53 = vpop.permute.xlu0 %4128 }
 0x787   :  { %v7765_v6 = vpop.permute.xlu1 %3890  ;;  %8957 = vst [vmem:[#allocation85_spill] sm:$0xff] %v7767_v53 }
 0x788   :  { %8956 = vst [vmem:[#allocation86_spill] sm:$0xff] %v7765_v6 }
 0x78a   :  { %v7771_v18 = vpop.permute.xlu0 %4123 }
 0x78b   :  { %v7769_v30 = vpop.permute.xlu1 %4053  ;;  %8959 = vst [vmem:[#allocation89_spill] sm:$0xff] %v7771_v18 }
 0x78c   :  { %8958 = vst [vmem:[#allocation90_spill] sm:$0xff] %v7769_v30 }
 0x78e   :  { %v7775_v31 = vpop.permute.xlu0 %4118 }
 0x78f   :  { %v7773_v0 = vpop.permute.xlu1 %4048  ;;  %8961 = vst [vmem:[#allocation93_spill] sm:$0xff] %v7775_v31 }
 0x790   :  { %8960 = vst [vmem:[#allocation94_spill] sm:$0xff] %v7773_v0 }
 0x792   :  { %v7779_v36 = vpop.permute.xlu0 %4113 }
 0x793   :  { %v7777_v43 = vpop.permute.xlu1 %4043  ;;  %8963 = vst [vmem:[#allocation30_spill] sm:$0xff] %v7779_v36 }
 0x794   :  { %8962 = vst [vmem:[#allocation95_spill] sm:$0xff] %v7777_v43 }
 0x796   :  { %v7783_v51 = vpop.permute.xlu0 %4108 }
 0x797   :  { %v7781_v15 = vpop.permute.xlu1 %4038  ;;  %8965 = vst [vmem:[#allocation96_spill] sm:$0xff] %v7783_v51 }
 0x798   :  { %8964 = vst [vmem:[#allocation97_spill] sm:$0xff] %v7781_v15 }
 0x79a   :  { %v7787_v16 = vpop.permute.xlu0 %4103 }
 0x79b   :  { %v7785_v7 = vpop.permute.xlu1 %4033  ;;  %8967 = vst [vmem:[#allocation101_spill] sm:$0xff] %v7787_v16 }
 0x79c   :  { %8966 = vst [vmem:[#allocation99_spill] sm:$0xff] %v7785_v7 }
 0x79e   :  { %v7791_v59 = vpop.permute.xlu0 %4098 }
 0x79f   :  { %v7789_v47 = vpop.permute.xlu1 %4028  ;;  %8969 = vst [vmem:[#allocation100_spill] sm:$0xff] %v7791_v59 }
 0x7a0   :  { %8968 = vst [vmem:[#allocation98_spill] sm:$0xff] %v7789_v47 }
 0x7a2   :  { %v7795_v18 = vpop.permute.xlu0 %4093 }
 0x7a3   :  { %v7793_v53 = vpop.permute.xlu1 %4023  ;;  %8971 = vst [vmem:[#allocation103_spill] sm:$0xff] %v7795_v18 }
 0x7a4   :  { %8970 = vst [vmem:[#allocation26_spill] sm:$0xff] %v7793_v53 }
 0x7a6   :  { %v7799_v43 = vpop.permute.xlu0 %4088 }
 0x7a7   :  { %v7797_v31 = vpop.permute.xlu1 %4018  ;;  %8973 = vst [vmem:[#allocation102_spill] sm:$0xff] %v7799_v43 }
 0x7a8   :  { %8972 = vst [vmem:[#allocation29_spill] sm:$0xff] %v7797_v31 }
 0x7aa   :  { %v7803_v15 = vpop.permute.xlu0 %4083 }
 0x7ab   :  { %v7801_v36 = vpop.permute.xlu1 %4013  ;;  %8975 = vst [vmem:[#allocation25_spill] sm:$0xff] %v7803_v15 }
 0x7ac   :  { %8974 = vst [vmem:[#allocation92_spill] sm:$0xff] %v7801_v36 }
 0x7ae   :  { %v7807_v7 = vpop.permute.xlu0 %4078 }
 0x7af   :  { %v7805_v51 = vpop.permute.xlu1 %4008  ;;  %8977 = vst [vmem:[#allocation105_spill] sm:$0xff] %v7807_v7 }
 0x7b0   :  { %8976 = vst [vmem:[#allocation104_spill] sm:$0xff] %v7805_v51 }
 0x7b2   :  { %v7811_v47 = vpop.permute.xlu0 %4073 }
 0x7b3   :  { %v7809_v16 = vpop.permute.xlu1 %4003  ;;  %8979 = vst [vmem:[#allocation107_spill] sm:$0xff] %v7811_v47 }
 0x7b4   :  { %8978 = vst [vmem:[#allocation106_spill] sm:$0xff] %v7809_v16 }
 0x7b6   :  { %v7815_v53 = vpop.permute.xlu0 %4068 }
 0x7b7   :  { %v7813_v59 = vpop.permute.xlu1 %3998  ;;  %8981 = vst [vmem:[#allocation109_spill] sm:$0xff] %v7815_v53 }
 0x7b8   :  { %8980 = vst [vmem:[#allocation108_spill] sm:$0xff] %v7813_v59 }
 0x7ba   :  { %v7819_v31 = vpop.permute.xlu0 %4063 }
 0x7bb   :  { %v7817_v18 = vpop.permute.xlu1 %3993  ;;  %8983 = vst [vmem:[#allocation110_spill] sm:$0xff] %v7819_v31 }
 0x7bc   :  { %8982 = vst [vmem:[#allocation111_spill] sm:$0xff] %v7817_v18 }
 0x7be   :  { %v7823_v36 = vpop.permute.xlu0 %4058 }
 0x7bf   :  { %v7821_v43 = vpop.permute.xlu1 %3988  ;;  %8985 = vst [vmem:[#allocation112_spill] sm:$0xff] %v7823_v36 }
 0x7c0   :  { %8984 = vst [vmem:[#allocation113_spill] sm:$0xff] %v7821_v43 }
 0x7c2   :  { %v2185_v51 = vpop.permute.xlu0 %2184 }
 0x7c3   :  { %v7825_v15 = vpop.permute.xlu1 %3983 }
 0x7c4   :  { %8986 = vst [vmem:[#allocation115_spill] sm:$0xff] %v7825_v15 }
 0x7c6   :  { %v7829_v47 = vpop.permute.xlu0 %4503 }
 0x7c7   :  { %v7827_v0 = vpop.permute.xlu1 %3978  ;;  %8988 = vst [vmem:[#allocation116_spill] sm:$0xff] %v7829_v47 }
 0x7c8   :  { %8987 = vst [vmem:[#allocation114_spill] sm:$0xff] %v7827_v0 }
 0x7ca   :  { %v2195_v43 = vpop.permute.xlu0 %2194 }
 0x7cb   :  { %v2190_v18 = vpop.permute.xlu1 %2189 }
 0x817   :  { %v5104_v7 = vpop.f32.mrf.mxu0 }
 0x819   :  { %v5105_v16 = vpop.f32.mrf.mxu0 }
 0x81a   :  { %v5106_v50 = vadd.f32 %v5105_v16, %v5104_v7 }
 0x81b   :  { %v5107_v59 = vpop.f32.mrf.mxu0 }
 0x81c   :  { %v2269_v31 = vadd.f32 %v5106_v50, %v2185_v51 }
 0x81d   :  { %v5108_v53 = vpop.f32.mrf.mxu0 }
 0x81e   :  { %v5109_v30 = vadd.f32 %v5108_v53, %v5107_v59  ;;  %v2287_v17 = vadd.f32 %v2269_v31, %v7369_v13  ;;  %v2200_v53 = vpop.permute.xlu0 %2199  ;;  %v8990_v31 = vld [vmem:[#allocation32_spill] sm:$0xff] }
 0x81f   :  { %v5110_v6 = vpop.f32.mrf.mxu0 }
 0x820   :  { %v2274_v42 = vadd.f32 %v5109_v30, %v2190_v18  ;;  %v2299_v50 = vsel %vm221_vm2, %v2287_v17, 0.0 }
 0x821   :  { %v5111_v3 = vpop.f32.mrf.mxu0 }
 0x822   :  { %v2288_v36 = vadd.f32 %v2274_v42, %v7364_v19  ;;  %v5112_v15 = vadd.f32 %v5111_v3, %v5110_v6  ;;  %v8989_v3 = vld [vmem:[#allocation35_spill] sm:$0xff] }
 0x823   :  { %v5113_v2 = vpop.f32.mrf.mxu0 }
 0x824   :  { %v2279_v0 = vadd.f32 %v5112_v15, %v2195_v43  ;;  %v2300_v47 = vsel %vm221_vm2, %v2288_v36, 0.0 }
 0x825   :  { %v5114_v38 = vpop.f32.mrf.mxu0  ;;  %v2301_v51 = vadd.f32 %v2300_v47, %v2299_v50 }
 0x826   :  { %v2289_v7 = vadd.f32 %v2279_v0, %v7359_v58  ;;  %v5115_v16 = vadd.f32 %v5114_v38, %v5113_v2  ;;  %v8991_v0 = vld [vmem:[#allocation39_spill] sm:$0xff] }
 0x827   :  { %v5513_v59 = vpop.f32.mrf.mxu0 }
 0x828   :  { %v2302_v30 = vsel %vm221_vm2, %v2289_v7, 0.0  ;;  %v2284_v18 = vadd.f32 %v5115_v16, %v2200_v53  ;;  %v2531_v43 = vadd.f32 %v5513_v59, %v8990_v31  ;;  %v8992_v53 = vld [vmem:[#allocation36_spill] sm:$0xff] }
 0x829   :  { %v2525_v19 = vpop.f32.mrf.mxu0  ;;  %v2303_v6 = vadd.f32 %v2302_v30, %v2301_v51 }
 0x82a   :  { %v2290_v42 = vadd.f32 %v2284_v18, %v7354_v24  ;;  %v2526_v13 = vadd.f32 %v2525_v19, %v8989_v3 }
 0x82b   :  { %v5516_v15 = vpop.f32.mrf.mxu0 }
 0x82c   :  { %v2304_v58 = vsel %vm221_vm2, %v2290_v42, 0.0  ;;  %5543 = vmatprep.mubr.msk.f32.mxu0 %vm221_vm2, %v2526_v13  ;;  %v2541_v50 = vadd.f32 %v5516_v15, %v8992_v53 }
 0x82d   :  { %v2305_v38 = vadd.f32 %v2304_v58, %v2303_v6  ;;  %v2535_v2 = vpop.f32.mrf.mxu0  ;;  %5544 = vmatmul.mubr.msk.f32.vlgmr.msra.gmra.mxu0 %vm221_vm2, %v2531_v43 }
 0x82e   :  { %v2536_v16 = vadd.f32 %v2535_v2, %v8991_v0 }
 0x82f   :  { %v2306_v47 = vrot.slane %v2305_v38, 4 }
 0x830   :  { %5546 = vmatprep.mubr.msk.f32.mxu0 %vm221_vm2, %v2536_v16 }
 0x831   :  { %v2307_v24 = vadd.f32 %v2306_v47, %v2305_v38  ;;  %5547 = vmatmul.mubr.msk.f32.gmra.mxu0 %vm221_vm2, %v2541_v50 }
 0x833   :  { %v2308_v59 = vrot.slane %v2307_v24, 2 }
 0x835   :  { %v2309_v30 = vadd.f32 %v2308_v59, %v2307_v24 }
 0x837   :  { %v2310_v18 = vrot.slane %v2309_v30, 1 }
 0x839   :  { %v2311_v51 = vadd.f32 %v2310_v18, %v2309_v30 }
 0x83b   :  { %v2312_v19 = vmul.f32 0.03125, %v2311_v51 }
 0x83d   :  { %v2313_v3 = vsub.f32 %v2287_v17, %v2312_v19  ;;  %v2314_v13 = vsub.f32 %v2288_v36, %v2312_v19  ;;  %v2315_v6 = vsub.f32 %v2289_v7, %v2312_v19  ;;  %v2316_v31 = vsub.f32 %v2290_v42, %v2312_v19  ;;  %v7851_v17 = vpop.permute.xlu1 %4508 }
 0x83e   :  { %8993 = vst [vmem:[#allocation117_spill] sm:$0xff] %v7851_v17 }
 0x83f   :  { %v2317_v43 = vmul.f32 %v2313_v3, %v2313_v3  ;;  %v2318_v58 = vmul.f32 %v2314_v13, %v2314_v13  ;;  %v2319_v2 = vmul.f32 %v2315_v6, %v2315_v6  ;;  %v2320_v0 = vmul.f32 %v2316_v31, %v2316_v31 }
 0x841   :  { %v2321_v15 = vsel %vm221_vm2, %v2317_v43, 0.0  ;;  %v2322_v16 = vsel %vm221_vm2, %v2318_v58, 0.0  ;;  %v2324_v47 = vsel %vm221_vm2, %v2319_v2, 0.0  ;;  %v2326_v50 = vsel %vm221_vm2, %v2320_v0, 0.0  ;;  %v7853_v30 = vpop.permute.xlu1 %4513  ;;  %v2347_v2 = vpop.permute.xlu0 %2346 }
 0x842   :  { %v2323_v38 = vadd.f32 %v2322_v16, %v2321_v15  ;;  %8994 = vst [vmem:[#allocation118_spill] sm:$0xff] %v7853_v30 }
 0x844   :  { %v2325_v53 = vadd.f32 %v2324_v47, %v2323_v38 }
 0x845   :  { %v7855_v43 = vpop.permute.xlu1 %4518  ;;  %v2357_v16 = vpop.permute.xlu0 %2356 }
 0x846   :  { %v2327_v24 = vadd.f32 %v2326_v50, %v2325_v53  ;;  %8995 = vst [vmem:[#allocation121_spill] sm:$0xff] %v7855_v43  ;;  %v2364_v43 = vmul.f32 %v2347_v2, %v2313_v3 }
 0x848   :  { %v2328_v59 = vrot.slane %v2327_v24, 4 }
 0x849   :  { %v2352_v58 = vpop.permute.xlu1 %2351 }
 0x84a   :  { %v2329_v36 = vadd.f32 %v2328_v59, %v2327_v24  ;;  %v7859_v24 = vpop.permute.xlu0 %4665  ;;  %v2365_v30 = vmul.f32 %v2352_v58, %v2314_v13 }
 0x84b   :  { %8997 = vst [vmem:[#allocation120_spill] sm:$0xff] %v7859_v24 }
 0x84c   :  { %v2330_v7 = vrot.slane %v2329_v36, 2 }
 0x84d   :  { %v2362_v15 = vpop.permute.xlu1 %2361 }
 0x84e   :  { %v2331_v42 = vadd.f32 %v2330_v7, %v2329_v36  ;;  %v2367_v17 = vmul.f32 %v2362_v15, %v2316_v31  ;;  %v2647_v31 = vld [vmem:[%s8714_s8 + $0x18] sm:$0xff]  ;;  %v9001_v15 = vld [vmem:[#allocation43_spill] sm:$0xff] }
 0x850   :  { %v2332_v18 = vrot.slane %v2331_v42, 1 }
 0x851   :  { %v7857_v50 = vpop.permute.xlu1 %4670 }
 0x852   :  { %v2333_v51 = vadd.f32 %v2332_v18, %v2331_v42  ;;  %8996 = vst [vmem:[#allocation119_spill] sm:$0xff] %v7857_v50  ;;  %v7863_v42 = vpop.permute.xlu0 %4675 }
 0x853   :  { %8999 = vst [vmem:[#allocation122_spill] sm:$0xff] %v7863_v42 }
 0x854   :  { %v2334_v19 = vmul.f32 0.032258064, %v2333_v51 }
 0x855   :  { %v7861_v7 = vpop.permute.xlu1 %4680 }
 0x856   :  { %5705 = vrsqrt.f32 %v2334_v19  ;;  %vm2337_vm7 = vcmp.eq.f32.partialorder %v2334_v19, inf  ;;  %v2340_v47 = vand.u32 2147483648, %v2334_v19  ;;  %vm2339_vm8 = vcmp.eq.f32.partialorder %v2334_v19, 0.0  ;;  %8998 = vst [vmem:[#allocation123_spill] sm:$0xff] %v7861_v7  ;;  %v2375_v51 = vpop.permute.xlu0 %2374 }
 0x859   :  { %v2380_v18 = vpop.permute.xlu1 %2379 }
 0x85a   :  { %v2385_v24 = vpop.permute.xlu0 %2384 }
 0x85d   :  { %v2390_v10 = vpop.permute.xlu1 %2389 }
 0x863   :  { %v5706_v0 = vpop.eup %5705 }
 0x864   :  { %v2336_v38 = vmul.f32 %v5706_v0, %v2334_v19  ;;  %v2366_v0 = vmul.f32 %v2357_v16, %v2315_v6 }
 0x866   :  { %v2338_v53 = vsel %vm2337_vm7, %v2334_v19, %v2336_v38 }
 0x867   :  { %v2341_v59 = vsel %vm2339_vm8, %v2340_v47, %v2338_v53  ;;  %v2644_v47 = vld [vmem:[%s8714_s8] sm:$0xff] }
 0x868   :  { %v2342_v36 = vadd.f32 1e-06, %v2341_v59  ;;  %5557 = vmatprep.mubr.msk.f32.mxu0 %vm123_vm0, %v2644_v47 }
 0x86a   :  { %5707 = vrcp.f32 %v2342_v36 }
 0x877   :  { %v5708_v60 = vpop.eup %5707 }
 0x878   :  { %v2368_v38 = vmul.f32 %v5708_v60, %v2364_v43  ;;  %v2369_v19 = vmul.f32 %v5708_v60, %v2365_v30  ;;  %v2370_v14 = vmul.f32 %v5708_v60, %v2366_v0  ;;  %v2371_v50 = vmul.f32 %v5708_v60, %v2367_v17  ;;  %v2871_v17 = vld [vmem:[%s8829_s12] sm:$0xff]  ;;  %v9000_v43 = vld [vmem:[#allocation40_spill] sm:$0xff] }
 0x87a   :  { %v2392_v53 = vadd.f32 %v2375_v51, %v2368_v38  ;;  %v2393_v59 = vadd.f32 %v2380_v18, %v2369_v19  ;;  %v2394_v36 = vadd.f32 %v2385_v24, %v2370_v14  ;;  %v2395_v7 = vadd.f32 %v2390_v10, %v2371_v50  ;;  %v2645_v10 = vld [vmem:[%s8714_s8 + $0x8] sm:$0xff]  ;;  %v2646_v14 = vld [vmem:[%s8714_s8 + $0x10] sm:$0xff]  ;;  %v9002_v18 = vld [vmem:[#allocation44_spill] sm:$0xff] }
 0x87b   :  { %v9003_v19 = vld [vmem:[#allocation47_spill] sm:$0xff] }
 0x87c   :  { %2396 = vst.msk [vmem:[#allocation2] sm:$0xff] %vm221_vm2, %v2392_v53  ;;  %2397 = vst.msk [vmem:[#allocation2 + $0x8] sm:$0xff] %vm221_vm2, %v2393_v59 }
 0x87d   :  { %2398 = vst.msk [vmem:[#allocation2 + $0x10] sm:$0xff] %vm221_vm2, %v2394_v36  ;;  %2399 = vst.msk [vmem:[#allocation2 + $0x18] sm:$0xff] %vm221_vm2, %v2395_v7 }
 0x8ed   :  { %v5545_v60 = vpop.f32.mrf.mxu0 }
 0x8ef   :  { %v2625_v3 = vpop.f32.mrf.mxu0 }
 0x8f1   :  { %v5548_v13 = vpop.f32.mrf.mxu0 }
 0x8f2   :  { %5549 = vmatprep.subr.mxu0 %v5548_v13 }
 0x8f3   :  { %v2635_v6 = vpop.f32.mrf.mxu0  ;;  %5550 = vmatpush3.msra.mxu0 %v5548_v13 }
 0x8f4   :  { %5551 = vmatprep.subr.mxu0 %v2635_v6 }
 0x8f5   :  { %5552 = vmatpush3.msra.mxu0 %v2635_v6 }
 0x8f6   :  { %5553 = vmatprep.subr.mxu0 %v5545_v60 }
 0x8f7   :  { %5554 = vmatpush3.msra.mxu0 %v5545_v60 }
 0x8f8   :  { %5555 = vmatprep.subr.mxu0 %v2625_v3 }
 0x8f9   :  { %5556 = vmatpush3.msra.mxu0 %v2625_v3 }
 0x8fa   :  { %5558 = vmatmul.mubr.msk.f32.vlgmr.msra.gmra.mxu0 %vm123_vm0, %v2645_v10 }
 0x8fb   :  { %5560 = vmatprep.mubr.msk.f32.mxu0 %vm123_vm0, %v2646_v14 }
 0x8fe   :  { %5561 = vmatmul.mubr.msk.f32.gmra.mxu0 %vm123_vm0, %v2647_v31 }
 0x8ff   :  { %5571 = vmatprep.mubr.msk.f32.mxu0 %vm123_vm0, %v2871_v17 }
 0x9ba   :  { %v5559_v30 = vpop.f32.mrf.mxu0 }
 0x9bb   :  { %v2756_v58 = vadd.f32 %v5559_v30, %v9000_v43 }
 0x9bc   :  { %v2750_v2 = vpop.f32.mrf.mxu0 }
 0x9bd   :  { %v2751_v16 = vadd.f32 %v2750_v2, %v9001_v15  ;;  %v2770_v24 = vadd.f32 %v7619_v55, %v2756_v58 }
 0x9be   :  { %v5562_v50 = vpop.f32.mrf.mxu0 }
 0x9bf   :  { %v2769_v7 = vadd.f32 %v7631_v62, %v2751_v16  ;;  %v2766_v51 = vadd.f32 %v5562_v50, %v9002_v18  ;;  %v2782_v53 = vsel %vm221_vm2, %v2770_v24, 0.0 }
 0x9c0   :  { %v2760_v0 = vpop.f32.mrf.mxu0 }
 0x9c1   :  { %v2781_v38 = vsel %vm221_vm2, %v2769_v7, 0.0  ;;  %v2761_v47 = vadd.f32 %v2760_v0, %v9003_v19  ;;  %v2772_v59 = vadd.f32 %v7599_v45, %v2766_v51 }
 0x9c2   :  { %v2783_v60 = vadd.f32 %v2782_v53, %v2781_v38 }
 0x9c3   :  { %v2771_v36 = vadd.f32 %v7609_v8, %v2761_v47  ;;  %v2786_v55 = vsel %vm221_vm2, %v2772_v59, 0.0 }
 0x9c5   :  { %v2784_v3 = vsel %vm221_vm2, %v2771_v36, 0.0 }
 0x9c6   :  { %v2785_v13 = vadd.f32 %v2784_v3, %v2783_v60 }
 0x9c8   :  { %v2787_v62 = vadd.f32 %v2786_v55, %v2785_v13 }
 0x9ca   :  { %v2788_v6 = vrot.slane %v2787_v62, 4 }
 0x9cc   :  { %v2789_v10 = vadd.f32 %v2788_v6, %v2787_v62 }
 0x9ce   :  { %v2790_v14 = vrot.slane %v2789_v10, 2 }
 0x9d0   :  { %v2791_v31 = vadd.f32 %v2790_v14, %v2789_v10 }
 0x9d2   :  { %v2792_v17 = vrot.slane %v2791_v31, 1 }
 0x9d4   :  { %v2793_v30 = vadd.f32 %v2792_v17, %v2791_v31  ;;  %v9004_v17 = vld [vmem:[#allocation51_spill] sm:$0xff] }
 0x9d6   :  { %v2794_v43 = vmul.f32 0.03125, %v2793_v30 }
 0x9d8   :  { %v2795_v58 = vsub.f32 %v2769_v7, %v2794_v43  ;;  %v2796_v2 = vsub.f32 %v2770_v24, %v2794_v43  ;;  %v2797_v15 = vsub.f32 %v2771_v36, %v2794_v43  ;;  %v2798_v45 = vsub.f32 %v2772_v59, %v2794_v43  ;;  %v9005_v43 = vld [vmem:[#allocation48_spill] sm:$0xff] }
 0x9da   :  { %v2799_v16 = vmul.f32 %v2795_v58, %v2795_v58  ;;  %v2800_v8 = vmul.f32 %v2796_v2, %v2796_v2  ;;  %v2801_v50 = vmul.f32 %v2797_v15, %v2797_v15  ;;  %v2802_v18 = vmul.f32 %v2798_v45, %v2798_v45 }
 0x9dc   :  { %v2803_v51 = vsel %vm221_vm2, %v2799_v16, 0.0  ;;  %v2804_v0 = vsel %vm221_vm2, %v2800_v8, 0.0  ;;  %v2806_v19 = vsel %vm221_vm2, %v2801_v50, 0.0  ;;  %v2808_v53 = vsel %vm221_vm2, %v2802_v18, 0.0  ;;  %v9006_v50 = vld [vmem:[#allocation55_spill] sm:$0xff] }
 0x9dd   :  { %v2805_v38 = vadd.f32 %v2804_v0, %v2803_v51  ;;  %v9008_v51 = vld [vmem:[#allocation52_spill] sm:$0xff] }
 0x9df   :  { %v2807_v47 = vadd.f32 %v2806_v19, %v2805_v38  ;;  %v9009_v38 = vld [vmem:[#allocation59_spill] sm:$0xff] }
 0x9e1   :  { %v2809_v60 = vadd.f32 %v2808_v53, %v2807_v47  ;;  %v9011_v47 = vld [vmem:[#allocation56_spill] sm:$0xff] }
 0x9e3   :  { %v2810_v3 = vrot.slane %v2809_v60, 4 }
 0x9e5   :  { %v2811_v7 = vadd.f32 %v2810_v3, %v2809_v60  ;;  %v2872_v60 = vld [vmem:[%s8829_s12 + $0x8] sm:$0xff]  ;;  %v2873_v3 = vld [vmem:[%s8829_s12 + $0x10] sm:$0xff] }
 0x9e7   :  { %v2812_v24 = vrot.slane %v2811_v7, 2 }
 0x9e9   :  { %v2813_v36 = vadd.f32 %v2812_v24, %v2811_v7  ;;  %v2874_v7 = vld [vmem:[%s8829_s12 + $0x18] sm:$0xff]  ;;  %v2875_v24 = vld [vmem:[%s8829_s12 + $0x20] sm:$0xff] }
 0x9eb   :  { %v2814_v59 = vrot.slane %v2813_v36, 1 }
 0x9ed   :  { %v2815_v13 = vadd.f32 %v2814_v59, %v2813_v36  ;;  %v2876_v36 = vld [vmem:[%s8829_s12 + $0x28] sm:$0xff]  ;;  %v2877_v59 = vld [vmem:[%s8829_s12 + $0x30] sm:$0xff] }
 0x9ef   :  { %v2816_v55 = vmul.f32 0.03125, %v2815_v13  ;;  %v2878_v13 = vld [vmem:[%s8829_s12 + $0x38] sm:$0xff] }
 0x9f1   :  { %v2817_v62 = vadd.f32 1e-05, %v2816_v55  ;;  %v2879_v55 = vld [vmem:[%s8829_s12 + $0x40] sm:$0xff] }
 0x9f3   :  { %5709 = vrsqrt.f32 %v2817_v62  ;;  %v2880_v62 = vld [vmem:[%s8829_s12 + $0x48] sm:$0xff] }
 0xa00   :  { %v5710_v6 = vpop.eup %5709 }
 0xa01   :  { %v2821_v10 = vmul.f32 %v5710_v6, %v2797_v15  ;;  %v2822_v14 = vmul.f32 %v5710_v6, %v2798_v45  ;;  %v2820_v31 = vmul.f32 %v5710_v6, %v2796_v2  ;;  %v2819_v8 = vmul.f32 %v5710_v6, %v2795_v58  ;;  %v9012_v2 = vld [vmem:[#allocation63_spill] sm:$0xff]  ;;  %v9014_v58 = vld [vmem:[#allocation60_spill] sm:$0xff] }
 0xa02   :  { %v2881_v6 = vld [vmem:[%s8829_s12 + $0x50] sm:$0xff] }
 0xa03   :  { %v2846_v30 = vmul.f32 %v9004_v17, %v2822_v14  ;;  %v2845_v16 = vmul.f32 %v9005_v43, %v2821_v10  ;;  %v2844_v0 = vmul.f32 %v9008_v51, %v2820_v31  ;;  %v2843_v53 = vmul.f32 %v9011_v47, %v2819_v8  ;;  %v2882_v10 = vld [vmem:[%s8829_s12 + $0x58] sm:$0xff]  ;;  %v2883_v14 = vld [vmem:[%s8829_s12 + $0x60] sm:$0xff]  ;;  %v2884_v31 = vld [vmem:[%s8829_s12 + $0x68] sm:$0xff] }
 0xa04   :  { %v2885_v17 = vld [vmem:[%s8829_s12 + $0x70] sm:$0xff]  ;;  %v2887_v43 = vld [vmem:[%s8829_s12 + $0x80] sm:$0xff]  ;;  %v2894_v47 = vld [vmem:[%s8829_s12 + $0xb8] sm:$0xff] }
 0xa05   :  { %v7908_v18 = vadd.f32 %v9006_v50, %v2846_v30  ;;  %v7913_v19 = vadd.f32 %v9009_v38, %v2845_v16  ;;  %v7919_v15 = vadd.f32 %v9012_v2, %v2844_v0  ;;  %v7924_v45 = vadd.f32 %v9014_v58, %v2843_v53  ;;  %v2886_v30 = vld [vmem:[%s8829_s12 + $0x78] sm:$0xff]  ;;  %v2888_v16 = vld [vmem:[%s8829_s12 + $0x88] sm:$0xff]  ;;  %v2889_v8 = vld [vmem:[%s8829_s12 + $0x90] sm:$0xff] }
 0xa06   :  { %v2890_v50 = vld [vmem:[%s8829_s12 + $0x98] sm:$0xff]  ;;  %v2891_v51 = vld [vmem:[%s8829_s12 + $0xa0] sm:$0xff]  ;;  %v2892_v0 = vld [vmem:[%s8829_s12 + $0xa8] sm:$0xff] }
 0xa07   :  { %9007 = vst [vmem:[#allocation5_spill] sm:$0xff] %v7908_v18  ;;  %5563 = vmatprep.subr.mxu0 %v7908_v18  ;;  %9010 = vst [vmem:[#allocation124_spill] sm:$0xff] %v7913_v19  ;;  %v2893_v38 = vld [vmem:[%s8829_s12 + $0xb0] sm:$0xff]  ;;  %v2895_v53 = vld [vmem:[%s8829_s12 + $0xc0] sm:$0xff] }
 0xa08   :  { %5564 = vmatpush3.msra.mxu0 %v7908_v18  ;;  %9013 = vst [vmem:[#allocation7_spill] sm:$0xff] %v7919_v15  ;;  %9015 = vst [vmem:[#allocation6_spill] sm:$0xff] %v7924_v45  ;;  %v2896_v2 = vld [vmem:[%s8829_s12 + $0xc8] sm:$0xff]  ;;  %v2897_v58 = vld [vmem:[%s8829_s12 + $0xd0] sm:$0xff] }
 0xa09   :  { %5565 = vmatprep.subr.mxu0 %v7913_v19  ;;  %v9021_v18 = vld [vmem:[#allocation75_spill] sm:$0xff] }
 0xa0a   :  { %5566 = vmatpush3.msra.mxu0 %v7913_v19 }
 0xa0b   :  { %5567 = vmatprep.subr.mxu0 %v7919_v15 }
 0xa0c   :  { %5568 = vmatpush3.msra.mxu0 %v7919_v15  ;;  %v9023_v15 = vld [vmem:[#allocation72_spill] sm:$0xff] }
 0xa0d   :  { %5569 = vmatprep.subr.mxu0 %v7924_v45 }
 0xa0e   :  { %5570 = vmatpush3.msra.mxu0 %v7924_v45 }
 0xa0f   :  { %5572 = vmatmul.mubr.msk.f32.vlgmr.msra.gmra.mxu0 %vm123_vm0, %v2872_v60  ;;  %v2898_v60 = vld [vmem:[%s8829_s12 + $0xd8] sm:$0xff] }
 0xa10   :  { %5574 = vmatprep.mubr.msk.f32.mxu0 %vm123_vm0, %v2873_v3  ;;  %v2899_v3 = vld [vmem:[%s8829_s12 + $0xe0] sm:$0xff] }
 0xa13   :  { %5575 = vmatmul.mubr.msk.f32.gmra.mxu0 %vm123_vm0, %v2874_v7  ;;  %v2900_v7 = vld [vmem:[%s8829_s12 + $0xe8] sm:$0xff] }
 0xa14   :  { %5577 = vmatprep.mubr.msk.f32.mxu0 %vm123_vm0, %v2875_v24  ;;  %v2901_v24 = vld [vmem:[%s8829_s12 + $0xf0] sm:$0xff] }
 0xa17   :  { %5578 = vmatmul.mubr.msk.f32.gmra.mxu0 %vm123_vm0, %v2876_v36  ;;  %v2902_v36 = vld [vmem:[%s8829_s12 + $0xf8] sm:$0xff] }
 0xa18   :  { %5580 = vmatprep.mubr.msk.f32.mxu0 %vm123_vm0, %v2877_v59  ;;  %v3449_v59 = vld [vmem:[%s8496_s10 + $0x8] sm:$0xff] }
 0xa19   :  { %3544 = vmatprep.mubr.f32.mxu1 %v3449_v59 }
 0xa1b   :  { %5581 = vmatmul.mubr.msk.f32.gmra.mxu0 %vm123_vm0, %v2878_v13 }
 0xa1c   :  { %5583 = vmatprep.mubr.msk.f32.mxu0 %vm123_vm0, %v2879_v55 }
 0xa1f   :  { %5584 = vmatmul.mubr.msk.f32.gmra.mxu0 %vm123_vm0, %v2880_v62 }
 0xa20   :  { %5586 = vmatprep.mubr.msk.f32.mxu0 %vm123_vm0, %v2881_v6 }
 0xa23   :  { %5587 = vmatmul.mubr.msk.f32.gmra.mxu0 %vm123_vm0, %v2882_v10 }
 0xa24   :  { %5589 = vmatprep.mubr.msk.f32.mxu0 %vm123_vm0, %v2883_v14 }
 0xa27   :  { %5590 = vmatmul.mubr.msk.f32.gmra.mxu0 %vm123_vm0, %v2884_v31 }
 0xa28   :  { %5592 = vmatprep.mubr.msk.f32.mxu0 %vm123_vm0, %v2885_v17 }
 0xa2b   :  { %5593 = vmatmul.mubr.msk.f32.gmra.mxu0 %vm123_vm0, %v2886_v30 }
 0xa2c   :  { %5595 = vmatprep.mubr.msk.f32.mxu0 %vm123_vm0, %v2887_v43 }
 0xa2f   :  { %5596 = vmatmul.mubr.msk.f32.gmra.mxu0 %vm123_vm0, %v2888_v16 }
 0xa30   :  { %5598 = vmatprep.mubr.msk.f32.mxu0 %vm123_vm0, %v2889_v8 }
 0xa33   :  { %5599 = vmatmul.mubr.msk.f32.gmra.mxu0 %vm123_vm0, %v2890_v50 }
 0xa34   :  { %5601 = vmatprep.mubr.msk.f32.mxu0 %vm123_vm0, %v2891_v51 }
 0xa37   :  { %5602 = vmatmul.mubr.msk.f32.gmra.mxu0 %vm123_vm0, %v2892_v0 }
 0xa38   :  { %5604 = vmatprep.mubr.msk.f32.mxu0 %vm123_vm0, %v2893_v38 }
 0xa3b   :  { %5605 = vmatmul.mubr.msk.f32.gmra.mxu0 %vm123_vm0, %v2894_v47 }
 0xa3c   :  { %5607 = vmatprep.mubr.msk.f32.mxu0 %vm123_vm0, %v2895_v53 }
 0xa3f   :  { %5608 = vmatmul.mubr.msk.f32.gmra.mxu0 %vm123_vm0, %v2896_v2 }
 0xa40   :  { %5610 = vmatprep.mubr.msk.f32.mxu0 %vm123_vm0, %v2897_v58 }
 0xa43   :  { %5611 = vmatmul.mubr.msk.f32.gmra.mxu0 %vm123_vm0, %v2898_v60 }
 0xa44   :  { %5613 = vmatprep.mubr.msk.f32.mxu0 %vm123_vm0, %v2899_v3 }
 0xa47   :  { %5614 = vmatmul.mubr.msk.f32.gmra.mxu0 %vm123_vm0, %v2900_v7 }
 0xa48   :  { %5616 = vmatprep.mubr.msk.f32.mxu0 %vm123_vm0, %v2901_v24 }
 0xa4b   :  { %5617 = vmatmul.mubr.msk.f32.gmra.mxu0 %vm123_vm0, %v2902_v36 }
 0xacf   :  { %v8056_v13 = vpop.f32.mrf.mxu0 }
 0xad1   :  { %v8058_v55 = vpop.f32.mrf.mxu0 }
 0xad2   :  { %9016 = vst [vmem:[#allocation9_spill] sm:$0xff] %v8058_v55  ;;  %v9024_v55 = vld [vmem:[#allocation79_spill] sm:$0xff] }
 0xad3   :  { %v8060_v62 = vpop.f32.mrf.mxu0 }
 0xad5   :  { %v8062_v6 = vpop.f32.mrf.mxu0 }
 0xad7   :  { %v8064_v10 = vpop.f32.mrf.mxu0 }
 0xad9   :  { %v8066_v14 = vpop.f32.mrf.mxu0 }
 0xadb   :  { %v8068_v31 = vpop.f32.mrf.mxu0 }
 0xadd   :  { %v8070_v17 = vpop.f32.mrf.mxu0 }
 0xadf   :  { %v5585_v30 = vpop.f32.mrf.mxu0 }
 0xae1   :  { %v3297_v43 = vpop.f32.mrf.mxu0 }
 0xae3   :  { %v5588_v16 = vpop.f32.mrf.mxu0 }
 0xae5   :  { %v3307_v8 = vpop.f32.mrf.mxu0 }
 0xae7   :  { %v5591_v50 = vpop.f32.mrf.mxu0 }
 0xae8   :  { %v3323_v44 = vadd.f32 %v5591_v50, %v9023_v15 }
 0xae9   :  { %v3317_v51 = vpop.f32.mrf.mxu0 }
 0xaeb   :  { %v5594_v0 = vpop.f32.mrf.mxu0 }
 0xaec   :  { %v3333_v5 = vadd.f32 %v5594_v0, %v9018_v22  ;;  %v3318_v22 = vadd.f32 %v3317_v51, %v9025_v49 }
 0xaed   :  { %v3327_v38 = vpop.f32.mrf.mxu0 }
 0xaee   :  { %v3328_v20 = vadd.f32 %v3327_v38, %v9020_v48  ;;  %v3431_v23 = vmax.f32 %v3333_v5, 0.0  ;;  %v9027_v38 = vld [vmem:[#allocation80_spill] sm:$0xff]  ;;  %v3428_v15 = vmax.f32 %v3318_v22, 0.0 }
 0xaef   :  { %v8072_v47 = vpop.f32.mrf.mxu0  ;;  %v9029_v5 = vld [vmem:[#allocation84_spill] sm:$0xff] }
 0xaf0   :  { %v3430_v0 = vmax.f32 %v3328_v20, 0.0 }
 0xaf1   :  { %v8074_v53 = vpop.f32.mrf.mxu0 }
 0xaf2   :  { %9017 = vst [vmem:[#allocation8_spill] sm:$0xff] %v8074_v53 }
 0xaf3   :  { %v8076_v2 = vpop.f32.mrf.mxu0 }
 0xaf5   :  { %v8078_v58 = vpop.f32.mrf.mxu0 }
 0xaf7   :  { %v5603_v60 = vpop.f32.mrf.mxu0 }
 0xaf9   :  { %v8080_v3 = vpop.f32.mrf.mxu0 }
 0xafb   :  { %v5606_v7 = vpop.f32.mrf.mxu0 }
 0xafd   :  { %v3367_v24 = vpop.f32.mrf.mxu0 }
 0xaff   :  { %v5609_v36 = vpop.f32.mrf.mxu0 }
 0xb01   :  { %v3377_v59 = vpop.f32.mrf.mxu0 }
 0xb03   :  { %v5612_v42 = vpop.f32.mrf.mxu0 }
 0xb05   :  { %v3387_v54 = vpop.f32.mrf.mxu0 }
 0xb07   :  { %v5615_v9 = vpop.f32.mrf.mxu0 }
 0xb08   :  { %v3403_v37 = vadd.f32 %v5615_v9, %v9021_v18  ;;  %v3313_v9 = vadd.f32 %v5588_v16, %v9027_v38  ;;  %v3455_v38 = vld [vmem:[%s8496_s10 + $0x38] sm:$0xff] }
 0xb09   :  { %v3397_v27 = vpop.f32.mrf.mxu0 }
 0xb0a   :  { %v3398_v40 = vadd.f32 %v3397_v27, %v9024_v55  ;;  %v3445_v48 = vmax.f32 %v3403_v37, 0.0  ;;  %v3308_v27 = vadd.f32 %v3307_v8, %v9029_v5  ;;  %v3427_v37 = vmax.f32 %v3313_v9, 0.0  ;;  %v3454_v9 = vld [vmem:[%s8496_s10 + $0x30] sm:$0xff] }
 0xb0b   :  { %v5618_v35 = vpop.f32.mrf.mxu0  ;;  %v3373_v55 = vadd.f32 %v5606_v7, %v7543_v41  ;;  %v3293_v8 = vadd.f32 %v8068_v31, %v7563_v11  ;;  %v3283_v41 = vadd.f32 %v8064_v10, %v7591_v39  ;;  %v3358_v11 = vadd.f32 %v8080_v3, %v7585_v32  ;;  %v9032_v3 = vld [vmem:[#allocation34_spill] sm:$0xff] }
 0xb0c   :  { %v3413_v21 = vadd.f32 %v5618_v35, %v9019_v52  ;;  %v9026_v52 = vld [vmem:[#allocation83_spill] sm:$0xff]  ;;  %v3444_v18 = vmax.f32 %v3398_v40, 0.0  ;;  %v3426_v40 = vmax.f32 %v3308_v27, 0.0  ;;  %v3278_v31 = vadd.f32 %v8066_v14, %v7621_v56 }
 0xb0d   :  { %v3407_v4 = vpop.f32.mrf.mxu0  ;;  %v3393_v35 = vadd.f32 %v5612_v42, %v9026_v52  ;;  %v3423_v7 = vmax.f32 %v3293_v8, 0.0  ;;  %v3273_v39 = vadd.f32 %v8060_v62, %v7648_v61  ;;  %v3421_v10 = vmax.f32 %v3283_v41, 0.0  ;;  %v3450_v52 = vld [vmem:[%s8496_s10 + $0x10] sm:$0xff]  ;;  %v9040_v8 = vld [vmem:[#allocation37_spill] sm:$0xff] }
 0xb0e   :  { %v3447_v19 = vmax.f32 %v3413_v21, 0.0  ;;  %v3408_v45 = vadd.f32 %v3407_v4, %v9022_v26  ;;  %v3429_v21 = vmax.f32 %v3323_v44, 0.0  ;;  %v9028_v26 = vld [vmem:[#allocation87_spill] sm:$0xff]  ;;  %v3348_v32 = vadd.f32 %v8078_v58, %v7633_v34 }
 0xb0f   :  { %v3388_v4 = vadd.f32 %v3387_v54, %v9028_v26  ;;  %v3443_v20 = vmax.f32 %v3393_v35, 0.0  ;;  %v3298_v54 = vadd.f32 %v3297_v43, %v7549_v33  ;;  %v3363_v33 = vadd.f32 %v5603_v60, %v7569_v12  ;;  %v3453_v35 = vld [vmem:[%s8496_s10 + $0x28] sm:$0xff] }
 0xb10   :  { %v3446_v53 = vmax.f32 %v3408_v45, 0.0  ;;  %5185 = vmatprep.subr.mxu1 %v3447_v19  ;;  %v9030_v19 = vld [vmem:[#allocation91_spill] sm:$0xff]  ;;  %v3378_v45 = vadd.f32 %v3377_v59, %v7535_v28  ;;  %v3288_v28 = vadd.f32 %v8070_v17, %v7579_v57  ;;  %v3439_v43 = vmax.f32 %v3373_v55, 0.0  ;;  %v9035_v59 = vld [vmem:[#allocation9_spill] sm:$0xff]  ;;  %v9039_v55 = vld [vmem:[#allocation6_spill] sm:$0xff] }
 0xb11   :  { %5186 = vmatpush3.msra.mxu1 %v3431_v23  ;;  %v3383_v49 = vadd.f32 %v5609_v36, %v9030_v19  ;;  %v9031_v23 = vld [vmem:[#allocation88_spill] sm:$0xff]  ;;  %v3442_v44 = vmax.f32 %v3388_v4, 0.0  ;;  %v3353_v12 = vadd.f32 %v8076_v2, %v7601_v1  ;;  %v3437_v17 = vmax.f32 %v3363_v33, 0.0  ;;  %v9034_v36 = vld [vmem:[#allocation38_spill] sm:$0xff] }
 0xb12   :  { %5187 = vmatprep.subr.mxu1 %v3446_v53  ;;  %v3303_v42 = vadd.f32 %v5585_v30, %v9031_v23  ;;  %v3368_v30 = vadd.f32 %v3367_v24, %v7554_v63  ;;  %v3440_v51 = vmax.f32 %v3378_v45, 0.0  ;;  %v3424_v53 = vmax.f32 %v3298_v54, 0.0  ;;  %v9033_v24 = vld [vmem:[#allocation8_spill] sm:$0xff]  ;;  %v9037_v23 = vld [vmem:[#allocation42_spill] sm:$0xff]  ;;  %v9038_v45 = vld [vmem:[#allocation7_spill] sm:$0xff] }
 0xb13   :  { %5188 = vmatpush3.msra.mxu1 %v3430_v0  ;;  %v3441_v16 = vmax.f32 %v3383_v49, 0.0  ;;  %v3422_v57 = vmax.f32 %v3288_v28, 0.0  ;;  %v3436_v60 = vmax.f32 %v3358_v11, 0.0  ;;  %v3268_v56 = vadd.f32 %v8062_v6, %v7663_v46  ;;  %v9036_v49 = vld [vmem:[#allocation33_spill] sm:$0xff]  ;;  %v9041_v28 = vld [vmem:[#allocation124_spill] sm:$0xff] }
 0xb14   :  { %5189 = vmatprep.subr.mxu1 %v3445_v48  ;;  %v3425_v50 = vmax.f32 %v3303_v42, 0.0  ;;  %v3438_v63 = vmax.f32 %v3368_v30, 0.0  ;;  %v3420_v14 = vmax.f32 %v3278_v31, 0.0  ;;  %v3343_v1 = vadd.f32 %v8072_v47, %v7654_v29  ;;  %v3452_v48 = vld [vmem:[%s8496_s10 + $0x20] sm:$0xff] }
 0xb15   :  { %5190 = vmatpush3.msra.mxu1 %v3429_v21  ;;  %v3435_v2 = vmax.f32 %v3353_v12, 0.0  ;;  %v3263_v61 = vadd.f32 %v8056_v13, %v7679_v25  ;;  %v3419_v62 = vmax.f32 %v3273_v39, 0.0  ;;  %v3338_v34 = vadd.f32 %v9033_v24, %v9032_v3  ;;  %v3448_v25 = vld [vmem:[%s8496_s10] sm:$0xff]  ;;  %v3451_v13 = vld [vmem:[%s8496_s10 + $0x18] sm:$0xff] }
 0xb16   :  { %5191 = vmatprep.subr.mxu1 %v3444_v18  ;;  %v3434_v58 = vmax.f32 %v3348_v32, 0.0  ;;  %v3258_v46 = vadd.f32 %v9035_v59, %v9034_v36  ;;  %v3418_v6 = vmax.f32 %v3268_v56, 0.0  ;;  %v3433_v22 = vmax.f32 %v3343_v1, 0.0  ;;  %v3674_v21 = vld [vmem:[%s8500_s14] sm:$0xff] }
 0xb17   :  { %5192 = vmatpush3.msra.mxu1 %v3428_v15  ;;  %v3417_v29 = vmax.f32 %v3263_v61, 0.0  ;;  %v3432_v47 = vmax.f32 %v3338_v34, 0.0  ;;  %v9043_v31 = vld [vmem:[#allocation5_spill] sm:$0xff] }
 0xb18   :  { %5193 = vmatprep.subr.mxu1 %v3443_v20  ;;  %v3416_v0 = vmax.f32 %v3258_v46, 0.0 }
 0xb19   :  { %5194 = vmatpush3.msra.mxu1 %v3427_v37 }
 0xb1a   :  { %5195 = vmatprep.subr.mxu1 %v3442_v44 }
 0xb1b   :  { %5196 = vmatpush3.msra.mxu1 %v3426_v40 }
 0xb1c   :  { %5197 = vmatprep.subr.mxu1 %v3441_v16 }
 0xb1d   :  { %5198 = vmatpush3.msra.mxu1 %v3425_v50 }
 0xb1e   :  { %5199 = vmatprep.subr.mxu1 %v3440_v51 }
 0xb1f   :  { %5200 = vmatpush3.msra.mxu1 %v3424_v53 }
 0xb20   :  { %5201 = vmatprep.subr.mxu1 %v3439_v43 }
 0xb21   :  { %5202 = vmatpush3.msra.mxu1 %v3423_v7  ;;  %v9042_v7 = vld [vmem:[#allocation46_spill] sm:$0xff] }
 0xb22   :  { %5203 = vmatprep.subr.mxu1 %v3438_v63 }
 0xb23   :  { %5204 = vmatpush3.msra.mxu1 %v3422_v57 }
 0xb24   :  { %5205 = vmatprep.subr.mxu1 %v3437_v17 }
 0xb25   :  { %5206 = vmatpush3.msra.mxu1 %v3421_v10 }
 0xb26   :  { %5207 = vmatprep.subr.mxu1 %v3436_v60 }
 0xb27   :  { %5208 = vmatpush3.msra.mxu1 %v3420_v14 }
 0xb28   :  { %5209 = vmatprep.subr.mxu1 %v3435_v2 }
 0xb29   :  { %5210 = vmatpush3.msra.mxu1 %v3419_v62 }
 0xb2a   :  { %5211 = vmatprep.subr.mxu1 %v3434_v58 }
 0xb2b   :  { %5212 = vmatpush3.msra.mxu1 %v3418_v6 }
 0xb2c   :  { %5213 = vmatprep.subr.mxu1 %v3433_v22 }
 0xb2d   :  { %5214 = vmatpush3.msra.mxu1 %v3417_v29 }
 0xb2e   :  { %5215 = vmatprep.subr.mxu1 %v3432_v47 }
 0xb2f   :  { %5216 = vmatpush3.msra.mxu1 %v3416_v0 }
 0xb30   :  { %3545 = vmatmul.mubr.f32.vlgmr.msra.gmra.mxu1 %v3448_v25 }
 0xb31   :  { %3549 = vmatprep.mubr.f32.mxu1 %v3451_v13 }
 0xb34   :  { %3550 = vmatmul.mubr.f32.gmra.mxu1 %v3450_v52 }
 0xb35   :  { %3554 = vmatprep.mubr.f32.mxu1 %v3453_v35 }
 0xb38   :  { %3555 = vmatmul.mubr.f32.gmra.mxu1 %v3452_v48 }
 0xb39   :  { %3559 = vmatprep.mubr.f32.mxu1 %v3455_v38 }
 0xb3c   :  { %3560 = vmatmul.mubr.f32.gmra.mxu1 %v3454_v9 }
 0xb3d   :  { %5627 = vmatprep.mubr.msk.f32.mxu1 %vm123_vm0, %v3674_v21 }
 0xbf0   :  { %v5217_v26 = vpop.f32.mrf.mxu1 }
 0xbf2   :  { %v5218_v4 = vpop.f32.mrf.mxu1 }
 0xbf3   :  { %v5219_v5 = vadd.f32 %v5218_v4, %v5217_v26 }
 0xbf4   :  { %v5220_v18 = vpop.f32.mrf.mxu1 }
 0xbf5   :  { %v3547_v20 = vadd.f32 %v5219_v5, %v9036_v49 }
 0xbf6   :  { %v5221_v27 = vpop.f32.mrf.mxu1 }
 0xbf7   :  { %v5222_v15 = vadd.f32 %v5221_v27, %v5220_v18  ;;  %v3565_v16 = vadd.f32 %v3547_v20, %v9039_v55  ;;  %v9045_v20 = vld [vmem:[#allocation49_spill] sm:$0xff]  ;;  %v9047_v55 = vld [vmem:[#allocation50_spill] sm:$0xff] }
 0xbf8   :  { %v5223_v19 = vpop.f32.mrf.mxu1 }
 0xbf9   :  { %v3552_v42 = vadd.f32 %v5222_v15, %v9037_v23  ;;  %v3577_v43 = vsel %vm221_vm2, %v3565_v16, 0.0 }
 0xbfa   :  { %v5224_v37 = vpop.f32.mrf.mxu1 }
 0xbfb   :  { %v3566_v44 = vadd.f32 %v3552_v42, %v9038_v45  ;;  %v5225_v54 = vadd.f32 %v5224_v37, %v5223_v19  ;;  %v9044_v19 = vld [vmem:[#allocation41_spill] sm:$0xff] }
 0xbfc   :  { %v5226_v40 = vpop.f32.mrf.mxu1  ;;  %v9046_v42 = vld [vmem:[#allocation45_spill] sm:$0xff] }
 0xbfd   :  { %v3557_v50 = vadd.f32 %v5225_v54, %v9040_v8  ;;  %v3578_v51 = vsel %vm221_vm2, %v3566_v44, 0.0  ;;  %v9048_v8 = vld [vmem:[#allocation53_spill] sm:$0xff] }
 0xbfe   :  { %v5227_v30 = vpop.f32.mrf.mxu1  ;;  %v3579_v63 = vadd.f32 %v3578_v51, %v3577_v43  ;;  %v9050_v43 = vld [vmem:[#allocation58_spill] sm:$0xff] }
 0xbff   :  { %v3567_v53 = vadd.f32 %v3557_v50, %v9041_v28  ;;  %v5228_v33 = vadd.f32 %v5227_v30, %v5226_v40  ;;  %v9049_v30 = vld [vmem:[#allocation54_spill] sm:$0xff] }
 0xc01   :  { %v3580_v41 = vsel %vm221_vm2, %v3567_v53, 0.0  ;;  %v3562_v11 = vadd.f32 %v5228_v33, %v9042_v7  ;;  %v5728_v7 = vld [vmem:[%s8594_s27 + $0x30] sm:$0xff] }
 0xc02   :  { %v3581_v12 = vadd.f32 %v3580_v41, %v3579_v63  ;;  %v9051_v63 = vld [vmem:[#allocation62_spill] sm:$0xff] }
 0xc03   :  { %v3568_v57 = vadd.f32 %v3562_v11, %v9043_v31 }
 0xc05   :  { %v3582_v17 = vsel %vm221_vm2, %v3568_v57, 0.0 }
 0xc06   :  { %v3583_v39 = vadd.f32 %v3582_v17, %v3581_v12  ;;  %v5730_v17 = vld [vmem:[%s8594_s27 + $0x20] sm:$0xff] }
 0xc08   :  { %v3584_v10 = vrot.slane %v3583_v39, 4 }
 0xc0a   :  { %v3585_v32 = vadd.f32 %v3584_v10, %v3583_v39  ;;  %v3675_v10 = vld [vmem:[%s8500_s14 + $0x8] sm:$0xff] }
 0xc0c   :  { %v3586_v60 = vrot.slane %v3585_v32, 2 }
 0xc0e   :  { %v3587_v56 = vadd.f32 %v3586_v60, %v3585_v32  ;;  %v3676_v32 = vld [vmem:[%s8500_s14 + $0x10] sm:$0xff]  ;;  %v3677_v60 = vld [vmem:[%s8500_s14 + $0x18] sm:$0xff] }
 0xc10   :  { %v3588_v14 = vrot.slane %v3587_v56, 1 }
 0xc12   :  { %v3589_v1 = vadd.f32 %v3588_v14, %v3587_v56  ;;  %v3912_v56 = vld [vmem:[%s8885_s19] sm:$0xff] }
 0xc14   :  { %v3590_v2 = vmul.f32 0.03125, %v3589_v1 }
 0xc16   :  { %v3591_v61 = vsub.f32 %v3565_v16, %v3590_v2  ;;  %v3592_v62 = vsub.f32 %v3566_v44, %v3590_v2  ;;  %v3593_v3 = vsub.f32 %v3567_v53, %v3590_v2  ;;  %v3594_v24 = vsub.f32 %v3568_v57, %v3590_v2  ;;  %v5727_v53 = vld [vmem:[%s8594_s27 + $0x38] sm:$0xff]  ;;  %v5729_v57 = vld [vmem:[%s8594_s27 + $0x28] sm:$0xff] }
 0xc17   :  { %v9052_v2 = vld [vmem:[#allocation66_spill] sm:$0xff] }
 0xc18   :  { %v3595_v34 = vmul.f32 %v3591_v61, %v3591_v61  ;;  %v3596_v58 = vmul.f32 %v3592_v62, %v3592_v62  ;;  %v3597_v36 = vmul.f32 %v3593_v3, %v3593_v3  ;;  %v3598_v59 = vmul.f32 %v3594_v24, %v3594_v24 }
 0xc19   :  { %v3645_v49 = vmul.f32 %v9044_v19, %v3594_v24  ;;  %v3644_v23 = vmul.f32 %v9045_v20, %v3593_v3  ;;  %v3643_v37 = vmul.f32 %v9046_v42, %v3592_v62  ;;  %v3642_v16 = vmul.f32 %v9047_v55, %v3591_v61  ;;  %v9053_v62 = vld [vmem:[#allocation57_spill] sm:$0xff] }
 0xc1a   :  { %v3599_v46 = vsel %vm221_vm2, %v3595_v34, 0.0  ;;  %v3600_v6 = vsel %vm221_vm2, %v3596_v58, 0.0  ;;  %v3602_v29 = vsel %vm221_vm2, %v3597_v36, 0.0  ;;  %v3604_v0 = vsel %vm221_vm2, %v3598_v59, 0.0  ;;  %v9054_v59 = vld [vmem:[#allocation70_spill] sm:$0xff] }
 0xc1b   :  { %v3601_v22 = vadd.f32 %v3600_v6, %v3599_v46  ;;  %v9055_v6 = vld [vmem:[#allocation61_spill] sm:$0xff] }
 0xc1d   :  { %v3603_v47 = vadd.f32 %v3602_v29, %v3601_v22 }
 0xc1f   :  { %v3605_v25 = vadd.f32 %v3604_v0, %v3603_v47 }
 0xc21   :  { %v3606_v13 = vrot.slane %v3605_v25, 4 }
 0xc23   :  { %v3607_v52 = vadd.f32 %v3606_v13, %v3605_v25 }
 0xc25   :  { %v3608_v35 = vrot.slane %v3607_v52, 2 }
 0xc27   :  { %v3609_v48 = vadd.f32 %v3608_v35, %v3607_v52 }
 0xc29   :  { %v3610_v38 = vrot.slane %v3609_v48, 1 }
 0xc2b   :  { %v3611_v9 = vadd.f32 %v3610_v38, %v3609_v48 }
 0xc2d   :  { %v3612_v21 = vmul.f32 0.032258064, %v3611_v9 }
 0xc2f   :  { %5711 = vrsqrt.f32 %v3612_v21  ;;  %vm3615_vm9 = vcmp.eq.f32.partialorder %v3612_v21, inf  ;;  %v3618_v18 = vand.u32 2147483648, %v3612_v21  ;;  %vm3617_vm10 = vcmp.eq.f32.partialorder %v3612_v21, 0.0 }
 0xc3c   :  { %v5712_v26 = vpop.eup %5711 }
 0xc3d   :  { %v3614_v4 = vmul.f32 %v5712_v26, %v3612_v21 }
 0xc3f   :  { %v3616_v5 = vsel %vm3615_vm9, %v3612_v21, %v3614_v4 }
 0xc40   :  { %v3619_v27 = vsel %vm3617_vm10, %v3618_v18, %v3616_v5 }
 0xc41   :  { %v3620_v15 = vadd.f32 1e-06, %v3619_v27 }
 0xc43   :  { %5713 = vrcp.f32 %v3620_v15 }
 0xc50   :  { %v5714_v45 = vpop.eup %5713 }
 0xc51   :  { %v3649_v44 = vmul.f32 %v5714_v45, %v3645_v49  ;;  %v3648_v54 = vmul.f32 %v5714_v45, %v3644_v23  ;;  %v3647_v40 = vmul.f32 %v5714_v45, %v3643_v37  ;;  %v3646_v28 = vmul.f32 %v5714_v45, %v3642_v16 }
 0xc53   :  { %v3673_v50 = vadd.f32 %v9048_v8, %v3649_v44  ;;  %v3672_v51 = vadd.f32 %v9049_v30, %v3648_v54  ;;  %v3671_v41 = vadd.f32 %v9050_v43, %v3647_v40  ;;  %v3670_v31 = vadd.f32 %v9051_v63, %v3646_v28  ;;  %v9056_v63 = vld [vmem:[#allocation74_spill] sm:$0xff] }
 0xc55   :  { %v3681_v33 = vadd.f32 %v5727_v53, %v3673_v50  ;;  %v3680_v11 = vadd.f32 %v5728_v7, %v3672_v51  ;;  %v3679_v12 = vadd.f32 %v5729_v57, %v3671_v41  ;;  %v3678_v39 = vadd.f32 %v5730_v17, %v3670_v31  ;;  %v9057_v57 = vld [vmem:[#allocation65_spill] sm:$0xff] }
 0xc57   :  { %5619 = vmatprep.subr.mxu1 %v3681_v33 }
 0xc58   :  { %5620 = vmatpush3.msra.mxu1 %v3681_v33 }
 0xc59   :  { %5621 = vmatprep.subr.mxu1 %v3680_v11 }
 0xc5a   :  { %5622 = vmatpush3.msra.mxu1 %v3680_v11 }
 0xc5b   :  { %5623 = vmatprep.subr.mxu1 %v3679_v12 }
 0xc5c   :  { %5624 = vmatpush3.msra.mxu1 %v3679_v12 }
 0xc5d   :  { %5625 = vmatprep.subr.mxu1 %v3678_v39 }
 0xc5e   :  { %5626 = vmatpush3.msra.mxu1 %v3678_v39 }
 0xc5f   :  { %5628 = vmatmul.mubr.msk.f32.vlgmr.msra.gmra.mxu1 %vm123_vm0, %v3675_v10 }
 0xc60   :  { %5630 = vmatprep.mubr.msk.f32.mxu1 %vm123_vm0, %v3676_v32  ;;  %v9058_v32 = vld [vmem:[#allocation69_spill] sm:$0xff] }
 0xc63   :  { %5631 = vmatmul.mubr.msk.f32.gmra.mxu1 %vm123_vm0, %v3677_v60 }
 0xc64   :  { %5641 = vmatprep.mubr.msk.f32.mxu1 %vm123_vm0, %v3912_v56  ;;  %v9059_v56 = vld [vmem:[#allocation78_spill] sm:$0xff] }
 0xd1f   :  { %v5629_v14 = vpop.f32.mrf.mxu1 }
 0xd20   :  { %v3794_v61 = vadd.f32 %v5629_v14, %v9052_v2  ;;  %v9060_v2 = vld [vmem:[#allocation73_spill] sm:$0xff] }
 0xd21   :  { %v3788_v1 = vpop.f32.mrf.mxu1 }
 0xd22   :  { %v3789_v3 = vadd.f32 %v3788_v1, %v9053_v62  ;;  %v3816_v36 = vsel %vm221_vm2, %v3794_v61, 0.0  ;;  %v9061_v62 = vld [vmem:[#allocation82_spill] sm:$0xff] }
 0xd23   :  { %v5632_v24 = vpop.f32.mrf.mxu1 }
 0xd24   :  { %v3815_v34 = vsel %vm221_vm2, %v3789_v3, 0.0  ;;  %v3804_v46 = vadd.f32 %v5632_v24, %v9054_v59 }
 0xd25   :  { %v3798_v58 = vpop.f32.mrf.mxu1  ;;  %v3817_v29 = vadd.f32 %v3816_v36, %v3815_v34  ;;  %v9062_v34 = vld [vmem:[#allocation77_spill] sm:$0xff]  ;;  %v9063_v36 = vld [vmem:[#allocation86_spill] sm:$0xff] }
 0xd26   :  { %v3799_v22 = vadd.f32 %v3798_v58, %v9055_v6  ;;  %v3820_v25 = vsel %vm221_vm2, %v3804_v46, 0.0  ;;  %v3914_v6 = vld [vmem:[%s8885_s19 + $0x10] sm:$0xff] }
 0xd28   :  { %v3818_v47 = vsel %vm221_vm2, %v3799_v22, 0.0 }
 0xd29   :  { %v3819_v0 = vadd.f32 %v3818_v47, %v3817_v29  ;;  %v3916_v29 = vld [vmem:[%s8885_s19 + $0x20] sm:$0xff]  ;;  %v3917_v47 = vld [vmem:[%s8885_s19 + $0x28] sm:$0xff] }
 0xd2b   :  { %v3821_v13 = vadd.f32 %v3820_v25, %v3819_v0  ;;  %v3918_v0 = vld [vmem:[%s8885_s19 + $0x30] sm:$0xff]  ;;  %v3919_v25 = vld [vmem:[%s8885_s19 + $0x38] sm:$0xff] }
 0xd2d   :  { %v3822_v52 = vrot.slane %v3821_v13, 4 }
 0xd2f   :  { %v3823_v35 = vadd.f32 %v3822_v52, %v3821_v13  ;;  %v3920_v13 = vld [vmem:[%s8885_s19 + $0x40] sm:$0xff]  ;;  %v3921_v52 = vld [vmem:[%s8885_s19 + $0x48] sm:$0xff] }
 0xd31   :  { %v3824_v48 = vrot.slane %v3823_v35, 2 }
 0xd33   :  { %v3825_v38 = vadd.f32 %v3824_v48, %v3823_v35  ;;  %v3922_v35 = vld [vmem:[%s8885_s19 + $0x50] sm:$0xff]  ;;  %v3923_v48 = vld [vmem:[%s8885_s19 + $0x58] sm:$0xff] }
 0xd35   :  { %v3826_v9 = vrot.slane %v3825_v38, 1 }
 0xd37   :  { %v3827_v21 = vadd.f32 %v3826_v9, %v3825_v38  ;;  %v3924_v38 = vld [vmem:[%s8885_s19 + $0x60] sm:$0xff]  ;;  %v3925_v9 = vld [vmem:[%s8885_s19 + $0x68] sm:$0xff] }
 0xd39   :  { %v3828_v26 = vmul.f32 0.03125, %v3827_v21  ;;  %v3926_v21 = vld [vmem:[%s8885_s19 + $0x70] sm:$0xff] }
 0xd3b   :  { %v3829_v4 = vsub.f32 %v3789_v3, %v3828_v26  ;;  %v3830_v18 = vsub.f32 %v3794_v61, %v3828_v26  ;;  %v3831_v5 = vsub.f32 %v3799_v22, %v3828_v26  ;;  %v3832_v27 = vsub.f32 %v3804_v46, %v3828_v26  ;;  %v3913_v46 = vld [vmem:[%s8885_s19 + $0x8] sm:$0xff]  ;;  %v3915_v22 = vld [vmem:[%s8885_s19 + $0x18] sm:$0xff] }
 0xd3c   :  { %v3927_v26 = vld [vmem:[%s8885_s19 + $0x78] sm:$0xff] }
 0xd3d   :  { %v3833_v15 = vmul.f32 %v3829_v4, %v3829_v4  ;;  %v3834_v19 = vmul.f32 %v3830_v18, %v3830_v18  ;;  %v3835_v49 = vmul.f32 %v3831_v5, %v3831_v5  ;;  %v3836_v20 = vmul.f32 %v3832_v27, %v3832_v27 }
 0xd3e   :  { %v3882_v31 = vmul.f32 %v9056_v63, %v3831_v5  ;;  %v3883_v12 = vmul.f32 %v9057_v57, %v3832_v27  ;;  %v3881_v60 = vmul.f32 %v9058_v32, %v3830_v18  ;;  %v3880_v61 = vmul.f32 %v9060_v2, %v3829_v4  ;;  %v3928_v4 = vld [vmem:[%s8885_s19 + $0x80] sm:$0xff]  ;;  %v3929_v18 = vld [vmem:[%s8885_s19 + $0x88] sm:$0xff]  ;;  %v3930_v5 = vld [vmem:[%s8885_s19 + $0x90] sm:$0xff] }
 0xd3f   :  { %v3837_v23 = vsel %vm221_vm2, %v3833_v15, 0.0  ;;  %v3838_v42 = vsel %vm221_vm2, %v3834_v19, 0.0  ;;  %v3840_v45 = vsel %vm221_vm2, %v3835_v49, 0.0  ;;  %v3842_v54 = vsel %vm221_vm2, %v3836_v20, 0.0  ;;  %v3931_v27 = vld [vmem:[%s8885_s19 + $0x98] sm:$0xff]  ;;  %v3932_v15 = vld [vmem:[%s8885_s19 + $0xa0] sm:$0xff] }
 0xd40   :  { %v3839_v37 = vadd.f32 %v3838_v42, %v3837_v23  ;;  %v3933_v19 = vld [vmem:[%s8885_s19 + $0xa8] sm:$0xff]  ;;  %v3934_v49 = vld [vmem:[%s8885_s19 + $0xb0] sm:$0xff]  ;;  %v3935_v20 = vld [vmem:[%s8885_s19 + $0xb8] sm:$0xff] }
 0xd41   :  { %v3936_v23 = vld [vmem:[%s8885_s19 + $0xc0] sm:$0xff]  ;;  %v3937_v42 = vld [vmem:[%s8885_s19 + $0xc8] sm:$0xff] }
 0xd42   :  { %v3841_v44 = vadd.f32 %v3840_v45, %v3839_v37  ;;  %v3938_v37 = vld [vmem:[%s8885_s19 + $0xd0] sm:$0xff]  ;;  %v3939_v45 = vld [vmem:[%s8885_s19 + $0xd8] sm:$0xff] }
 0xd44   :  { %v3843_v40 = vadd.f32 %v3842_v54, %v3841_v44  ;;  %v3940_v44 = vld [vmem:[%s8885_s19 + $0xe0] sm:$0xff]  ;;  %v3941_v54 = vld [vmem:[%s8885_s19 + $0xe8] sm:$0xff] }
 0xd46   :  { %v3844_v55 = vrot.slane %v3843_v40, 4 }
 0xd48   :  { %v3845_v16 = vadd.f32 %v3844_v55, %v3843_v40  ;;  %v3942_v40 = vld [vmem:[%s8885_s19 + $0xf0] sm:$0xff]  ;;  %v3943_v55 = vld [vmem:[%s8885_s19 + $0xf8] sm:$0xff] }
 0xd4a   :  { %v3846_v8 = vrot.slane %v3845_v16, 2 }
 0xd4c   :  { %v3847_v50 = vadd.f32 %v3846_v8, %v3845_v16  ;;  %v4490_v16 = vld [vmem:[%s8506_s20 + $0x8] sm:$0xff] }
 0xd4d   :  { %4585 = vmatprep.mubr.f32.mxu0 %v4490_v16 }
 0xd4e   :  { %v3848_v30 = vrot.slane %v3847_v50, 1 }
 0xd50   :  { %v3849_v51 = vadd.f32 %v3848_v30, %v3847_v50 }
 0xd52   :  { %v3850_v28 = vmul.f32 0.032258064, %v3849_v51 }
 0xd54   :  { %5715 = vrsqrt.f32 %v3850_v28  ;;  %vm3853_vm11 = vcmp.eq.f32.partialorder %v3850_v28, inf  ;;  %v3856_v43 = vand.u32 2147483648, %v3850_v28  ;;  %vm3855_vm12 = vcmp.eq.f32.partialorder %v3850_v28, 0.0 }
 0xd61   :  { %v5716_v53 = vpop.eup %5715 }
 0xd62   :  { %v3852_v33 = vmul.f32 %v5716_v53, %v3850_v28 }
 0xd64   :  { %v3854_v41 = vsel %vm3853_vm11, %v3850_v28, %v3852_v33 }
 0xd65   :  { %v3857_v7 = vsel %vm3855_vm12, %v3856_v43, %v3854_v41 }
 0xd66   :  { %v3858_v11 = vadd.f32 1e-06, %v3857_v7 }
 0xd68   :  { %5717 = vrcp.f32 %v3858_v11 }
 0xd75   :  { %v5718_v17 = vpop.eup %5717 }
 0xd76   :  { %v3887_v39 = vmul.f32 %v5718_v17, %v3883_v12  ;;  %v3886_v10 = vmul.f32 %v5718_v17, %v3882_v31  ;;  %v3885_v1 = vmul.f32 %v5718_v17, %v3881_v60  ;;  %v3884_v24 = vmul.f32 %v5718_v17, %v3880_v61 }
 0xd78   :  { %v8220_v14 = vadd.f32 %v9059_v56, %v3887_v39  ;;  %v8225_v3 = vadd.f32 %v9061_v62, %v3886_v10  ;;  %v8230_v58 = vadd.f32 %v9062_v34, %v3885_v1  ;;  %v8235_v59 = vadd.f32 %v9063_v36, %v3884_v24 }
 0xd7a   :  { %5633 = vmatprep.subr.mxu1 %v8220_v14 }
 0xd7b   :  { %5634 = vmatpush3.msra.mxu1 %v8220_v14 }
 0xd7c   :  { %5635 = vmatprep.subr.mxu1 %v8225_v3 }
 0xd7d   :  { %5636 = vmatpush3.msra.mxu1 %v8225_v3 }
 0xd7e   :  { %5637 = vmatprep.subr.mxu1 %v8230_v58 }
 0xd7f   :  { %5638 = vmatpush3.msra.mxu1 %v8230_v58 }
 0xd80   :  { %5639 = vmatprep.subr.mxu1 %v8235_v59 }
 0xd81   :  { %5640 = vmatpush3.msra.mxu1 %v8235_v59 }
 0xd82   :  { %5642 = vmatmul.mubr.msk.f32.vlgmr.msra.gmra.mxu1 %vm123_vm0, %v3913_v46 }
 0xd83   :  { %5644 = vmatprep.mubr.msk.f32.mxu1 %vm123_vm0, %v3914_v6 }
 0xd86   :  { %5645 = vmatmul.mubr.msk.f32.gmra.mxu1 %vm123_vm0, %v3915_v22  ;;  %v9064_v22 = vld [vmem:[#allocation90_spill] sm:$0xff] }
 0xd87   :  { %5647 = vmatprep.mubr.msk.f32.mxu1 %vm123_vm0, %v3916_v29 }
 0xd8a   :  { %5648 = vmatmul.mubr.msk.f32.gmra.mxu1 %vm123_vm0, %v3917_v47 }
 0xd8b   :  { %5650 = vmatprep.mubr.msk.f32.mxu1 %vm123_vm0, %v3918_v0  ;;  %v9065_v0 = vld [vmem:[#allocation81_spill] sm:$0xff] }
 0xd8e   :  { %5651 = vmatmul.mubr.msk.f32.gmra.mxu1 %vm123_vm0, %v3919_v25 }
 0xd8f   :  { %5653 = vmatprep.mubr.msk.f32.mxu1 %vm123_vm0, %v3920_v13  ;;  %v9066_v13 = vld [vmem:[#allocation94_spill] sm:$0xff] }
 0xd92   :  { %5654 = vmatmul.mubr.msk.f32.gmra.mxu1 %vm123_vm0, %v3921_v52 }
 0xd93   :  { %5656 = vmatprep.mubr.msk.f32.mxu1 %vm123_vm0, %v3922_v35 }
 0xd96   :  { %5657 = vmatmul.mubr.msk.f32.gmra.mxu1 %vm123_vm0, %v3923_v48  ;;  %v9067_v48 = vld [vmem:[#allocation89_spill] sm:$0xff] }
 0xd97   :  { %5659 = vmatprep.mubr.msk.f32.mxu1 %vm123_vm0, %v3924_v38 }
 0xd9a   :  { %5660 = vmatmul.mubr.msk.f32.gmra.mxu1 %vm123_vm0, %v3925_v9 }
 0xd9b   :  { %5662 = vmatprep.mubr.msk.f32.mxu1 %vm123_vm0, %v3926_v21  ;;  %v9068_v21 = vld [vmem:[#allocation85_spill] sm:$0xff] }
 0xd9e   :  { %5663 = vmatmul.mubr.msk.f32.gmra.mxu1 %vm123_vm0, %v3927_v26 }
 0xd9f   :  { %5665 = vmatprep.mubr.msk.f32.mxu1 %vm123_vm0, %v3928_v4  ;;  %v9069_v4 = vld [vmem:[#allocation95_spill] sm:$0xff] }
 0xda2   :  { %5666 = vmatmul.mubr.msk.f32.gmra.mxu1 %vm123_vm0, %v3929_v18 }
 0xda3   :  { %5668 = vmatprep.mubr.msk.f32.mxu1 %vm123_vm0, %v3930_v5 }
 0xda6   :  { %5669 = vmatmul.mubr.msk.f32.gmra.mxu1 %vm123_vm0, %v3931_v27  ;;  %v9070_v27 = vld [vmem:[#allocation93_spill] sm:$0xff] }
 0xda7   :  { %5671 = vmatprep.mubr.msk.f32.mxu1 %vm123_vm0, %v3932_v15 }
 0xdaa   :  { %5672 = vmatmul.mubr.msk.f32.gmra.mxu1 %vm123_vm0, %v3933_v19 }
 0xdab   :  { %5674 = vmatprep.mubr.msk.f32.mxu1 %vm123_vm0, %v3934_v49  ;;  %v9071_v49 = vld [vmem:[#allocation97_spill] sm:$0xff] }
 0xdae   :  { %5675 = vmatmul.mubr.msk.f32.gmra.mxu1 %vm123_vm0, %v3935_v20 }
 0xdaf   :  { %5677 = vmatprep.mubr.msk.f32.mxu1 %vm123_vm0, %v3936_v23 }
 0xdb2   :  { %5678 = vmatmul.mubr.msk.f32.gmra.mxu1 %vm123_vm0, %v3937_v42  ;;  %v9072_v42 = vld [vmem:[#allocation30_spill] sm:$0xff] }
 0xdb3   :  { %5680 = vmatprep.mubr.msk.f32.mxu1 %vm123_vm0, %v3938_v37 }
 0xdb6   :  { %5681 = vmatmul.mubr.msk.f32.gmra.mxu1 %vm123_vm0, %v3939_v45 }
 0xdb7   :  { %5683 = vmatprep.mubr.msk.f32.mxu1 %vm123_vm0, %v3940_v44  ;;  %v9073_v44 = vld [vmem:[#allocation99_spill] sm:$0xff] }
 0xdba   :  { %5684 = vmatmul.mubr.msk.f32.gmra.mxu1 %vm123_vm0, %v3941_v54 }
 0xdbb   :  { %5686 = vmatprep.mubr.msk.f32.mxu1 %vm123_vm0, %v3942_v40 }
 0xdbe   :  { %5687 = vmatmul.mubr.msk.f32.gmra.mxu1 %vm123_vm0, %v3943_v55  ;;  %v9074_v55 = vld [vmem:[#allocation96_spill] sm:$0xff] }
 0xe42   :  { %v8367_v8 = vpop.f32.mrf.mxu1 }
 0xe44   :  { %v8369_v50 = vpop.f32.mrf.mxu1 }
 0xe46   :  { %v8371_v30 = vpop.f32.mrf.mxu1 }
 0xe48   :  { %v8373_v51 = vpop.f32.mrf.mxu1 }
 0xe4a   :  { %v8375_v28 = vpop.f32.mrf.mxu1 }
 0xe4c   :  { %v8377_v53 = vpop.f32.mrf.mxu1 }
 0xe4e   :  { %v8379_v33 = vpop.f32.mrf.mxu1 }
 0xe50   :  { %v8381_v43 = vpop.f32.mrf.mxu1 }
 0xe52   :  { %v5655_v41 = vpop.f32.mrf.mxu1 }
 0xe54   :  { %v4338_v7 = vpop.f32.mrf.mxu1 }
 0xe56   :  { %v5658_v11 = vpop.f32.mrf.mxu1 }
 0xe57   :  { %v4354_v54 = vadd.f32 %v5658_v11, %v9073_v44 }
 0xe58   :  { %v4348_v63 = vpop.f32.mrf.mxu1 }
 0xe5a   :  { %v5661_v31 = vpop.f32.mrf.mxu1 }
 0xe5b   :  { %v4364_v18 = vadd.f32 %v5661_v31, %v9069_v4 }
 0xe5c   :  { %v4358_v57 = vpop.f32.mrf.mxu1 }
 0xe5d   :  { %v4359_v20 = vadd.f32 %v4358_v57, %v9071_v49  ;;  %v4470_v40 = vmax.f32 %v4364_v18, 0.0 }
 0xe5e   :  { %v5664_v12 = vpop.f32.mrf.mxu1 }
 0xe5f   :  { %v4374_v29 = vadd.f32 %v5664_v12, %v9064_v22  ;;  %v9075_v12 = vld [vmem:[#allocation98_spill] sm:$0xff] }
 0xe60   :  { %v4368_v17 = vpop.f32.mrf.mxu1 }
 0xe61   :  { %v4369_v52 = vadd.f32 %v4368_v17, %v9066_v13  ;;  %v4472_v5 = vmax.f32 %v4374_v29, 0.0  ;;  %v4349_v17 = vadd.f32 %v4348_v63, %v9075_v12  ;;  %v9077_v29 = vld [vmem:[#allocation26_spill] sm:$0xff]  ;;  %v9079_v13 = vld [vmem:[#allocation29_spill] sm:$0xff] }
 0xe62   :  { %v8383_v39 = vpop.f32.mrf.mxu1 }
 0xe63   :  { %v4471_v23 = vmax.f32 %v4369_v52, 0.0  ;;  %v4467_v52 = vmax.f32 %v4349_v17, 0.0  ;;  %v9093_v17 = vld [vmem:[#allocation115_spill] sm:$0xff] }
 0xe64   :  { %v8385_v10 = vpop.f32.mrf.mxu1 }
 0xe66   :  { %v8387_v32 = vpop.f32.mrf.mxu1 }
 0xe68   :  { %v8389_v60 = vpop.f32.mrf.mxu1 }
 0xe6a   :  { %v5673_v56 = vpop.f32.mrf.mxu1 }
 0xe6c   :  { %v8391_v1 = vpop.f32.mrf.mxu1 }
 0xe6e   :  { %v5676_v2 = vpop.f32.mrf.mxu1 }
 0xe70   :  { %v4408_v61 = vpop.f32.mrf.mxu1 }
 0xe72   :  { %v5679_v62 = vpop.f32.mrf.mxu1 }
 0xe74   :  { %v4418_v24 = vpop.f32.mrf.mxu1 }
 0xe76   :  { %v5682_v34 = vpop.f32.mrf.mxu1 }
 0xe77   :  { %v4434_v37 = vadd.f32 %v5682_v34, %v9072_v42  ;;  %v4344_v34 = vadd.f32 %v5655_v41, %v9077_v29  ;;  %v9082_v41 = vld [vmem:[#allocation102_spill] sm:$0xff]  ;;  %v9088_v42 = vld [vmem:[#allocation107_spill] sm:$0xff] }
 0xe78   :  { %v4428_v36 = vpop.f32.mrf.mxu1 }
 0xe79   :  { %v4429_v16 = vadd.f32 %v4428_v36, %v9074_v55  ;;  %v4484_v22 = vmax.f32 %v4434_v37, 0.0  ;;  %v4339_v36 = vadd.f32 %v4338_v7, %v9079_v13  ;;  %v9084_v7 = vld [vmem:[#allocation25_spill] sm:$0xff]  ;;  %v4496_v13 = vld [vmem:[%s8506_s20 + $0x38] sm:$0xff] }
 0xe7a   :  { %v5685_v46 = vpop.f32.mrf.mxu1  ;;  %v9091_v55 = vld [vmem:[#allocation113_spill] sm:$0xff] }
 0xe7b   :  { %v4444_v38 = vadd.f32 %v5685_v46, %v9067_v48  ;;  %v4469_v46 = vmax.f32 %v4359_v20, 0.0  ;;  %v4465_v18 = vmax.f32 %v4339_v36, 0.0  ;;  %v9087_v20 = vld [vmem:[#allocation108_spill] sm:$0xff]  ;;  %v4495_v36 = vld [vmem:[%s8506_s20 + $0x30] sm:$0xff] }
 0xe7c   :  { %v4438_v6 = vpop.f32.mrf.mxu1 }
 0xe7d   :  { %v4439_v15 = vadd.f32 %v4438_v6, %v9070_v27  ;;  %v4486_v45 = vmax.f32 %v4444_v38, 0.0  ;;  %v9076_v6 = vld [vmem:[#allocation101_spill] sm:$0xff]  ;;  %v9081_v38 = vld [vmem:[#allocation92_spill] sm:$0xff] }
 0xe7e   :  { %v5688_v47 = vpop.f32.mrf.mxu1  ;;  %v4424_v57 = vadd.f32 %v5679_v62, %v9076_v6  ;;  %v4334_v62 = vadd.f32 %v8379_v33, %v9081_v38  ;;  %v9086_v33 = vld [vmem:[#allocation105_spill] sm:$0xff]  ;;  %v9094_v6 = vld [vmem:[#allocation112_spill] sm:$0xff] }
 0xe7f   :  { %v4454_v25 = vadd.f32 %v5688_v47, %v9065_v0  ;;  %v4485_v31 = vmax.f32 %v4439_v15, 0.0  ;;  %v4468_v47 = vmax.f32 %v4354_v54, 0.0  ;;  %v9078_v0 = vld [vmem:[#allocation100_spill] sm:$0xff]  ;;  %v4399_v49 = vadd.f32 %v8391_v1, %v9086_v33  ;;  %v9090_v54 = vld [vmem:[#allocation109_spill] sm:$0xff] }
 0xe80   :  { %v4448_v35 = vpop.f32.mrf.mxu1  ;;  %v4419_v11 = vadd.f32 %v4418_v24, %v9078_v0  ;;  %v4482_v48 = vmax.f32 %v4424_v57, 0.0  ;;  %v9083_v24 = vld [vmem:[#allocation104_spill] sm:$0xff]  ;;  %v4389_v1 = vadd.f32 %v8389_v60, %v9090_v54  ;;  %v4379_v60 = vadd.f32 %v8385_v10, %v9094_v6 }
 0xe81   :  { %v4488_v9 = vmax.f32 %v4454_v25, 0.0  ;;  %v4449_v26 = vadd.f32 %v4448_v35, %v9068_v21  ;;  %v4483_v25 = vmax.f32 %v4429_v16, 0.0  ;;  %v9080_v35 = vld [vmem:[#allocation103_spill] sm:$0xff]  ;;  %v4409_v21 = vadd.f32 %v4408_v61, %v9082_v41  ;;  %v4492_v10 = vld [vmem:[%s8506_s20 + $0x18] sm:$0xff] }
 0xe82   :  { %v4414_v63 = vadd.f32 %v5676_v2, %v9080_v35  ;;  %v4329_v4 = vadd.f32 %v8381_v43, %v9083_v24  ;;  %v9085_v2 = vld [vmem:[#allocation106_spill] sm:$0xff]  ;;  %v4475_v57 = vmax.f32 %v4389_v1, 0.0  ;;  %v9096_v41 = vld [vmem:[#allocation116_spill] sm:$0xff] }
 0xe83   :  { %v4487_v19 = vmax.f32 %v4449_v26, 0.0  ;;  %5273 = vmatprep.subr.mxu0 %v4488_v9  ;;  %v4466_v9 = vmax.f32 %v4344_v34, 0.0  ;;  %v4481_v26 = vmax.f32 %v4419_v11, 0.0  ;;  %v4324_v15 = vadd.f32 %v8375_v28, %v9085_v2  ;;  %v4494_v11 = vld [vmem:[%s8506_s20 + $0x28] sm:$0xff] }
 0xe84   :  { %5274 = vmatpush3.msra.mxu0 %v4472_v5  ;;  %v4404_v5 = vadd.f32 %v5673_v56, %v9084_v7  ;;  %v4480_v27 = vmax.f32 %v4414_v63, 0.0  ;;  %v4479_v61 = vmax.f32 %v4409_v21, 0.0  ;;  %v4463_v43 = vmax.f32 %v4329_v4, 0.0  ;;  %v9098_v2 = vld [vmem:[#allocation118_spill] sm:$0xff] }
 0xe85   :  { %5275 = vmatprep.subr.mxu0 %v4487_v19  ;;  %v4464_v19 = vmax.f32 %v4334_v62, 0.0  ;;  %v4394_v56 = vadd.f32 %v8387_v32, %v9088_v42  ;;  %v4462_v44 = vmax.f32 %v4324_v15, 0.0 }
 0xe86   :  { %5276 = vmatpush3.msra.mxu0 %v4471_v23  ;;  %v4319_v23 = vadd.f32 %v8377_v53, %v9087_v20  ;;  %v4478_v37 = vmax.f32 %v4404_v5, 0.0  ;;  %v4309_v53 = vadd.f32 %v8373_v51, %v9091_v55 }
 0xe87   :  { %5277 = vmatprep.subr.mxu0 %v4486_v45  ;;  %v9089_v45 = vld [vmem:[#allocation111_spill] sm:$0xff]  ;;  %v4476_v12 = vmax.f32 %v4394_v56, 0.0 }
 0xe88   :  { %5278 = vmatpush3.msra.mxu0 %v4470_v40  ;;  %v4314_v28 = vadd.f32 %v8371_v30, %v9089_v45  ;;  %v4477_v40 = vmax.f32 %v4399_v49, 0.0  ;;  %v4461_v16 = vmax.f32 %v4319_v23, 0.0  ;;  %v4304_v30 = vadd.f32 %v8367_v8, %v9093_v17  ;;  %v4489_v8 = vld [vmem:[%s8506_s20] sm:$0xff] }
 0xe89   :  { %5279 = vmatprep.subr.mxu0 %v4485_v31  ;;  %v9092_v31 = vld [vmem:[#allocation110_spill] sm:$0xff]  ;;  %v4459_v29 = vmax.f32 %v4309_v53, 0.0 }
 0xe8a   :  { %5280 = vmatpush3.msra.mxu0 %v4469_v46  ;;  %v4384_v32 = vadd.f32 %v8383_v39, %v9092_v31  ;;  %v4460_v46 = vmax.f32 %v4314_v28, 0.0  ;;  %v4458_v39 = vmax.f32 %v4304_v30, 0.0 }
 0xe8b   :  { %5281 = vmatprep.subr.mxu0 %v4484_v22  ;;  %v9095_v22 = vld [vmem:[#allocation114_spill] sm:$0xff] }
 0xe8c   :  { %5282 = vmatpush3.msra.mxu0 %v4468_v47  ;;  %v4299_v51 = vadd.f32 %v8369_v50, %v9095_v22  ;;  %v4474_v34 = vmax.f32 %v4384_v32, 0.0  ;;  %v4473_v47 = vmax.f32 %v4379_v60, 0.0  ;;  %v4491_v50 = vld [vmem:[%s8506_s20 + $0x10] sm:$0xff] }
 0xe8d   :  { %5283 = vmatprep.subr.mxu0 %v4483_v25  ;;  %v4493_v25 = vld [vmem:[%s8506_s20 + $0x20] sm:$0xff]  ;;  %s5754_s20 = smov [#allocation2]  }
 0xe8e   :  { %5284 = vmatpush3.msra.mxu0 %v4467_v52  ;;  %v4457_v0 = vmax.f32 %v4299_v51, 0.0  ;;  %s4725_s25 = sshll.u32 %s5754_s20, 4  ;;  %s4726_s25 = int_to_ptr.vmem [resolvable:$true] %s4725_s25 }
 0xe8f   :  { %5285 = vmatprep.subr.mxu0 %v4482_v48  ;;  %s5731_s12 = scalar_lea.vmem %s4726_s25, 1024  ;;  %p5736_p1 = scmp.lt.s32.totalorder %s4726_s25, %s4726_s25 }
 0xe90   :  { %5286 = vmatpush3.msra.mxu0 %v4466_v9  ;;  %p5732_p0 = scmp.ne.s32.totalorder %s4726_s25, %s5731_s12  ;;  %p5737_p2 = scmp.lt.s32.totalorder %s5731_s12, %s5731_s12 }
 0xe91   :  { %5287 = vmatprep.subr.mxu0 %v4481_v26  ;;  %v9097_v26 = vld [vmem:[#allocation117_spill] sm:$0xff] }
 0xe92   :  { %5288 = vmatpush3.msra.mxu0 %v4465_v18  ;;  %p5738_p3 = por %p5737_p2, %p5736_p1 }
 0xe93   :  { %5289 = vmatprep.subr.mxu0 %v4480_v27 }
 0xe94   :  { %5290 = vmatpush3.msra.mxu0 %v4464_v19  ;;  %p5739_p4 = pnand %p5738_p3, %p5732_p0 }
 0xe95   :  { %5291 = vmatprep.subr.mxu0 %v4479_v61 }
 0xe96   :  { %5292 = vmatpush3.msra.mxu0 %v4463_v43  ;;  %v9099_v43 = vld [vmem:[#allocation121_spill] sm:$0xff] }
 0xe97   :  { %5293 = vmatprep.subr.mxu0 %v4478_v37 }
 0xe98   :  { %5294 = vmatpush3.msra.mxu0 %v4462_v44 }
 0xe99   :  { %5295 = vmatprep.subr.mxu0 %v4477_v40 }
 0xe9a   :  { %5296 = vmatpush3.msra.mxu0 %v4461_v16 }
 0xe9b   :  { %5297 = vmatprep.subr.mxu0 %v4476_v12 }
 0xe9c   :  { %5298 = vmatpush3.msra.mxu0 %v4460_v46 }
 0xe9d   :  { %5299 = vmatprep.subr.mxu0 %v4475_v57 }
 0xe9e   :  { %5300 = vmatpush3.msra.mxu0 %v4459_v29 }
 0xe9f   :  { %5301 = vmatprep.subr.mxu0 %v4474_v34 }
 0xea0   :  { %5302 = vmatpush3.msra.mxu0 %v4458_v39 }
 0xea1   :  { %5303 = vmatprep.subr.mxu0 %v4473_v47 }
 0xea2   :  { %5304 = vmatpush3.msra.mxu0 %v4457_v0 }
 0xea3   :  { %4586 = vmatmul.mubr.f32.vlgmr.msra.gmra.mxu0 %v4489_v8 }
 0xea4   :  { %4590 = vmatprep.mubr.f32.mxu0 %v4492_v10 }
 0xea7   :  { %4591 = vmatmul.mubr.f32.gmra.mxu0 %v4491_v50 }
 0xea8   :  { %4595 = vmatprep.mubr.f32.mxu0 %v4494_v11 }
 0xeab   :  { %4596 = vmatmul.mubr.f32.gmra.mxu0 %v4493_v25 }
 0xeac   :  { %4600 = vmatprep.mubr.f32.mxu0 %v4496_v13 }
 0xeaf   :  { %4601 = vmatmul.mubr.f32.gmra.mxu0 %v4495_v36 }
 0xf63   :  { %v5305_v52 = vpop.f32.mrf.mxu0 }
 0xf65   :  { %v5306_v35 = vpop.f32.mrf.mxu0 }
 0xf66   :  { %v5307_v48 = vadd.f32 %v5306_v35, %v5305_v52 }
 0xf67   :  { %v5308_v63 = vpop.f32.mrf.mxu0 }
 0xf68   :  { %v4588_v21 = vadd.f32 %v5307_v48, %v9096_v41  ;;  %v4694_v48 = vpop.permute.xlu0 %4693 }
 0xf69   :  { %v5309_v38 = vpop.f32.mrf.mxu0 }
 0xf6a   :  { %v5310_v62 = vadd.f32 %v5309_v38, %v5308_v63  ;;  %v4606_v27 = vadd.f32 %v4588_v21, %v8235_v59  ;;  %v4699_v63 = vpop.permute.xlu1 %4698  ;;  %v9100_v38 = vld [vmem:[#allocation120_spill] sm:$0xff]  ;;  %v9102_v21 = vld [vmem:[#allocation122_spill] sm:$0xff] }
 0xf6b   :  { %v5311_v9 = vpop.f32.mrf.mxu0 }
 0xf6c   :  { %v4593_v24 = vadd.f32 %v5310_v62, %v9097_v26  ;;  %v4618_v20 = vsel %vm221_vm2, %v4606_v27, 0.0 }
 0xf6d   :  { %v5312_v4 = vpop.f32.mrf.mxu0 }
 0xf6e   :  { %v4607_v18 = vadd.f32 %v4593_v24, %v8230_v58  ;;  %v5313_v7 = vadd.f32 %v5312_v4, %v5311_v9  ;;  %v9101_v9 = vld [vmem:[#allocation119_spill] sm:$0xff] }
 0xf6f   :  { %v5314_v5 = vpop.f32.mrf.mxu0  ;;  %v9103_v24 = vld [vmem:[#allocation123_spill] sm:$0xff] }
 0xf70   :  { %v4598_v15 = vadd.f32 %v5313_v7, %v9098_v2  ;;  %v4619_v33 = vsel %vm221_vm2, %v4607_v18, 0.0 }
 0xf71   :  { %v5315_v19 = vpop.f32.mrf.mxu0  ;;  %v4620_v56 = vadd.f32 %v4619_v33, %v4618_v20 }
 0xf72   :  { %v4608_v49 = vadd.f32 %v4598_v15, %v8225_v3  ;;  %v5316_v61 = vadd.f32 %v5315_v19, %v5314_v5  ;;  %v4709_v15 = vpop.permute.xlu1 %4708  ;;  %v4704_v19 = vpop.permute.xlu0 %4703 }
 0xf74   :  { %v4621_v23 = vsel %vm221_vm2, %v4608_v49, 0.0  ;;  %v4603_v42 = vadd.f32 %v5316_v61, %v9099_v43 }
 0xf75   :  { %v4622_v37 = vadd.f32 %v4621_v23, %v4620_v56 }
 0xf76   :  { %v4609_v58 = vadd.f32 %v4603_v42, %v8220_v14 }
 0xf78   :  { %v4623_v59 = vsel %vm221_vm2, %v4609_v58, 0.0 }
 0xf79   :  { %v4624_v45 = vadd.f32 %v4623_v59, %v4622_v37 }
 0xf7b   :  { %v4625_v28 = vrot.slane %v4624_v45, 4 }
 0xf7d   :  { %v4626_v44 = vadd.f32 %v4625_v28, %v4624_v45 }
 0xf7f   :  { %v4627_v54 = vrot.slane %v4626_v44, 2 }
 0xf81   :  { %v4628_v1 = vadd.f32 %v4627_v54, %v4626_v44 }
 0xf83   :  { %v4629_v40 = vrot.slane %v4628_v1, 1 }
 0xf85   :  { %v4630_v3 = vadd.f32 %v4629_v40, %v4628_v1 }
 0xf87   :  { %v4631_v55 = vmul.f32 0.03125, %v4630_v3 }
 0xf89   :  { %v4632_v53 = vsub.f32 %v4606_v27, %v4631_v55  ;;  %v4633_v16 = vsub.f32 %v4607_v18, %v4631_v55  ;;  %v4634_v31 = vsub.f32 %v4608_v49, %v4631_v55  ;;  %v4635_v32 = vsub.f32 %v4609_v58, %v4631_v55 }
 0xf8b   :  { %v4636_v12 = vmul.f32 %v4632_v53, %v4632_v53  ;;  %v4637_v17 = vmul.f32 %v4633_v16, %v4633_v16  ;;  %v4638_v30 = vmul.f32 %v4634_v31, %v4634_v31  ;;  %v4639_v46 = vmul.f32 %v4635_v32, %v4635_v32 }
 0xf8c   :  { %v4683_v62 = vmul.f32 %v9100_v38, %v4632_v53  ;;  %v4684_v41 = vmul.f32 %v9101_v9, %v4633_v16  ;;  %v4685_v26 = vmul.f32 %v9102_v21, %v4634_v31  ;;  %v4686_v4 = vmul.f32 %v9103_v24, %v4635_v32 }
 0xf8d   :  { %v4640_v14 = vsel %vm221_vm2, %v4636_v12, 0.0  ;;  %v4641_v6 = vsel %vm221_vm2, %v4637_v17, 0.0  ;;  %v4643_v57 = vsel %vm221_vm2, %v4638_v30, 0.0  ;;  %v4645_v51 = vsel %vm221_vm2, %v4639_v46, 0.0 }
 0xf8e   :  { %v4642_v60 = vadd.f32 %v4641_v6, %v4640_v14 }
 0xf90   :  { %v4644_v22 = vadd.f32 %v4643_v57, %v4642_v60 }
 0xf92   :  { %v4646_v29 = vadd.f32 %v4645_v51, %v4644_v22 }
 0xf94   :  { %v4647_v34 = vrot.slane %v4646_v29, 4 }
 0xf96   :  { %v4648_v39 = vadd.f32 %v4647_v34, %v4646_v29 }
 0xf98   :  { %v4649_v47 = vrot.slane %v4648_v39, 2 }
 0xf9a   :  { %v4650_v0 = vadd.f32 %v4649_v47, %v4648_v39 }
 0xf9c   :  { %v4651_v8 = vrot.slane %v4650_v0, 1 }
 0xf9e   :  { %v4652_v10 = vadd.f32 %v4651_v8, %v4650_v0 }
 0xfa0   :  { %v4653_v50 = vmul.f32 0.032258064, %v4652_v10 }
 0xfa2   :  { %5719 = vrsqrt.f32 %v4653_v50  ;;  %vm4656_vm13 = vcmp.eq.f32.partialorder %v4653_v50, inf  ;;  %v4659_v13 = vand.u32 2147483648, %v4653_v50  ;;  %vm4658_vm14 = vcmp.eq.f32.partialorder %v4653_v50, 0.0 }
 0xfaf   :  { %v5720_v11 = vpop.eup %5719 }
 0xfb0   :  { %v4655_v25 = vmul.f32 %v5720_v11, %v4653_v50 }
 0xfb2   :  { %v4657_v36 = vsel %vm4656_vm13, %v4653_v50, %v4655_v25 }
 0xfb3   :  { %v4660_v52 = vsel %vm4658_vm14, %v4659_v13, %v4657_v36 }
 0xfb4   :  { %v4661_v35 = vadd.f32 1e-06, %v4660_v52 }
 0xfb6   :  { %5721 = vrcp.f32 %v4661_v35 }
 0xfc3   :  { %v5722_v18 = vpop.eup %5721 }
 0xfc4   :  { %v4687_v7 = vmul.f32 %v5722_v18, %v4683_v62  ;;  %v4688_v5 = vmul.f32 %v5722_v18, %v4684_v41  ;;  %v4689_v27 = vmul.f32 %v5722_v18, %v4685_v26  ;;  %v4690_v2 = vmul.f32 %v5722_v18, %v4686_v4 }
 0xfc6   :  { %v4711_v33 = vadd.f32 %v4694_v48, %v4687_v7  ;;  %v4712_v49 = vadd.f32 %v4699_v63, %v4688_v5  ;;  %v4713_v61 = vadd.f32 %v4704_v19, %v4689_v27  ;;  %v4714_v20 = vadd.f32 %v4709_v15, %v4690_v2 }
 0xfc8   :  { %4716 = vst.msk [vmem:[#allocation2 + $0x20] sm:$0xff] %vm221_vm2, %v4711_v33  ;;  %4717 = vst.msk [vmem:[#allocation2 + $0x28] sm:$0xff] %vm221_vm2, %v4712_v49 }
 0xfc9   :  { %4718 = vst.msk [vmem:[#allocation2 + $0x30] sm:$0xff] %vm221_vm2, %v4713_v61  ;;  %4719 = vst.msk [vmem:[#allocation2 + $0x38] sm:$0xff] %vm221_vm2, %v4714_v20 }
 0xfca   :  { %5742 = shalt.err (!%p5739_p4)
}
 0xfcb   :  { %s5755_s2 = smov 128   ;;  %s5756_s11 = smov 8  }
 0xfcc   :  { %4731 = dma.vmem_to_hbm [thread:$0]  %s4726_s25, 1024, %s8510_s24, [#allocation3], %s5755_s2, %s5755_s2, %s5756_s11  }
 0xfcd   :  { %5751 = dma.done.wait [#allocation3], 1024  }
 0xfce   :  { %5752 = vsyncadd [#allocation3], 4294966272 }
 0xfcf   :  { %4735 = vsyncpa [#allocation3], 1 }

</bundles_post_ra>
